<compile_context>
chip_gen: v5e
topology: v5e:2x2
jax: 0.10.0
libtpu: 0.0.40
codegen_flags: <defaults>
</compile_context>

<pallas_src>
import numpy as np

import jax
import jax.numpy as jnp
from jax import lax
from jax.experimental import pallas as pl
from jax.experimental.pallas import tpu as pltpu


# (cin, cout, h_in, w_in, has_bn) -- static network structure (never traced).
_BLOCK_DEFS = (
    (3, 16, 32, 32, False),
    (16, 32, 16, 16, True),
    (32, 64, 8, 8, True),
    (64, 128, 4, 4, True),
)
_BN_EPS = 0.8          # nn.BatchNorm2d(C, 0.8) -> eps = 0.8
_LEAKY_SLOPE = 0.2
_FC_OUT = 300


# ----------------------------------------------------------------------------
# Static structural matrices (numpy, built at trace time -> compile constants).
# ----------------------------------------------------------------------------
def _h_select_np(n, h_in, kh):
    """S_kh[(b,i),(b,r)] = 1 iff r == 2*i + kh - 1 (stride 2, pad 1 over H)."""
    ho = h_in // 2
    s = np.zeros((n * ho, n * h_in), np.float32)
    for b in range(n):
        for i in range(ho):
            r = 2 * i + kh - 1
            if 0 <= r < h_in:
                s[b * ho + i, b * h_in + r] = 1.0
    return s


def _w_place_np(w_in, kw):
    """P_kw[j, s] = 1 iff s == 2*j + kw - 1 (stride 2, pad 1 over W)."""
    wo = w_in // 2
    p = np.zeros((wo, w_in), np.float32)
    for j in range(wo):
        sidx = 2 * j + kw - 1
        if 0 <= sidx < w_in:
            p[j, sidx] = 1.0
    return p


# ----------------------------------------------------------------------------
# Operator construction (weight-sized work only; no activation glue).
# ----------------------------------------------------------------------------
def build_operators(params, n):
    """Returns (flat list of kernel operands, static per-block metadata)."""
    args = []
    meta = []
    for idx, (cin, cout, h_in, w_in, has_bn) in enumerate(_BLOCK_DEFS):
        ho, wo = h_in // 2, w_in // 2
        w = params[f"conv{idx}_w"]                      # (cout, cin, 3, 3) OIHW
        b = params[f"conv{idx}_b"]                      # (cout,)

        s_np = np.stack([_h_select_np(n, h_in, kh) for kh in range(3)])
        p_np = np.stack([_w_place_np(w_in, kw) for kw in range(3)])  # (3,wo,w_in)

        # B[kh, s*cin+ci, j*cout+co] = w[co, ci, kh, s - 2*j + 1] (0 outside band)
        band = jnp.einsum("kjs,ochk->hscjo", jnp.asarray(p_np), w)
        band = band.reshape(3, w_in * cin, wo * cout)

        args.append(jnp.asarray(s_np, jnp.bfloat16))    # S  (3, n*ho, n*h_in)
        args.append(band.astype(jnp.bfloat16))          # B  (3, w_in*cin, wo*cout)
        args.append(jnp.tile(b, wo).reshape(1, wo * cout).astype(jnp.float32))

        if has_bn:
            r_np = np.tile(np.eye(cout, dtype=np.float32), (wo, 1))  # (wo*cout, cout)
            args.append(jnp.asarray(r_np))                           # R   (lane -> channel)
            args.append(jnp.asarray(np.ascontiguousarray(r_np.T)))   # R^T (channel -> lane)
            args.append(params[f"bn{idx}_gamma"].reshape(1, cout).astype(jnp.float32))
            args.append(params[f"bn{idx}_beta"].reshape(1, cout).astype(jnp.float32))

        meta.append({"bn": has_bn, "wo": wo})

    # Final Linear(512, 300): fold PyTorch's NCHW flatten (co, i, j) into a
    # static permutation of fc_w plus a 0/1 row selection over i.
    sel_np = np.zeros((2, n, 2 * n), np.float32)
    for i in range(2):
        for b in range(n):
            sel_np[i, b, 2 * b + i] = 1.0
    fc_w = params["fc_w"]                                # (300, 512)
    fcw4 = fc_w.reshape(_FC_OUT, 128, 2, 2)              # (o, co, i, j)
    wfc = jnp.transpose(fcw4, (2, 3, 1, 0)).reshape(2, 2 * 128, _FC_OUT)
    args.append(jnp.asarray(sel_np, jnp.bfloat16))       # Sel (2, n, 2n)
    args.append(wfc.astype(jnp.bfloat16))                # Wfc (2, 256, 300)
    args.append(params["fc_b"].reshape(1, _FC_OUT).astype(jnp.float32))
    return args, tuple(meta)


# ----------------------------------------------------------------------------
# The single fused kernel.
# ----------------------------------------------------------------------------
def _make_kernel(block_meta):
    def kernel(*refs):
        out_ref = refs[-1]
        it = iter(refs[:-1])

        x = next(it)[...].astype(jnp.bfloat16)           # (n*32, 32*3), rows=(n,h), lanes=(w,c)
        for blk in block_meta:
            s_ref, b_ref, bias_ref = next(it), next(it), next(it)
            acc = None
            for kh in range(3):
                rows = jnp.dot(s_ref[kh], x, preferred_element_type=jnp.float32)
                part = jnp.dot(rows.astype(jnp.bfloat16), b_ref[kh],
                               preferred_element_type=jnp.float32)
                acc = part if acc is None else acc + part
            y = acc + bias_ref[...]                       # Conv2d bias
            y = jnp.where(y >= 0.0, y, _LEAKY_SLOPE * y)  # LeakyReLU(0.2)
            # Dropout2d(p=0) is the identity.
            if blk["bn"]:
                r_ref, rt_ref, g_ref, be_ref = next(it), next(it), next(it), next(it)
                cnt = float(y.shape[0] * blk["wo"])       # N*Ho*Wo (static)
                s1 = jnp.dot(jnp.sum(y, axis=0, keepdims=True), r_ref[...],
                             preferred_element_type=jnp.float32)
                s2 = jnp.dot(jnp.sum(y * y, axis=0, keepdims=True), r_ref[...],
                             preferred_element_type=jnp.float32)
                mean = s1 / cnt
                var = jnp.maximum(s2 / cnt - mean * mean, 0.0)   # biased batch var
                scale_c = g_ref[...] * lax.rsqrt(var + _BN_EPS)
                shift_c = be_ref[...] - mean * scale_c
                scale_l = jnp.dot(scale_c, rt_ref[...],
                                  preferred_element_type=jnp.float32)
                shift_l = jnp.dot(shift_c, rt_ref[...],
                                  preferred_element_type=jnp.float32)
                y = y * scale_l + shift_l
            x = y.astype(jnp.bfloat16)                    # rows=(n,i), 256 lanes=(j,co)

        # adv_layer: Linear(512, 300), NCHW flatten folded into Wfc.
        sel_ref, wfc_ref, fcb_ref = next(it), next(it), next(it)
        feat = None
        for i in range(2):
            rows = jnp.dot(sel_ref[i], x, preferred_element_type=jnp.float32)
            part = jnp.dot(rows.astype(jnp.bfloat16), wfc_ref[i],
                           preferred_element_type=jnp.float32)
            feat = part if feat is None else feat + part
        out_ref[...] = (feat + fcb_ref[...]).astype(out_ref.dtype)

    return kernel


def _full_block_spec(a):
    nd = a.ndim
    return pl.BlockSpec(tuple(a.shape), lambda i, _nd=nd: (0,) * _nd)


# ----------------------------------------------------------------------------
# Forward pass.
# ----------------------------------------------------------------------------
def convnet_cifar10_forward(params, img_flat):
    """img_flat: (N, 3*32*32) flattened NCHW, as in the PyTorch module."""
    n = img_flat.shape[0]
    ops, meta = build_operators(params, n)

    # Unflatten(1,(3,32,32)) + relayout to rows=(n,h), lanes=(w,c) (tiny, once).
    x0 = img_flat.reshape(n, 3, 32, 32).transpose(0, 2, 3, 1)
    x0 = x0.reshape(n * 32, 32 * 3).astype(jnp.float32)

    args = [x0] + ops
    out = pl.pallas_call(
        _make_kernel(meta),
        out_shape=jax.ShapeDtypeStruct((n, _FC_OUT), jnp.float32),
        grid=(1,),
        in_specs=[_full_block_spec(a) for a in args],
        out_specs=pl.BlockSpec((n, _FC_OUT), lambda i: (0, 0)),
        compiler_params=pltpu.CompilerParams(
            dimension_semantics=("arbitrary",)),
    )(*args)
    return out


# ----------------------------------------------------------------------------
# Parameters (PyTorch layouts) and a pure-JAX reference for validation.
# ----------------------------------------------------------------------------
def make_params(key):
    params = {}
    for idx, (cin, cout, _, _, _) in enumerate(_BLOCK_DEFS):
        key, k_w, k_b = jax.random.split(key, 3)
        params[f"conv{idx}_w"] = 0.05 * jax.random.normal(
            k_w, (cout, cin, 3, 3), dtype=jnp.float32)    # torch OIHW
        params[f"conv{idx}_b"] = 0.05 * jax.random.normal(
            k_b, (cout,), dtype=jnp.float32)
        params[f"bn{idx}_gamma"] = jnp.ones((cout,), jnp.float32)
        params[f"bn{idx}_beta"] = jnp.zeros((cout,), jnp.float32)
    key, k_w, k_b = jax.random.split(key, 3)
    params["fc_w"] = 0.05 * jax.random.normal(k_w, (_FC_OUT, 128 * 2 * 2),
                                              dtype=jnp.float32)
    params["fc_b"] = 0.05 * jax.random.normal(k_b, (_FC_OUT,), dtype=jnp.float32)
    return params


def reference_forward(params, img_flat):
    """Plain-XLA f32 reference mirroring the PyTorch module."""
    n = img_flat.shape[0]
    x = img_flat.reshape(n, 3, 32, 32)
    for idx, (_, cout, _, _, has_bn) in enumerate(_BLOCK_DEFS):
        x = lax.conv_general_dilated(
            x, params[f"conv{idx}_w"], window_strides=(2, 2),
            padding=((1, 1), (1, 1)),
            dimension_numbers=("NCHW", "OIHW", "NCHW"))
        x = x + params[f"conv{idx}_b"].reshape(1, cout, 1, 1)
        x = jnp.where(x >= 0.0, x, _LEAKY_SLOPE * x)
        if has_bn:
            mean = jnp.mean(x, axis=(0, 2, 3), keepdims=True)
            var = jnp.mean(jnp.square(x - mean), axis=(0, 2, 3), keepdims=True)
            x = (x - mean) * lax.rsqrt(var + _BN_EPS)
            x = (x * params[f"bn{idx}_gamma"].reshape(1, cout, 1, 1)
                 + params[f"bn{idx}_beta"].reshape(1, cout, 1, 1))
    x = x.reshape(n, -1)                                  # NCHW flatten -> (N, 512)
    return x @ params["fc_w"].T + params["fc_b"]


if __name__ == "__main__":
    key = jax.random.PRNGKey(0)
    key, k_img = jax.random.split(key)
    img = jax.random.normal(k_img, (2, 3 * 32 * 32), dtype=jnp.float32)
    params = make_params(key)

    fwd = jax.jit(convnet_cifar10_forward)
    out = jax.block_until_ready(fwd(params, img))
    assert out.shape == (2, _FC_OUT), out.shape
    assert out.dtype == jnp.float32

    ref = jax.block_until_ready(jax.jit(reference_forward)(params, img))
    max_err = float(jnp.max(jnp.abs(out - ref)))
    assert max_err < 3e-2, f"kernel/reference mismatch: max abs err {max_err}"
    print("KERNEL_OK")
</pallas_src>

<mosaic_0001>
module attributes {stable_mosaic.version = 11 : i64} {
  func.func @kernel(%arg0: i32, %arg1: memref<64x96xf32, #tpu.memory_space<vmem>>, %arg2: memref<3x32x64xbf16, #tpu.memory_space<vmem>>, %arg3: memref<3x96x256xbf16, #tpu.memory_space<vmem>>, %arg4: memref<1x256xf32, #tpu.memory_space<vmem>>, %arg5: memref<3x16x32xbf16, #tpu.memory_space<vmem>>, %arg6: memref<3x256x256xbf16, #tpu.memory_space<vmem>>, %arg7: memref<1x256xf32, #tpu.memory_space<vmem>>, %arg8: memref<256x32xf32, #tpu.memory_space<vmem>>, %arg9: memref<32x256xf32, #tpu.memory_space<vmem>>, %arg10: memref<1x32xf32, #tpu.memory_space<vmem>>, %arg11: memref<1x32xf32, #tpu.memory_space<vmem>>, %arg12: memref<3x8x16xbf16, #tpu.memory_space<vmem>>, %arg13: memref<3x256x256xbf16, #tpu.memory_space<vmem>>, %arg14: memref<1x256xf32, #tpu.memory_space<vmem>>, %arg15: memref<256x64xf32, #tpu.memory_space<vmem>>, %arg16: memref<64x256xf32, #tpu.memory_space<vmem>>, %arg17: memref<1x64xf32, #tpu.memory_space<vmem>>, %arg18: memref<1x64xf32, #tpu.memory_space<vmem>>, %arg19: memref<3x4x8xbf16, #tpu.memory_space<vmem>>, %arg20: memref<3x256x256xbf16, #tpu.memory_space<vmem>>, %arg21: memref<1x256xf32, #tpu.memory_space<vmem>>, %arg22: memref<256x128xf32, #tpu.memory_space<vmem>>, %arg23: memref<128x256xf32, #tpu.memory_space<vmem>>, %arg24: memref<1x128xf32, #tpu.memory_space<vmem>>, %arg25: memref<1x128xf32, #tpu.memory_space<vmem>>, %arg26: memref<2x2x4xbf16, #tpu.memory_space<vmem>>, %arg27: memref<2x256x300xbf16, #tpu.memory_space<vmem>>, %arg28: memref<1x300xf32, #tpu.memory_space<vmem>>, %arg29: memref<2x300xf32, #tpu.memory_space<vmem>>) attributes {dimension_semantics = [#tpu.dimension_semantics<arbitrary>], iteration_bounds = array<i64: 1>, scalar_prefetch = 0 : i64, scratch_operands = 0 : i64, tpu.core_type = #tpu.core_type<tc>, window_params = [{pipeline_mode = #tpu.pipeline_mode<synchronous>, transform_indices = @transform_0, window_bounds = array<i64: 64, 96>}, {pipeline_mode = #tpu.pipeline_mode<synchronous>, transform_indices = @transform_1, window_bounds = array<i64: 3, 32, 64>}, {pipeline_mode = #tpu.pipeline_mode<synchronous>, transform_indices = @transform_2, window_bounds = array<i64: 3, 96, 256>}, {pipeline_mode = #tpu.pipeline_mode<synchronous>, transform_indices = @transform_3, window_bounds = array<i64: 1, 256>}, {pipeline_mode = #tpu.pipeline_mode<synchronous>, transform_indices = @transform_4, window_bounds = array<i64: 3, 16, 32>}, {pipeline_mode = #tpu.pipeline_mode<synchronous>, transform_indices = @transform_5, window_bounds = array<i64: 3, 256, 256>}, {pipeline_mode = #tpu.pipeline_mode<synchronous>, transform_indices = @transform_6, window_bounds = array<i64: 1, 256>}, {pipeline_mode = #tpu.pipeline_mode<synchronous>, transform_indices = @transform_7, window_bounds = array<i64: 256, 32>}, {pipeline_mode = #tpu.pipeline_mode<synchronous>, transform_indices = @transform_8, window_bounds = array<i64: 32, 256>}, {pipeline_mode = #tpu.pipeline_mode<synchronous>, transform_indices = @transform_9, window_bounds = array<i64: 1, 32>}, {pipeline_mode = #tpu.pipeline_mode<synchronous>, transform_indices = @transform_10, window_bounds = array<i64: 1, 32>}, {pipeline_mode = #tpu.pipeline_mode<synchronous>, transform_indices = @transform_11, window_bounds = array<i64: 3, 8, 16>}, {pipeline_mode = #tpu.pipeline_mode<synchronous>, transform_indices = @transform_12, window_bounds = array<i64: 3, 256, 256>}, {pipeline_mode = #tpu.pipeline_mode<synchronous>, transform_indices = @transform_13, window_bounds = array<i64: 1, 256>}, {pipeline_mode = #tpu.pipeline_mode<synchronous>, transform_indices = @transform_14, window_bounds = array<i64: 256, 64>}, {pipeline_mode = #tpu.pipeline_mode<synchronous>, transform_indices = @transform_15, window_bounds = array<i64: 64, 256>}, {pipeline_mode = #tpu.pipeline_mode<synchronous>, transform_indices = @transform_16, window_bounds = array<i64: 1, 64>}, {pipeline_mode = #tpu.pipeline_mode<synchronous>, transform_indices = @transform_17, window_bounds = array<i64: 1, 64>}, {pipeline_mode = #tpu.pipeline_mode<synchronous>, transform_indices = @transform_18, window_bounds = array<i64: 3, 4, 8>}, {pipeline_mode = #tpu.pipeline_mode<synchronous>, transform_indices = @transform_19, window_bounds = array<i64: 3, 256, 256>}, {pipeline_mode = #tpu.pipeline_mode<synchronous>, transform_indices = @transform_20, window_bounds = array<i64: 1, 256>}, {pipeline_mode = #tpu.pipeline_mode<synchronous>, transform_indices = @transform_21, window_bounds = array<i64: 256, 128>}, {pipeline_mode = #tpu.pipeline_mode<synchronous>, transform_indices = @transform_22, window_bounds = array<i64: 128, 256>}, {pipeline_mode = #tpu.pipeline_mode<synchronous>, transform_indices = @transform_23, window_bounds = array<i64: 1, 128>}, {pipeline_mode = #tpu.pipeline_mode<synchronous>, transform_indices = @transform_24, window_bounds = array<i64: 1, 128>}, {pipeline_mode = #tpu.pipeline_mode<synchronous>, transform_indices = @transform_25, window_bounds = array<i64: 2, 2, 4>}, {pipeline_mode = #tpu.pipeline_mode<synchronous>, transform_indices = @transform_26, window_bounds = array<i64: 2, 256, 300>}, {pipeline_mode = #tpu.pipeline_mode<synchronous>, transform_indices = @transform_27, window_bounds = array<i64: 1, 300>}, {pipeline_mode = #tpu.pipeline_mode<synchronous>, transform_indices = @transform_28, window_bounds = array<i64: 2, 300>}]} {
    %c0 = arith.constant 0 : index
    %c0_0 = arith.constant 0 : index
    %0 = vector.load %arg1[%c0, %c0_0] : memref<64x96xf32, #tpu.memory_space<vmem>>, vector<64x96xf32>
    %1 = arith.truncf %0 : vector<64x96xf32> to vector<64x96xbf16>
    %c0_1 = arith.constant 0 : index
    %c0_2 = arith.constant 0 : index
    %c0_3 = arith.constant 0 : index
    %2 = vector.load %arg2[%c0_1, %c0_2, %c0_3] : memref<3x32x64xbf16, #tpu.memory_space<vmem>>, vector<1x32x64xbf16>
    %3 = vector.shape_cast %2 : vector<1x32x64xbf16> to vector<32x64xbf16>
    %cst = arith.constant dense<0.000000e+00> : vector<32x96xf32>
    %4 = tpu.matmul %3, %1, %cst {dimension_numbers = #tpu.dot_dimension_numbers<[1], [0], [0], [1], [0, 0, 1, 1], [], []>} : vector<32x64xbf16>, vector<64x96xbf16>, vector<32x96xf32> -> vector<32x96xf32>
    %5 = arith.truncf %4 : vector<32x96xf32> to vector<32x96xbf16>
    %c0_4 = arith.constant 0 : index
    %c0_5 = arith.constant 0 : index
    %c0_6 = arith.constant 0 : index
    %6 = vector.load %arg3[%c0_4, %c0_5, %c0_6] : memref<3x96x256xbf16, #tpu.memory_space<vmem>>, vector<1x96x256xbf16>
    %7 = vector.shape_cast %6 : vector<1x96x256xbf16> to vector<96x256xbf16>
    %cst_7 = arith.constant dense<0.000000e+00> : vector<32x256xf32>
    %8 = tpu.matmul %5, %7, %cst_7 {dimension_numbers = #tpu.dot_dimension_numbers<[1], [0], [0], [1], [0, 0, 1, 1], [], []>} : vector<32x96xbf16>, vector<96x256xbf16>, vector<32x256xf32> -> vector<32x256xf32>
    %c1 = arith.constant 1 : index
    %c0_8 = arith.constant 0 : index
    %c0_9 = arith.constant 0 : index
    %9 = vector.load %arg2[%c1, %c0_8, %c0_9] : memref<3x32x64xbf16, #tpu.memory_space<vmem>>, vector<1x32x64xbf16>
    %10 = vector.shape_cast %9 : vector<1x32x64xbf16> to vector<32x64xbf16>
    %cst_10 = arith.constant dense<0.000000e+00> : vector<32x96xf32>
    %11 = tpu.matmul %10, %1, %cst_10 {dimension_numbers = #tpu.dot_dimension_numbers<[1], [0], [0], [1], [0, 0, 1, 1], [], []>} : vector<32x64xbf16>, vector<64x96xbf16>, vector<32x96xf32> -> vector<32x96xf32>
    %12 = arith.truncf %11 : vector<32x96xf32> to vector<32x96xbf16>
    %c1_11 = arith.constant 1 : index
    %c0_12 = arith.constant 0 : index
    %c0_13 = arith.constant 0 : index
    %13 = vector.load %arg3[%c1_11, %c0_12, %c0_13] : memref<3x96x256xbf16, #tpu.memory_space<vmem>>, vector<1x96x256xbf16>
    %14 = vector.shape_cast %13 : vector<1x96x256xbf16> to vector<96x256xbf16>
    %cst_14 = arith.constant dense<0.000000e+00> : vector<32x256xf32>
    %15 = tpu.matmul %12, %14, %cst_14 {dimension_numbers = #tpu.dot_dimension_numbers<[1], [0], [0], [1], [0, 0, 1, 1], [], []>} : vector<32x96xbf16>, vector<96x256xbf16>, vector<32x256xf32> -> vector<32x256xf32>
    %16 = arith.addf %8, %15 : vector<32x256xf32>
    %c2 = arith.constant 2 : index
    %c0_15 = arith.constant 0 : index
    %c0_16 = arith.constant 0 : index
    %17 = vector.load %arg2[%c2, %c0_15, %c0_16] : memref<3x32x64xbf16, #tpu.memory_space<vmem>>, vector<1x32x64xbf16>
    %18 = vector.shape_cast %17 : vector<1x32x64xbf16> to vector<32x64xbf16>
    %cst_17 = arith.constant dense<0.000000e+00> : vector<32x96xf32>
    %19 = tpu.matmul %18, %1, %cst_17 {dimension_numbers = #tpu.dot_dimension_numbers<[1], [0], [0], [1], [0, 0, 1, 1], [], []>} : vector<32x64xbf16>, vector<64x96xbf16>, vector<32x96xf32> -> vector<32x96xf32>
    %20 = arith.truncf %19 : vector<32x96xf32> to vector<32x96xbf16>
    %c2_18 = arith.constant 2 : index
    %c0_19 = arith.constant 0 : index
    %c0_20 = arith.constant 0 : index
    %21 = vector.load %arg3[%c2_18, %c0_19, %c0_20] : memref<3x96x256xbf16, #tpu.memory_space<vmem>>, vector<1x96x256xbf16>
    %22 = vector.shape_cast %21 : vector<1x96x256xbf16> to vector<96x256xbf16>
    %cst_21 = arith.constant dense<0.000000e+00> : vector<32x256xf32>
    %23 = tpu.matmul %20, %22, %cst_21 {dimension_numbers = #tpu.dot_dimension_numbers<[1], [0], [0], [1], [0, 0, 1, 1], [], []>} : vector<32x96xbf16>, vector<96x256xbf16>, vector<32x256xf32> -> vector<32x256xf32>
    %24 = arith.addf %16, %23 : vector<32x256xf32>
    %c0_22 = arith.constant 0 : index
    %c0_23 = arith.constant 0 : index
    %25 = vector.load %arg4[%c0_22, %c0_23] : memref<1x256xf32, #tpu.memory_space<vmem>>, vector<1x256xf32>
    %26 = vector.broadcast %25 : vector<1x256xf32> to vector<32x256xf32>
    %27 = arith.addf %24, %26 : vector<32x256xf32>
    %cst_24 = arith.constant 0.000000e+00 : f32
    %28 = vector.broadcast %cst_24 : f32 to vector<32x256xf32>
    %29 = arith.cmpf oge, %27, %28 : vector<32x256xf32>
    %cst_25 = arith.constant 2.000000e-01 : f32
    %30 = vector.broadcast %cst_25 : f32 to vector<32x256xf32>
    %31 = arith.mulf %30, %27 : vector<32x256xf32>
    %32 = arith.select %29, %27, %31 : vector<32x256xi1>, vector<32x256xf32>
    %33 = arith.truncf %32 : vector<32x256xf32> to vector<32x256xbf16>
    %c0_26 = arith.constant 0 : index
    %c0_27 = arith.constant 0 : index
    %c0_28 = arith.constant 0 : index
    %34 = vector.load %arg5[%c0_26, %c0_27, %c0_28] : memref<3x16x32xbf16, #tpu.memory_space<vmem>>, vector<1x16x32xbf16>
    %35 = vector.shape_cast %34 : vector<1x16x32xbf16> to vector<16x32xbf16>
    %cst_29 = arith.constant dense<0.000000e+00> : vector<16x256xf32>
    %36 = tpu.matmul %35, %33, %cst_29 {dimension_numbers = #tpu.dot_dimension_numbers<[1], [0], [0], [1], [0, 0, 1, 1], [], []>} : vector<16x32xbf16>, vector<32x256xbf16>, vector<16x256xf32> -> vector<16x256xf32>
    %37 = arith.truncf %36 : vector<16x256xf32> to vector<16x256xbf16>
    %c0_30 = arith.constant 0 : index
    %c0_31 = arith.constant 0 : index
    %c0_32 = arith.constant 0 : index
    %38 = vector.load %arg6[%c0_30, %c0_31, %c0_32] : memref<3x256x256xbf16, #tpu.memory_space<vmem>>, vector<1x256x256xbf16>
    %39 = vector.shape_cast %38 : vector<1x256x256xbf16> to vector<256x256xbf16>
    %cst_33 = arith.constant dense<0.000000e+00> : vector<16x256xf32>
    %40 = tpu.matmul %37, %39, %cst_33 {dimension_numbers = #tpu.dot_dimension_numbers<[1], [0], [0], [1], [0, 0, 1, 1], [], []>} : vector<16x256xbf16>, vector<256x256xbf16>, vector<16x256xf32> -> vector<16x256xf32>
    %c1_34 = arith.constant 1 : index
    %c0_35 = arith.constant 0 : index
    %c0_36 = arith.constant 0 : index
    %41 = vector.load %arg5[%c1_34, %c0_35, %c0_36] : memref<3x16x32xbf16, #tpu.memory_space<vmem>>, vector<1x16x32xbf16>
    %42 = vector.shape_cast %41 : vector<1x16x32xbf16> to vector<16x32xbf16>
    %cst_37 = arith.constant dense<0.000000e+00> : vector<16x256xf32>
    %43 = tpu.matmul %42, %33, %cst_37 {dimension_numbers = #tpu.dot_dimension_numbers<[1], [0], [0], [1], [0, 0, 1, 1], [], []>} : vector<16x32xbf16>, vector<32x256xbf16>, vector<16x256xf32> -> vector<16x256xf32>
    %44 = arith.truncf %43 : vector<16x256xf32> to vector<16x256xbf16>
    %c1_38 = arith.constant 1 : index
    %c0_39 = arith.constant 0 : index
    %c0_40 = arith.constant 0 : index
    %45 = vector.load %arg6[%c1_38, %c0_39, %c0_40] : memref<3x256x256xbf16, #tpu.memory_space<vmem>>, vector<1x256x256xbf16>
    %46 = vector.shape_cast %45 : vector<1x256x256xbf16> to vector<256x256xbf16>
    %cst_41 = arith.constant dense<0.000000e+00> : vector<16x256xf32>
    %47 = tpu.matmul %44, %46, %cst_41 {dimension_numbers = #tpu.dot_dimension_numbers<[1], [0], [0], [1], [0, 0, 1, 1], [], []>} : vector<16x256xbf16>, vector<256x256xbf16>, vector<16x256xf32> -> vector<16x256xf32>
    %48 = arith.addf %40, %47 : vector<16x256xf32>
    %c2_42 = arith.constant 2 : index
    %c0_43 = arith.constant 0 : index
    %c0_44 = arith.constant 0 : index
    %49 = vector.load %arg5[%c2_42, %c0_43, %c0_44] : memref<3x16x32xbf16, #tpu.memory_space<vmem>>, vector<1x16x32xbf16>
    %50 = vector.shape_cast %49 : vector<1x16x32xbf16> to vector<16x32xbf16>
    %cst_45 = arith.constant dense<0.000000e+00> : vector<16x256xf32>
    %51 = tpu.matmul %50, %33, %cst_45 {dimension_numbers = #tpu.dot_dimension_numbers<[1], [0], [0], [1], [0, 0, 1, 1], [], []>} : vector<16x32xbf16>, vector<32x256xbf16>, vector<16x256xf32> -> vector<16x256xf32>
    %52 = arith.truncf %51 : vector<16x256xf32> to vector<16x256xbf16>
    %c2_46 = arith.constant 2 : index
    %c0_47 = arith.constant 0 : index
    %c0_48 = arith.constant 0 : index
    %53 = vector.load %arg6[%c2_46, %c0_47, %c0_48] : memref<3x256x256xbf16, #tpu.memory_space<vmem>>, vector<1x256x256xbf16>
    %54 = vector.shape_cast %53 : vector<1x256x256xbf16> to vector<256x256xbf16>
    %cst_49 = arith.constant dense<0.000000e+00> : vector<16x256xf32>
    %55 = tpu.matmul %52, %54, %cst_49 {dimension_numbers = #tpu.dot_dimension_numbers<[1], [0], [0], [1], [0, 0, 1, 1], [], []>} : vector<16x256xbf16>, vector<256x256xbf16>, vector<16x256xf32> -> vector<16x256xf32>
    %56 = arith.addf %48, %55 : vector<16x256xf32>
    %c0_50 = arith.constant 0 : index
    %c0_51 = arith.constant 0 : index
    %57 = vector.load %arg7[%c0_50, %c0_51] : memref<1x256xf32, #tpu.memory_space<vmem>>, vector<1x256xf32>
    %58 = vector.broadcast %57 : vector<1x256xf32> to vector<16x256xf32>
    %59 = arith.addf %56, %58 : vector<16x256xf32>
    %cst_52 = arith.constant 0.000000e+00 : f32
    %60 = vector.broadcast %cst_52 : f32 to vector<16x256xf32>
    %61 = arith.cmpf oge, %59, %60 : vector<16x256xf32>
    %cst_53 = arith.constant 2.000000e-01 : f32
    %62 = vector.broadcast %cst_53 : f32 to vector<16x256xf32>
    %63 = arith.mulf %62, %59 : vector<16x256xf32>
    %64 = arith.select %61, %59, %63 : vector<16x256xi1>, vector<16x256xf32>
    %cst_54 = arith.constant dense<0.000000e+00> : vector<256xf32>
    %65 = vector.multi_reduction <add>, %64, %cst_54 [0] : vector<16x256xf32> to vector<256xf32>
    %66 = vector.shape_cast %65 : vector<256xf32> to vector<1x256xf32>
    %c0_55 = arith.constant 0 : index
    %c0_56 = arith.constant 0 : index
    %67 = vector.load %arg8[%c0_55, %c0_56] : memref<256x32xf32, #tpu.memory_space<vmem>>, vector<256x32xf32>
    %cst_57 = arith.constant dense<0.000000e+00> : vector<1x32xf32>
    %68 = tpu.matmul %66, %67, %cst_57 {dimension_numbers = #tpu.dot_dimension_numbers<[1], [0], [0], [1], [0, 0, 1, 1], [], []>} : vector<1x256xf32>, vector<256x32xf32>, vector<1x32xf32> -> vector<1x32xf32>
    %69 = arith.mulf %64, %64 : vector<16x256xf32>
    %cst_58 = arith.constant dense<0.000000e+00> : vector<256xf32>
    %70 = vector.multi_reduction <add>, %69, %cst_58 [0] : vector<16x256xf32> to vector<256xf32>
    %71 = vector.shape_cast %70 : vector<256xf32> to vector<1x256xf32>
    %c0_59 = arith.constant 0 : index
    %c0_60 = arith.constant 0 : index
    %72 = vector.load %arg8[%c0_59, %c0_60] : memref<256x32xf32, #tpu.memory_space<vmem>>, vector<256x32xf32>
    %cst_61 = arith.constant dense<0.000000e+00> : vector<1x32xf32>
    %73 = tpu.matmul %71, %72, %cst_61 {dimension_numbers = #tpu.dot_dimension_numbers<[1], [0], [0], [1], [0, 0, 1, 1], [], []>} : vector<1x256xf32>, vector<256x32xf32>, vector<1x32xf32> -> vector<1x32xf32>
    %cst_62 = arith.constant 1.280000e+02 : f32
    %74 = vector.broadcast %cst_62 : f32 to vector<1x32xf32>
    %75 = arith.divf %68, %74 : vector<1x32xf32>
    %cst_63 = arith.constant 1.280000e+02 : f32
    %76 = vector.broadcast %cst_63 : f32 to vector<1x32xf32>
    %77 = arith.divf %73, %76 : vector<1x32xf32>
    %78 = arith.mulf %75, %75 : vector<1x32xf32>
    %79 = arith.subf %77, %78 : vector<1x32xf32>
    %cst_64 = arith.constant 0.000000e+00 : f32
    %80 = vector.broadcast %cst_64 : f32 to vector<1x32xf32>
    %81 = arith.maximumf %79, %80 : vector<1x32xf32>
    %c0_65 = arith.constant 0 : index
    %c0_66 = arith.constant 0 : index
    %82 = vector.load %arg10[%c0_65, %c0_66] : memref<1x32xf32, #tpu.memory_space<vmem>>, vector<1x32xf32>
    %cst_67 = arith.constant 8.000000e-01 : f32
    %83 = vector.broadcast %cst_67 : f32 to vector<1x32xf32>
    %84 = arith.addf %81, %83 : vector<1x32xf32>
    %85 = math.rsqrt %84 : vector<1x32xf32>
    %86 = arith.mulf %82, %85 : vector<1x32xf32>
    %c0_68 = arith.constant 0 : index
    %c0_69 = arith.constant 0 : index
    %87 = vector.load %arg11[%c0_68, %c0_69] : memref<1x32xf32, #tpu.memory_space<vmem>>, vector<1x32xf32>
    %88 = arith.mulf %75, %86 : vector<1x32xf32>
    %89 = arith.subf %87, %88 : vector<1x32xf32>
    %c0_70 = arith.constant 0 : index
    %c0_71 = arith.constant 0 : index
    %90 = vector.load %arg9[%c0_70, %c0_71] : memref<32x256xf32, #tpu.memory_space<vmem>>, vector<32x256xf32>
    %cst_72 = arith.constant dense<0.000000e+00> : vector<1x256xf32>
    %91 = tpu.matmul %86, %90, %cst_72 {dimension_numbers = #tpu.dot_dimension_numbers<[1], [0], [0], [1], [0, 0, 1, 1], [], []>} : vector<1x32xf32>, vector<32x256xf32>, vector<1x256xf32> -> vector<1x256xf32>
    %c0_73 = arith.constant 0 : index
    %c0_74 = arith.constant 0 : index
    %92 = vector.load %arg9[%c0_73, %c0_74] : memref<32x256xf32, #tpu.memory_space<vmem>>, vector<32x256xf32>
    %cst_75 = arith.constant dense<0.000000e+00> : vector<1x256xf32>
    %93 = tpu.matmul %89, %92, %cst_75 {dimension_numbers = #tpu.dot_dimension_numbers<[1], [0], [0], [1], [0, 0, 1, 1], [], []>} : vector<1x32xf32>, vector<32x256xf32>, vector<1x256xf32> -> vector<1x256xf32>
    %94 = vector.broadcast %91 : vector<1x256xf32> to vector<16x256xf32>
    %95 = arith.mulf %64, %94 : vector<16x256xf32>
    %96 = vector.broadcast %93 : vector<1x256xf32> to vector<16x256xf32>
    %97 = arith.addf %95, %96 : vector<16x256xf32>
    %98 = arith.truncf %97 : vector<16x256xf32> to vector<16x256xbf16>
    %c0_76 = arith.constant 0 : index
    %c0_77 = arith.constant 0 : index
    %c0_78 = arith.constant 0 : index
    %99 = vector.load %arg12[%c0_76, %c0_77, %c0_78] : memref<3x8x16xbf16, #tpu.memory_space<vmem>>, vector<1x8x16xbf16>
    %100 = vector.shape_cast %99 : vector<1x8x16xbf16> to vector<8x16xbf16>
    %cst_79 = arith.constant dense<0.000000e+00> : vector<8x256xf32>
    %101 = tpu.matmul %100, %98, %cst_79 {dimension_numbers = #tpu.dot_dimension_numbers<[1], [0], [0], [1], [0, 0, 1, 1], [], []>} : vector<8x16xbf16>, vector<16x256xbf16>, vector<8x256xf32> -> vector<8x256xf32>
    %102 = arith.truncf %101 : vector<8x256xf32> to vector<8x256xbf16>
    %c0_80 = arith.constant 0 : index
    %c0_81 = arith.constant 0 : index
    %c0_82 = arith.constant 0 : index
    %103 = vector.load %arg13[%c0_80, %c0_81, %c0_82] : memref<3x256x256xbf16, #tpu.memory_space<vmem>>, vector<1x256x256xbf16>
    %104 = vector.shape_cast %103 : vector<1x256x256xbf16> to vector<256x256xbf16>
    %cst_83 = arith.constant dense<0.000000e+00> : vector<8x256xf32>
    %105 = tpu.matmul %102, %104, %cst_83 {dimension_numbers = #tpu.dot_dimension_numbers<[1], [0], [0], [1], [0, 0, 1, 1], [], []>} : vector<8x256xbf16>, vector<256x256xbf16>, vector<8x256xf32> -> vector<8x256xf32>
    %c1_84 = arith.constant 1 : index
    %c0_85 = arith.constant 0 : index
    %c0_86 = arith.constant 0 : index
    %106 = vector.load %arg12[%c1_84, %c0_85, %c0_86] : memref<3x8x16xbf16, #tpu.memory_space<vmem>>, vector<1x8x16xbf16>
    %107 = vector.shape_cast %106 : vector<1x8x16xbf16> to vector<8x16xbf16>
    %cst_87 = arith.constant dense<0.000000e+00> : vector<8x256xf32>
    %108 = tpu.matmul %107, %98, %cst_87 {dimension_numbers = #tpu.dot_dimension_numbers<[1], [0], [0], [1], [0, 0, 1, 1], [], []>} : vector<8x16xbf16>, vector<16x256xbf16>, vector<8x256xf32> -> vector<8x256xf32>
    %109 = arith.truncf %108 : vector<8x256xf32> to vector<8x256xbf16>
    %c1_88 = arith.constant 1 : index
    %c0_89 = arith.constant 0 : index
    %c0_90 = arith.constant 0 : index
    %110 = vector.load %arg13[%c1_88, %c0_89, %c0_90] : memref<3x256x256xbf16, #tpu.memory_space<vmem>>, vector<1x256x256xbf16>
    %111 = vector.shape_cast %110 : vector<1x256x256xbf16> to vector<256x256xbf16>
    %cst_91 = arith.constant dense<0.000000e+00> : vector<8x256xf32>
    %112 = tpu.matmul %109, %111, %cst_91 {dimension_numbers = #tpu.dot_dimension_numbers<[1], [0], [0], [1], [0, 0, 1, 1], [], []>} : vector<8x256xbf16>, vector<256x256xbf16>, vector<8x256xf32> -> vector<8x256xf32>
    %113 = arith.addf %105, %112 : vector<8x256xf32>
    %c2_92 = arith.constant 2 : index
    %c0_93 = arith.constant 0 : index
    %c0_94 = arith.constant 0 : index
    %114 = vector.load %arg12[%c2_92, %c0_93, %c0_94] : memref<3x8x16xbf16, #tpu.memory_space<vmem>>, vector<1x8x16xbf16>
    %115 = vector.shape_cast %114 : vector<1x8x16xbf16> to vector<8x16xbf16>
    %cst_95 = arith.constant dense<0.000000e+00> : vector<8x256xf32>
    %116 = tpu.matmul %115, %98, %cst_95 {dimension_numbers = #tpu.dot_dimension_numbers<[1], [0], [0], [1], [0, 0, 1, 1], [], []>} : vector<8x16xbf16>, vector<16x256xbf16>, vector<8x256xf32> -> vector<8x256xf32>
    %117 = arith.truncf %116 : vector<8x256xf32> to vector<8x256xbf16>
    %c2_96 = arith.constant 2 : index
    %c0_97 = arith.constant 0 : index
    %c0_98 = arith.constant 0 : index
    %118 = vector.load %arg13[%c2_96, %c0_97, %c0_98] : memref<3x256x256xbf16, #tpu.memory_space<vmem>>, vector<1x256x256xbf16>
    %119 = vector.shape_cast %118 : vector<1x256x256xbf16> to vector<256x256xbf16>
    %cst_99 = arith.constant dense<0.000000e+00> : vector<8x256xf32>
    %120 = tpu.matmul %117, %119, %cst_99 {dimension_numbers = #tpu.dot_dimension_numbers<[1], [0], [0], [1], [0, 0, 1, 1], [], []>} : vector<8x256xbf16>, vector<256x256xbf16>, vector<8x256xf32> -> vector<8x256xf32>
    %121 = arith.addf %113, %120 : vector<8x256xf32>
    %c0_100 = arith.constant 0 : index
    %c0_101 = arith.constant 0 : index
    %122 = vector.load %arg14[%c0_100, %c0_101] : memref<1x256xf32, #tpu.memory_space<vmem>>, vector<1x256xf32>
    %123 = vector.broadcast %122 : vector<1x256xf32> to vector<8x256xf32>
    %124 = arith.addf %121, %123 : vector<8x256xf32>
    %cst_102 = arith.constant 0.000000e+00 : f32
    %125 = vector.broadcast %cst_102 : f32 to vector<8x256xf32>
    %126 = arith.cmpf oge, %124, %125 : vector<8x256xf32>
    %cst_103 = arith.constant 2.000000e-01 : f32
    %127 = vector.broadcast %cst_103 : f32 to vector<8x256xf32>
    %128 = arith.mulf %127, %124 : vector<8x256xf32>
    %129 = arith.select %126, %124, %128 : vector<8x256xi1>, vector<8x256xf32>
    %cst_104 = arith.constant dense<0.000000e+00> : vector<256xf32>
    %130 = vector.multi_reduction <add>, %129, %cst_104 [0] : vector<8x256xf32> to vector<256xf32>
    %131 = vector.shape_cast %130 : vector<256xf32> to vector<1x256xf32>
    %c0_105 = arith.constant 0 : index
    %c0_106 = arith.constant 0 : index
    %132 = vector.load %arg15[%c0_105, %c0_106] : memref<256x64xf32, #tpu.memory_space<vmem>>, vector<256x64xf32>
    %cst_107 = arith.constant dense<0.000000e+00> : vector<1x64xf32>
    %133 = tpu.matmul %131, %132, %cst_107 {dimension_numbers = #tpu.dot_dimension_numbers<[1], [0], [0], [1], [0, 0, 1, 1], [], []>} : vector<1x256xf32>, vector<256x64xf32>, vector<1x64xf32> -> vector<1x64xf32>
    %134 = arith.mulf %129, %129 : vector<8x256xf32>
    %cst_108 = arith.constant dense<0.000000e+00> : vector<256xf32>
    %135 = vector.multi_reduction <add>, %134, %cst_108 [0] : vector<8x256xf32> to vector<256xf32>
    %136 = vector.shape_cast %135 : vector<256xf32> to vector<1x256xf32>
    %c0_109 = arith.constant 0 : index
    %c0_110 = arith.constant 0 : index
    %137 = vector.load %arg15[%c0_109, %c0_110] : memref<256x64xf32, #tpu.memory_space<vmem>>, vector<256x64xf32>
    %cst_111 = arith.constant dense<0.000000e+00> : vector<1x64xf32>
    %138 = tpu.matmul %136, %137, %cst_111 {dimension_numbers = #tpu.dot_dimension_numbers<[1], [0], [0], [1], [0, 0, 1, 1], [], []>} : vector<1x256xf32>, vector<256x64xf32>, vector<1x64xf32> -> vector<1x64xf32>
    %cst_112 = arith.constant 3.200000e+01 : f32
    %139 = vector.broadcast %cst_112 : f32 to vector<1x64xf32>
    %140 = arith.divf %133, %139 : vector<1x64xf32>
    %cst_113 = arith.constant 3.200000e+01 : f32
    %141 = vector.broadcast %cst_113 : f32 to vector<1x64xf32>
    %142 = arith.divf %138, %141 : vector<1x64xf32>
    %143 = arith.mulf %140, %140 : vector<1x64xf32>
    %144 = arith.subf %142, %143 : vector<1x64xf32>
    %cst_114 = arith.constant 0.000000e+00 : f32
    %145 = vector.broadcast %cst_114 : f32 to vector<1x64xf32>
    %146 = arith.maximumf %144, %145 : vector<1x64xf32>
    %c0_115 = arith.constant 0 : index
    %c0_116 = arith.constant 0 : index
    %147 = vector.load %arg17[%c0_115, %c0_116] : memref<1x64xf32, #tpu.memory_space<vmem>>, vector<1x64xf32>
    %cst_117 = arith.constant 8.000000e-01 : f32
    %148 = vector.broadcast %cst_117 : f32 to vector<1x64xf32>
    %149 = arith.addf %146, %148 : vector<1x64xf32>
    %150 = math.rsqrt %149 : vector<1x64xf32>
    %151 = arith.mulf %147, %150 : vector<1x64xf32>
    %c0_118 = arith.constant 0 : index
    %c0_119 = arith.constant 0 : index
    %152 = vector.load %arg18[%c0_118, %c0_119] : memref<1x64xf32, #tpu.memory_space<vmem>>, vector<1x64xf32>
    %153 = arith.mulf %140, %151 : vector<1x64xf32>
    %154 = arith.subf %152, %153 : vector<1x64xf32>
    %c0_120 = arith.constant 0 : index
    %c0_121 = arith.constant 0 : index
    %155 = vector.load %arg16[%c0_120, %c0_121] : memref<64x256xf32, #tpu.memory_space<vmem>>, vector<64x256xf32>
    %cst_122 = arith.constant dense<0.000000e+00> : vector<1x256xf32>
    %156 = tpu.matmul %151, %155, %cst_122 {dimension_numbers = #tpu.dot_dimension_numbers<[1], [0], [0], [1], [0, 0, 1, 1], [], []>} : vector<1x64xf32>, vector<64x256xf32>, vector<1x256xf32> -> vector<1x256xf32>
    %c0_123 = arith.constant 0 : index
    %c0_124 = arith.constant 0 : index
    %157 = vector.load %arg16[%c0_123, %c0_124] : memref<64x256xf32, #tpu.memory_space<vmem>>, vector<64x256xf32>
    %cst_125 = arith.constant dense<0.000000e+00> : vector<1x256xf32>
    %158 = tpu.matmul %154, %157, %cst_125 {dimension_numbers = #tpu.dot_dimension_numbers<[1], [0], [0], [1], [0, 0, 1, 1], [], []>} : vector<1x64xf32>, vector<64x256xf32>, vector<1x256xf32> -> vector<1x256xf32>
    %159 = vector.broadcast %156 : vector<1x256xf32> to vector<8x256xf32>
    %160 = arith.mulf %129, %159 : vector<8x256xf32>
    %161 = vector.broadcast %158 : vector<1x256xf32> to vector<8x256xf32>
    %162 = arith.addf %160, %161 : vector<8x256xf32>
    %163 = arith.truncf %162 : vector<8x256xf32> to vector<8x256xbf16>
    %c0_126 = arith.constant 0 : index
    %c0_127 = arith.constant 0 : index
    %c0_128 = arith.constant 0 : index
    %164 = vector.load %arg19[%c0_126, %c0_127, %c0_128] : memref<3x4x8xbf16, #tpu.memory_space<vmem>>, vector<1x4x8xbf16>
    %165 = vector.shape_cast %164 : vector<1x4x8xbf16> to vector<4x8xbf16>
    %cst_129 = arith.constant dense<0.000000e+00> : vector<4x256xf32>
    %166 = tpu.matmul %165, %163, %cst_129 {dimension_numbers = #tpu.dot_dimension_numbers<[1], [0], [0], [1], [0, 0, 1, 1], [], []>} : vector<4x8xbf16>, vector<8x256xbf16>, vector<4x256xf32> -> vector<4x256xf32>
    %167 = arith.truncf %166 : vector<4x256xf32> to vector<4x256xbf16>
    %c0_130 = arith.constant 0 : index
    %c0_131 = arith.constant 0 : index
    %c0_132 = arith.constant 0 : index
    %168 = vector.load %arg20[%c0_130, %c0_131, %c0_132] : memref<3x256x256xbf16, #tpu.memory_space<vmem>>, vector<1x256x256xbf16>
    %169 = vector.shape_cast %168 : vector<1x256x256xbf16> to vector<256x256xbf16>
    %cst_133 = arith.constant dense<0.000000e+00> : vector<4x256xf32>
    %170 = tpu.matmul %167, %169, %cst_133 {dimension_numbers = #tpu.dot_dimension_numbers<[1], [0], [0], [1], [0, 0, 1, 1], [], []>} : vector<4x256xbf16>, vector<256x256xbf16>, vector<4x256xf32> -> vector<4x256xf32>
    %c1_134 = arith.constant 1 : index
    %c0_135 = arith.constant 0 : index
    %c0_136 = arith.constant 0 : index
    %171 = vector.load %arg19[%c1_134, %c0_135, %c0_136] : memref<3x4x8xbf16, #tpu.memory_space<vmem>>, vector<1x4x8xbf16>
    %172 = vector.shape_cast %171 : vector<1x4x8xbf16> to vector<4x8xbf16>
    %cst_137 = arith.constant dense<0.000000e+00> : vector<4x256xf32>
    %173 = tpu.matmul %172, %163, %cst_137 {dimension_numbers = #tpu.dot_dimension_numbers<[1], [0], [0], [1], [0, 0, 1, 1], [], []>} : vector<4x8xbf16>, vector<8x256xbf16>, vector<4x256xf32> -> vector<4x256xf32>
    %174 = arith.truncf %173 : vector<4x256xf32> to vector<4x256xbf16>
    %c1_138 = arith.constant 1 : index
    %c0_139 = arith.constant 0 : index
    %c0_140 = arith.constant 0 : index
    %175 = vector.load %arg20[%c1_138, %c0_139, %c0_140] : memref<3x256x256xbf16, #tpu.memory_space<vmem>>, vector<1x256x256xbf16>
    %176 = vector.shape_cast %175 : vector<1x256x256xbf16> to vector<256x256xbf16>
    %cst_141 = arith.constant dense<0.000000e+00> : vector<4x256xf32>
    %177 = tpu.matmul %174, %176, %cst_141 {dimension_numbers = #tpu.dot_dimension_numbers<[1], [0], [0], [1], [0, 0, 1, 1], [], []>} : vector<4x256xbf16>, vector<256x256xbf16>, vector<4x256xf32> -> vector<4x256xf32>
    %178 = arith.addf %170, %177 : vector<4x256xf32>
    %c2_142 = arith.constant 2 : index
    %c0_143 = arith.constant 0 : index
    %c0_144 = arith.constant 0 : index
    %179 = vector.load %arg19[%c2_142, %c0_143, %c0_144] : memref<3x4x8xbf16, #tpu.memory_space<vmem>>, vector<1x4x8xbf16>
    %180 = vector.shape_cast %179 : vector<1x4x8xbf16> to vector<4x8xbf16>
    %cst_145 = arith.constant dense<0.000000e+00> : vector<4x256xf32>
    %181 = tpu.matmul %180, %163, %cst_145 {dimension_numbers = #tpu.dot_dimension_numbers<[1], [0], [0], [1], [0, 0, 1, 1], [], []>} : vector<4x8xbf16>, vector<8x256xbf16>, vector<4x256xf32> -> vector<4x256xf32>
    %182 = arith.truncf %181 : vector<4x256xf32> to vector<4x256xbf16>
    %c2_146 = arith.constant 2 : index
    %c0_147 = arith.constant 0 : index
    %c0_148 = arith.constant 0 : index
    %183 = vector.load %arg20[%c2_146, %c0_147, %c0_148] : memref<3x256x256xbf16, #tpu.memory_space<vmem>>, vector<1x256x256xbf16>
    %184 = vector.shape_cast %183 : vector<1x256x256xbf16> to vector<256x256xbf16>
    %cst_149 = arith.constant dense<0.000000e+00> : vector<4x256xf32>
    %185 = tpu.matmul %182, %184, %cst_149 {dimension_numbers = #tpu.dot_dimension_numbers<[1], [0], [0], [1], [0, 0, 1, 1], [], []>} : vector<4x256xbf16>, vector<256x256xbf16>, vector<4x256xf32> -> vector<4x256xf32>
    %186 = arith.addf %178, %185 : vector<4x256xf32>
    %c0_150 = arith.constant 0 : index
    %c0_151 = arith.constant 0 : index
    %187 = vector.load %arg21[%c0_150, %c0_151] : memref<1x256xf32, #tpu.memory_space<vmem>>, vector<1x256xf32>
    %188 = vector.broadcast %187 : vector<1x256xf32> to vector<4x256xf32>
    %189 = arith.addf %186, %188 : vector<4x256xf32>
    %cst_152 = arith.constant 0.000000e+00 : f32
    %190 = vector.broadcast %cst_152 : f32 to vector<4x256xf32>
    %191 = arith.cmpf oge, %189, %190 : vector<4x256xf32>
    %cst_153 = arith.constant 2.000000e-01 : f32
    %192 = vector.broadcast %cst_153 : f32 to vector<4x256xf32>
    %193 = arith.mulf %192, %189 : vector<4x256xf32>
    %194 = arith.select %191, %189, %193 : vector<4x256xi1>, vector<4x256xf32>
    %cst_154 = arith.constant dense<0.000000e+00> : vector<256xf32>
    %195 = vector.multi_reduction <add>, %194, %cst_154 [0] : vector<4x256xf32> to vector<256xf32>
    %196 = vector.shape_cast %195 : vector<256xf32> to vector<1x256xf32>
    %c0_155 = arith.constant 0 : index
    %c0_156 = arith.constant 0 : index
    %197 = vector.load %arg22[%c0_155, %c0_156] : memref<256x128xf32, #tpu.memory_space<vmem>>, vector<256x128xf32>
    %cst_157 = arith.constant dense<0.000000e+00> : vector<1x128xf32>
    %198 = tpu.matmul %196, %197, %cst_157 {dimension_numbers = #tpu.dot_dimension_numbers<[1], [0], [0], [1], [0, 0, 1, 1], [], []>} : vector<1x256xf32>, vector<256x128xf32>, vector<1x128xf32> -> vector<1x128xf32>
    %199 = arith.mulf %194, %194 : vector<4x256xf32>
    %cst_158 = arith.constant dense<0.000000e+00> : vector<256xf32>
    %200 = vector.multi_reduction <add>, %199, %cst_158 [0] : vector<4x256xf32> to vector<256xf32>
    %201 = vector.shape_cast %200 : vector<256xf32> to vector<1x256xf32>
    %c0_159 = arith.constant 0 : index
    %c0_160 = arith.constant 0 : index
    %202 = vector.load %arg22[%c0_159, %c0_160] : memref<256x128xf32, #tpu.memory_space<vmem>>, vector<256x128xf32>
    %cst_161 = arith.constant dense<0.000000e+00> : vector<1x128xf32>
    %203 = tpu.matmul %201, %202, %cst_161 {dimension_numbers = #tpu.dot_dimension_numbers<[1], [0], [0], [1], [0, 0, 1, 1], [], []>} : vector<1x256xf32>, vector<256x128xf32>, vector<1x128xf32> -> vector<1x128xf32>
    %cst_162 = arith.constant 8.000000e+00 : f32
    %204 = vector.broadcast %cst_162 : f32 to vector<1x128xf32>
    %205 = arith.divf %198, %204 : vector<1x128xf32>
    %cst_163 = arith.constant 8.000000e+00 : f32
    %206 = vector.broadcast %cst_163 : f32 to vector<1x128xf32>
    %207 = arith.divf %203, %206 : vector<1x128xf32>
    %208 = arith.mulf %205, %205 : vector<1x128xf32>
    %209 = arith.subf %207, %208 : vector<1x128xf32>
    %cst_164 = arith.constant 0.000000e+00 : f32
    %210 = vector.broadcast %cst_164 : f32 to vector<1x128xf32>
    %211 = arith.maximumf %209, %210 : vector<1x128xf32>
    %c0_165 = arith.constant 0 : index
    %c0_166 = arith.constant 0 : index
    %212 = vector.load %arg24[%c0_165, %c0_166] : memref<1x128xf32, #tpu.memory_space<vmem>>, vector<1x128xf32>
    %cst_167 = arith.constant 8.000000e-01 : f32
    %213 = vector.broadcast %cst_167 : f32 to vector<1x128xf32>
    %214 = arith.addf %211, %213 : vector<1x128xf32>
    %215 = math.rsqrt %214 : vector<1x128xf32>
    %216 = arith.mulf %212, %215 : vector<1x128xf32>
    %c0_168 = arith.constant 0 : index
    %c0_169 = arith.constant 0 : index
    %217 = vector.load %arg25[%c0_168, %c0_169] : memref<1x128xf32, #tpu.memory_space<vmem>>, vector<1x128xf32>
    %218 = arith.mulf %205, %216 : vector<1x128xf32>
    %219 = arith.subf %217, %218 : vector<1x128xf32>
    %c0_170 = arith.constant 0 : index
    %c0_171 = arith.constant 0 : index
    %220 = vector.load %arg23[%c0_170, %c0_171] : memref<128x256xf32, #tpu.memory_space<vmem>>, vector<128x256xf32>
    %cst_172 = arith.constant dense<0.000000e+00> : vector<1x256xf32>
    %221 = tpu.matmul %216, %220, %cst_172 {dimension_numbers = #tpu.dot_dimension_numbers<[1], [0], [0], [1], [0, 0, 1, 1], [], []>} : vector<1x128xf32>, vector<128x256xf32>, vector<1x256xf32> -> vector<1x256xf32>
    %c0_173 = arith.constant 0 : index
    %c0_174 = arith.constant 0 : index
    %222 = vector.load %arg23[%c0_173, %c0_174] : memref<128x256xf32, #tpu.memory_space<vmem>>, vector<128x256xf32>
    %cst_175 = arith.constant dense<0.000000e+00> : vector<1x256xf32>
    %223 = tpu.matmul %219, %222, %cst_175 {dimension_numbers = #tpu.dot_dimension_numbers<[1], [0], [0], [1], [0, 0, 1, 1], [], []>} : vector<1x128xf32>, vector<128x256xf32>, vector<1x256xf32> -> vector<1x256xf32>
    %224 = vector.broadcast %221 : vector<1x256xf32> to vector<4x256xf32>
    %225 = arith.mulf %194, %224 : vector<4x256xf32>
    %226 = vector.broadcast %223 : vector<1x256xf32> to vector<4x256xf32>
    %227 = arith.addf %225, %226 : vector<4x256xf32>
    %228 = arith.truncf %227 : vector<4x256xf32> to vector<4x256xbf16>
    %c0_176 = arith.constant 0 : index
    %c0_177 = arith.constant 0 : index
    %c0_178 = arith.constant 0 : index
    %229 = vector.load %arg26[%c0_176, %c0_177, %c0_178] : memref<2x2x4xbf16, #tpu.memory_space<vmem>>, vector<1x2x4xbf16>
    %230 = vector.shape_cast %229 : vector<1x2x4xbf16> to vector<2x4xbf16>
    %cst_179 = arith.constant dense<0.000000e+00> : vector<2x256xf32>
    %231 = tpu.matmul %230, %228, %cst_179 {dimension_numbers = #tpu.dot_dimension_numbers<[1], [0], [0], [1], [0, 0, 1, 1], [], []>} : vector<2x4xbf16>, vector<4x256xbf16>, vector<2x256xf32> -> vector<2x256xf32>
    %232 = arith.truncf %231 : vector<2x256xf32> to vector<2x256xbf16>
    %c0_180 = arith.constant 0 : index
    %c0_181 = arith.constant 0 : index
    %c0_182 = arith.constant 0 : index
    %233 = vector.load %arg27[%c0_180, %c0_181, %c0_182] : memref<2x256x300xbf16, #tpu.memory_space<vmem>>, vector<1x256x300xbf16>
    %234 = vector.shape_cast %233 : vector<1x256x300xbf16> to vector<256x300xbf16>
    %cst_183 = arith.constant dense<0.000000e+00> : vector<2x300xf32>
    %235 = tpu.matmul %232, %234, %cst_183 {dimension_numbers = #tpu.dot_dimension_numbers<[1], [0], [0], [1], [0, 0, 1, 1], [], []>} : vector<2x256xbf16>, vector<256x300xbf16>, vector<2x300xf32> -> vector<2x300xf32>
    %c1_184 = arith.constant 1 : index
    %c0_185 = arith.constant 0 : index
    %c0_186 = arith.constant 0 : index
    %236 = vector.load %arg26[%c1_184, %c0_185, %c0_186] : memref<2x2x4xbf16, #tpu.memory_space<vmem>>, vector<1x2x4xbf16>
    %237 = vector.shape_cast %236 : vector<1x2x4xbf16> to vector<2x4xbf16>
    %cst_187 = arith.constant dense<0.000000e+00> : vector<2x256xf32>
    %238 = tpu.matmul %237, %228, %cst_187 {dimension_numbers = #tpu.dot_dimension_numbers<[1], [0], [0], [1], [0, 0, 1, 1], [], []>} : vector<2x4xbf16>, vector<4x256xbf16>, vector<2x256xf32> -> vector<2x256xf32>
    %239 = arith.truncf %238 : vector<2x256xf32> to vector<2x256xbf16>
    %c1_188 = arith.constant 1 : index
    %c0_189 = arith.constant 0 : index
    %c0_190 = arith.constant 0 : index
    %240 = vector.load %arg27[%c1_188, %c0_189, %c0_190] : memref<2x256x300xbf16, #tpu.memory_space<vmem>>, vector<1x256x300xbf16>
    %241 = vector.shape_cast %240 : vector<1x256x300xbf16> to vector<256x300xbf16>
    %cst_191 = arith.constant dense<0.000000e+00> : vector<2x300xf32>
    %242 = tpu.matmul %239, %241, %cst_191 {dimension_numbers = #tpu.dot_dimension_numbers<[1], [0], [0], [1], [0, 0, 1, 1], [], []>} : vector<2x256xbf16>, vector<256x300xbf16>, vector<2x300xf32> -> vector<2x300xf32>
    %243 = arith.addf %235, %242 : vector<2x300xf32>
    %c0_192 = arith.constant 0 : index
    %c0_193 = arith.constant 0 : index
    %244 = vector.load %arg28[%c0_192, %c0_193] : memref<1x300xf32, #tpu.memory_space<vmem>>, vector<1x300xf32>
    %245 = vector.broadcast %244 : vector<1x300xf32> to vector<2x300xf32>
    %246 = arith.addf %243, %245 : vector<2x300xf32>
    %c0_194 = arith.constant 0 : index
    %c0_195 = arith.constant 0 : index
    %247 = vector.load %arg29[%c0_194, %c0_195] : memref<2x300xf32, #tpu.memory_space<vmem>>, vector<2x300xf32>
    tpu.vector_store %arg29[%c0_194, %c0_195], %246 {strides = array<i32>} : memref<2x300xf32, #tpu.memory_space<vmem>>, vector<2x300xf32>,
    return
  }
  func.func @transform_0(%arg0: i32) -> (i32, i32) {
    %c0_i32 = arith.constant 0 : i32
    %c0_i32_0 = arith.constant 0 : i32
    %c0_i32_1 = arith.constant 0 : i32
    return %c0_i32, %c0_i32_0 : i32, i32
  }
  func.func @transform_1(%arg0: i32) -> (i32, i32, i32) {
    %c0_i32 = arith.constant 0 : i32
    %c0_i32_0 = arith.constant 0 : i32
    %c0_i32_1 = arith.constant 0 : i32
    %c0_i32_2 = arith.constant 0 : i32
    return %c0_i32, %c0_i32_0, %c0_i32_1 : i32, i32, i32
  }
  func.func @transform_2(%arg0: i32) -> (i32, i32, i32) {
    %c0_i32 = arith.constant 0 : i32
    %c0_i32_0 = arith.constant 0 : i32
    %c0_i32_1 = arith.constant 0 : i32
    %c0_i32_2 = arith.constant 0 : i32
    return %c0_i32, %c0_i32_0, %c0_i32_1 : i32, i32, i32
  }
  func.func @transform_3(%arg0: i32) -> (i32, i32) {
    %c0_i32 = arith.constant 0 : i32
    %c0_i32_0 = arith.constant 0 : i32
    %c0_i32_1 = arith.constant 0 : i32
    return %c0_i32, %c0_i32_0 : i32, i32
  }
  func.func @transform_4(%arg0: i32) -> (i32, i32, i32) {
    %c0_i32 = arith.constant 0 : i32
    %c0_i32_0 = arith.constant 0 : i32
    %c0_i32_1 = arith.constant 0 : i32
    %c0_i32_2 = arith.constant 0 : i32
    return %c0_i32, %c0_i32_0, %c0_i32_1 : i32, i32, i32
  }
  func.func @transform_5(%arg0: i32) -> (i32, i32, i32) {
    %c0_i32 = arith.constant 0 : i32
    %c0_i32_0 = arith.constant 0 : i32
    %c0_i32_1 = arith.constant 0 : i32
    %c0_i32_2 = arith.constant 0 : i32
    return %c0_i32, %c0_i32_0, %c0_i32_1 : i32, i32, i32
  }
  func.func @transform_6(%arg0: i32) -> (i32, i32) {
    %c0_i32 = arith.constant 0 : i32
    %c0_i32_0 = arith.constant 0 : i32
    %c0_i32_1 = arith.constant 0 : i32
    return %c0_i32, %c0_i32_0 : i32, i32
  }
  func.func @transform_7(%arg0: i32) -> (i32, i32) {
    %c0_i32 = arith.constant 0 : i32
    %c0_i32_0 = arith.constant 0 : i32
    %c0_i32_1 = arith.constant 0 : i32
    return %c0_i32, %c0_i32_0 : i32, i32
  }
  func.func @transform_8(%arg0: i32) -> (i32, i32) {
    %c0_i32 = arith.constant 0 : i32
    %c0_i32_0 = arith.constant 0 : i32
    %c0_i32_1 = arith.constant 0 : i32
    return %c0_i32, %c0_i32_0 : i32, i32
  }
  func.func @transform_9(%arg0: i32) -> (i32, i32) {
    %c0_i32 = arith.constant 0 : i32
    %c0_i32_0 = arith.constant 0 : i32
    %c0_i32_1 = arith.constant 0 : i32
    return %c0_i32, %c0_i32_0 : i32, i32
  }
  func.func @transform_10(%arg0: i32) -> (i32, i32) {
    %c0_i32 = arith.constant 0 : i32
    %c0_i32_0 = arith.constant 0 : i32
    %c0_i32_1 = arith.constant 0 : i32
    return %c0_i32, %c0_i32_0 : i32, i32
  }
  func.func @transform_11(%arg0: i32) -> (i32, i32, i32) {
    %c0_i32 = arith.constant 0 : i32
    %c0_i32_0 = arith.constant 0 : i32
    %c0_i32_1 = arith.constant 0 : i32
    %c0_i32_2 = arith.constant 0 : i32
    return %c0_i32, %c0_i32_0, %c0_i32_1 : i32, i32, i32
  }
  func.func @transform_12(%arg0: i32) -> (i32, i32, i32) {
    %c0_i32 = arith.constant 0 : i32
    %c0_i32_0 = arith.constant 0 : i32
    %c0_i32_1 = arith.constant 0 : i32
    %c0_i32_2 = arith.constant 0 : i32
    return %c0_i32, %c0_i32_0, %c0_i32_1 : i32, i32, i32
  }
  func.func @transform_13(%arg0: i32) -> (i32, i32) {
    %c0_i32 = arith.constant 0 : i32
    %c0_i32_0 = arith.constant 0 : i32
    %c0_i32_1 = arith.constant 0 : i32
    return %c0_i32, %c0_i32_0 : i32, i32
  }
  func.func @transform_14(%arg0: i32) -> (i32, i32) {
    %c0_i32 = arith.constant 0 : i32
    %c0_i32_0 = arith.constant 0 : i32
    %c0_i32_1 = arith.constant 0 : i32
    return %c0_i32, %c0_i32_0 : i32, i32
  }
  func.func @transform_15(%arg0: i32) -> (i32, i32) {
    %c0_i32 = arith.constant 0 : i32
    %c0_i32_0 = arith.constant 0 : i32
    %c0_i32_1 = arith.constant 0 : i32
    return %c0_i32, %c0_i32_0 : i32, i32
  }
  func.func @transform_16(%arg0: i32) -> (i32, i32) {
    %c0_i32 = arith.constant 0 : i32
    %c0_i32_0 = arith.constant 0 : i32
    %c0_i32_1 = arith.constant 0 : i32
    return %c0_i32, %c0_i32_0 : i32, i32
  }
  func.func @transform_17(%arg0: i32) -> (i32, i32) {
    %c0_i32 = arith.constant 0 : i32
    %c0_i32_0 = arith.constant 0 : i32
    %c0_i32_1 = arith.constant 0 : i32
    return %c0_i32, %c0_i32_0 : i32, i32
  }
  func.func @transform_18(%arg0: i32) -> (i32, i32, i32) {
    %c0_i32 = arith.constant 0 : i32
    %c0_i32_0 = arith.constant 0 : i32
    %c0_i32_1 = arith.constant 0 : i32
    %c0_i32_2 = arith.constant 0 : i32
    return %c0_i32, %c0_i32_0, %c0_i32_1 : i32, i32, i32
  }
  func.func @transform_19(%arg0: i32) -> (i32, i32, i32) {
    %c0_i32 = arith.constant 0 : i32
    %c0_i32_0 = arith.constant 0 : i32
    %c0_i32_1 = arith.constant 0 : i32
    %c0_i32_2 = arith.constant 0 : i32
    return %c0_i32, %c0_i32_0, %c0_i32_1 : i32, i32, i32
  }
  func.func @transform_20(%arg0: i32) -> (i32, i32) {
    %c0_i32 = arith.constant 0 : i32
    %c0_i32_0 = arith.constant 0 : i32
    %c0_i32_1 = arith.constant 0 : i32
    return %c0_i32, %c0_i32_0 : i32, i32
  }
  func.func @transform_21(%arg0: i32) -> (i32, i32) {
    %c0_i32 = arith.constant 0 : i32
    %c0_i32_0 = arith.constant 0 : i32
    %c0_i32_1 = arith.constant 0 : i32
    return %c0_i32, %c0_i32_0 : i32, i32
  }
  func.func @transform_22(%arg0: i32) -> (i32, i32) {
    %c0_i32 = arith.constant 0 : i32
    %c0_i32_0 = arith.constant 0 : i32
    %c0_i32_1 = arith.constant 0 : i32
    return %c0_i32, %c0_i32_0 : i32, i32
  }
  func.func @transform_23(%arg0: i32) -> (i32, i32) {
    %c0_i32 = arith.constant 0 : i32
    %c0_i32_0 = arith.constant 0 : i32
    %c0_i32_1 = arith.constant 0 : i32
    return %c0_i32, %c0_i32_0 : i32, i32
  }
  func.func @transform_24(%arg0: i32) -> (i32, i32) {
    %c0_i32 = arith.constant 0 : i32
    %c0_i32_0 = arith.constant 0 : i32
    %c0_i32_1 = arith.constant 0 : i32
    return %c0_i32, %c0_i32_0 : i32, i32
  }
  func.func @transform_25(%arg0: i32) -> (i32, i32, i32) {
    %c0_i32 = arith.constant 0 : i32
    %c0_i32_0 = arith.constant 0 : i32
    %c0_i32_1 = arith.constant 0 : i32
    %c0_i32_2 = arith.constant 0 : i32
    return %c0_i32, %c0_i32_0, %c0_i32_1 : i32, i32, i32
  }
  func.func @transform_26(%arg0: i32) -> (i32, i32, i32) {
    %c0_i32 = arith.constant 0 : i32
    %c0_i32_0 = arith.constant 0 : i32
    %c0_i32_1 = arith.constant 0 : i32
    %c0_i32_2 = arith.constant 0 : i32
    return %c0_i32, %c0_i32_0, %c0_i32_1 : i32, i32, i32
  }
  func.func @transform_27(%arg0: i32) -> (i32, i32) {
    %c0_i32 = arith.constant 0 : i32
    %c0_i32_0 = arith.constant 0 : i32
    %c0_i32_1 = arith.constant 0 : i32
    return %c0_i32, %c0_i32_0 : i32, i32
  }
  func.func @transform_28(%arg0: i32) -> (i32, i32) {
    %c0_i32 = arith.constant 0 : i32
    %c0_i32_0 = arith.constant 0 : i32
    %c0_i32_1 = arith.constant 0 : i32
    return %c0_i32, %c0_i32_0 : i32, i32
  }
}

</mosaic_0001>

<bundles_post_ra>
// kernel: tile.23
= control target key start
LH: loop header
LB: loop body
LE: loop exit
PB: predicated region body
PF: predicated region fallthrough
CT: control target
= control target key end

     0   :  { %s28_s0 = inlined_call_operand.vmem [shape: f32[16], index: 0, kind: input, shape index: {}]   ;;  %s29_s1 = inlined_call_operand.vmem [shape: f32[16,16], index: 1, kind: output, shape index: {}]  }
   0x1   :  { %v4_v0 = vld [vmem:[%s28_s0] ss:$0 sm:$0xff] }
   0x2   :  { %5 = vst [vmem:[%s29_s1] sm:$0xff] %v4_v0 }
   0x3   :  { %8 = vst [vmem:[%s29_s1 + $0x8] sm:$0xff] %v4_v0 }

// kernel: tile.24
= control target key start
LH: loop header
LB: loop body
LE: loop exit
PB: predicated region body
PF: predicated region fallthrough
CT: control target
= control target key end

     0   :  { %s7_s6 = smov 3  ;;  %s21_s9 = smov 3  ;;  %vm4_vm0 = vcmask 130048   ;;  %vm11_vm1 = vcmask 1048448   ;;  %vm18_vm2 = vcmask 917248   ;;  %vm25_vm3 = vcmask 786048   ;;  %s129_s0 = inlined_call_operand.vmem [shape: f32[16,16], index: 0, kind: input, shape index: {}]   ;;  %s130_s1 = inlined_call_operand.vmem [shape: f32[1,256], index: 1, kind: output, shape index: {}]  }
   0x1   :  { %v67_v0 = vld [vmem:[%s129_s0 + $0x7] ss:$8 sm:%s7_s6]   ;;  %s82_s10 = smov 112   ;;  %v69_v1 = vld [vmem:[%s129_s0 + $0x5] ss:$8 sm:%s21_s9]   ;;  %s83_s13 = smov 80  }
   0x2   :  { %9 = vrot.lane.b32.xlu0 %v67_v0, %s82_s10  ;;  %23 = vrot.lane.b32.xlu1 %v69_v1, %s83_s13  ;;  %s14_s14 = smov 3  ;;  %s28_s15 = smov 3  ;;  %vm32_vm4 = vcmask 654848   ;;  %vm39_vm5 = vcmask 523648   ;;  %vm46_vm6 = vcmask 392448   ;;  %vm53_vm7 = vcmask 261248  }
   0x3   :  { %s35_s16 = smov 3  ;;  %v68_v3 = vld [vmem:[%s129_s0 + $0x6] ss:$8 sm:%s14_s14]   ;;  %s84_s21 = smov 48   ;;  %v70_v4 = vld [vmem:[%s129_s0 + $0x4] ss:$8 sm:%s28_s15]  }
   0x4   :  { %v71_v2 = vld [vmem:[%s129_s0 + $0x3] ss:$8 sm:%s35_s16]   ;;  %s42_s24 = smov 3  ;;  %s85_s25 = smov 96  }
   0x5   :  { %37 = vrot.lane.b32.xlu2 %v71_v2, %s84_s21  ;;  %s86_s26 = smov 64   ;;  %s49_s27 = smov 3  ;;  %v72_v5 = vld [vmem:[%s129_s0 + $0x2] ss:$8 sm:%s42_s24]  }
   0x6   :  { %v73_v6 = vld [vmem:[%s129_s0 + $0x1] ss:$8 sm:%s49_s27]   ;;  %s87_s3 = smov 32   ;;  %s88_s4 = smov 16  }
   0x7   :  { %s2_s5 = smov 3 }
   0x8   :  { %v3_v7 = vld [vmem:[%s129_s0] ss:$8 sm:%s2_s5]  }
   0x9   :  { %5 = vst.msk [vmem:[#allocation0] ss:$8 sm:$0x3] %vm4_vm0, %v3_v7  }
   0xa   :  { %16 = vrot.lane.b32.xlu0 %v68_v3, %s85_s25  ;;  %30 = vrot.lane.b32.xlu1 %v70_v4, %s86_s26 }
   0xd   :  { %44 = vrot.lane.b32.xlu2 %v72_v5, %s87_s3 }
  0x12   :  { %51 = vrot.lane.b32.xlu0 %v73_v6, %s88_s4 }
  0x5f   :  { %v38_v8 = vpop.permute.xlu2 %37  }
  0x67   :  { %v45_v9 = vpop.permute.xlu2 %44  }
  0x74   :  { %v10_v10 = vpop.permute.xlu0 %9   ;;  %v24_v11 = vpop.permute.xlu1 %23  }
  0x75   :  { %12 = vst.msk [vmem:[#allocation0] ss:$8 sm:$0x3] %vm11_vm1, %v10_v10  }
  0x7c   :  { %v17_v12 = vpop.permute.xlu0 %16   ;;  %v31_v13 = vpop.permute.xlu1 %30  }
  0x7d   :  { %19 = vst.msk [vmem:[#allocation0] ss:$8 sm:$0x3] %vm18_vm2, %v17_v12  }
  0x7e   :  { %26 = vst.msk [vmem:[#allocation0] ss:$8 sm:$0x3] %vm25_vm3, %v24_v11  }
  0x7f   :  { %33 = vst.msk [vmem:[#allocation0] ss:$8 sm:$0x3] %vm32_vm4, %v31_v13  }
  0x80   :  { %40 = vst.msk [vmem:[#allocation0] ss:$8 sm:$0x3] %vm39_vm5, %v38_v8  }
  0x81   :  { %47 = vst.msk [vmem:[#allocation0] ss:$8 sm:$0x3] %vm46_vm6, %v45_v9  }
  0x84   :  { %v52_v14 = vpop.permute.xlu0 %51  }
  0x85   :  { %54 = vst.msk [vmem:[#allocation0] ss:$8 sm:$0x3] %vm53_vm7, %v52_v14  }
  0x8c   :  { %v57_v15 = vld [vmem:[#allocation0] sm:$0x1]  ;;  %v62_v16 = vld [vmem:[#allocation0 + $0x8] sm:$0x1] }
  0x8d   :  { %60 = vst [vmem:[%s130_s1] sm:$0x1] %v57_v15 }
  0x8e   :  { %74 = vst [vmem:[%s130_s1 + $0x1] sm:$0x1] %v62_v16 }

// kernel: tile.28
= control target key start
LH: loop header
LB: loop body
LE: loop exit
PB: predicated region body
PF: predicated region fallthrough
CT: control target
= control target key end

     0   :  { %s22_s0 = inlined_call_operand.vmem [shape: f32[32], index: 0, kind: input, shape index: {}]   ;;  %s23_s1 = inlined_call_operand.vmem [shape: f32[8,32], index: 1, kind: output, shape index: {}]  }
   0x1   :  { %v4_v0 = vld [vmem:[%s22_s0] ss:$0 sm:$0xff] }
   0x2   :  { %5 = vst [vmem:[%s23_s1] sm:$0xff] %v4_v0 }

// kernel: tile.29
= control target key start
LH: loop header
LB: loop body
LE: loop exit
PB: predicated region body
PF: predicated region fallthrough
CT: control target
= control target key end

     0   :  { %s7_s6 = smov 3  ;;  %s46_s9 = smov 96   ;;  %vm4_vm0 = vcmask 261120   ;;  %vm11_vm1 = vcmask 1048320   ;;  %vm18_vm2 = vcmask 785920   ;;  %vm25_vm3 = vcmask 523520   ;;  %s77_s0 = inlined_call_operand.vmem [shape: f32[8,32], index: 0, kind: input, shape index: {}]   ;;  %s78_s1 = inlined_call_operand.vmem [shape: f32[1,256], index: 1, kind: output, shape index: {}]  }
   0x1   :  { %v39_v0 = vld [vmem:[%s77_s0 + $0x3] ss:$4 sm:%s7_s6]   ;;  %s21_s10 = smov 3  ;;  %s14_s13 = smov 3 }
   0x2   :  { %9 = vrot.lane.b32.xlu0 %v39_v0, %s46_s9  ;;  %v41_v1 = vld [vmem:[%s77_s0 + $0x1] ss:$4 sm:%s21_s10]   ;;  %s47_s14 = smov 32   ;;  %s48_s17 = smov 64  }
   0x3   :  { %23 = vrot.lane.b32.xlu1 %v41_v1, %s47_s14  ;;  %v40_v2 = vld [vmem:[%s77_s0 + $0x2] ss:$4 sm:%s14_s13]   ;;  %s2_s18 = smov 3 }
   0x4   :  { %v3_v3 = vld [vmem:[%s77_s0] ss:$4 sm:%s2_s18]  }
   0x5   :  { %5 = vst.msk [vmem:[#allocation0] ss:$8 sm:$0x3] %vm4_vm0, %v3_v3  }
   0xa   :  { %16 = vrot.lane.b32.xlu0 %v40_v2, %s48_s17 }
  0x74   :  { %v10_v4 = vpop.permute.xlu0 %9  }
  0x75   :  { %12 = vst.msk [vmem:[#allocation0] ss:$8 sm:$0x3] %vm11_vm1, %v10_v4   ;;  %v24_v5 = vpop.permute.xlu1 %23  }
  0x7c   :  { %v17_v6 = vpop.permute.xlu0 %16  }
  0x7d   :  { %19 = vst.msk [vmem:[#allocation0] ss:$8 sm:$0x3] %vm18_vm2, %v17_v6  }
  0x7e   :  { %26 = vst.msk [vmem:[#allocation0] ss:$8 sm:$0x3] %vm25_vm3, %v24_v5  }
  0x85   :  { %v29_v7 = vld [vmem:[#allocation0] sm:$0x1]  ;;  %v34_v8 = vld [vmem:[#allocation0 + $0x8] sm:$0x1] }
  0x86   :  { %32 = vst [vmem:[%s78_s1] sm:$0x1] %v29_v7 }
  0x87   :  { %42 = vst [vmem:[%s78_s1 + $0x1] sm:$0x1] %v34_v8 }

// kernel: tile.33
= control target key start
LH: loop header
LB: loop body
LE: loop exit
PB: predicated region body
PF: predicated region fallthrough
CT: control target
= control target key end

     0   :  { %s22_s0 = inlined_call_operand.vmem [shape: f32[64], index: 0, kind: input, shape index: {}]   ;;  %s23_s1 = inlined_call_operand.vmem [shape: f32[4,64], index: 1, kind: output, shape index: {}]  }
   0x1   :  { %v4_v0 = vld [vmem:[%s22_s0] ss:$0 sm:$0xff] }
   0x2   :  { %5 = vst [vmem:[%s23_s1] sm:$0xf] %v4_v0 }

// kernel: tile.34
= control target key start
LH: loop header
LB: loop body
LE: loop exit
PB: predicated region body
PF: predicated region fallthrough
CT: control target
= control target key end

     0   :  { %s6_s8 = smov 3  ;;  %vm8_vm0 = vcmask 523264   ;;  %s31_s9 = smov 64   ;;  %vm15_vm1 = vcmask 1048064   ;;  %s51_s0 = inlined_call_operand.vmem [shape: f32[4,64], index: 0, kind: input, shape index: {}]   ;;  %s52_s1 = inlined_call_operand.vmem [shape: f32[1,256], index: 1, kind: output, shape index: {}]  }
   0x1   :  { %v4_v0 = vld [vmem:[%s51_s0] sm:$0xf]  ;;  %s11_s0 = smov 3 }
   0x2   :  { %5 = vst [vmem:[#allocation1] sm:$0xf] %v4_v0 }
   0x9   :  { %v12_v1 = vld [vmem:[#allocation1 + $0x1] ss:$2 sm:%s11_s0]   ;;  %v7_v2 = vld [vmem:[#allocation1] ss:$2 sm:%s6_s8]  }
   0xa   :  { %13 = vrot.lane.b32.xlu0 %v12_v1, %s31_s9  ;;  %9 = vst.msk [vmem:[#allocation0] ss:$8 sm:$0x3] %vm8_vm0, %v7_v2  }
  0x7c   :  { %v14_v3 = vpop.permute.xlu0 %13  }
  0x7d   :  { %16 = vst.msk [vmem:[#allocation0] ss:$8 sm:$0x3] %vm15_vm1, %v14_v3  }
  0x84   :  { %v19_v4 = vld [vmem:[#allocation0] sm:$0x1]  ;;  %v24_v5 = vld [vmem:[#allocation0 + $0x8] sm:$0x1] }
  0x85   :  { %22 = vst [vmem:[%s52_s1] sm:$0x1] %v19_v4 }
  0x86   :  { %29 = vst [vmem:[%s52_s1 + $0x1] sm:$0x1] %v24_v5 }

// kernel: tile.38
= control target key start
LH: loop header
LB: loop body
LE: loop exit
PB: predicated region body
PF: predicated region fallthrough
CT: control target
= control target key end

     0   :  { %s22_s0 = inlined_call_operand.vmem [shape: f32[128], index: 0, kind: input, shape index: {}]   ;;  %s23_s1 = inlined_call_operand.vmem [shape: f32[2,128], index: 1, kind: output, shape index: {}]  }
   0x1   :  { %v4_v0 = vld [vmem:[%s22_s0] ss:$0 sm:$0xff] }
   0x2   :  { %5 = vst [vmem:[%s23_s1] sm:$0x3] %v4_v0 }

// kernel: convnet_cifar10_forward.1
= control target key start
LH: loop header
LB: loop body
LE: loop exit
PB: predicated region body
PF: predicated region fallthrough
CT: control target
= control target key end

     0   :  { %s11003_s0 = inlined_call_operand.vmem [shape: f32[64,96], index: 0, kind: input, shape index: {}]   ;;  %s11004_s1 = inlined_call_operand.vmem [shape: bf16[3,32,64], index: 1, kind: input, shape index: {}]   ;;  %s11005_s2 = inlined_call_operand.vmem [shape: bf16[3,96,256], index: 2, kind: input, shape index: {}]   ;;  %s11006_s3 = inlined_call_operand.vmem [shape: f32[1,256], index: 3, kind: input, shape index: {}]   ;;  %s11007_s4 = inlined_call_operand.vmem [shape: bf16[3,16,32], index: 4, kind: input, shape index: {}]   ;;  %s11008_s5 = inlined_call_operand.vmem [shape: bf16[3,256,256], index: 5, kind: input, shape index: {}]   ;;  %s11009_s6 = inlined_call_operand.vmem [shape: f32[1,256], index: 6, kind: input, shape index: {}]   ;;  %s11010_s7 = inlined_call_operand.vmem [shape: f32[256,32], index: 7, kind: input, shape index: {}]   ;;  %s11011_s8 = inlined_call_operand.vmem [shape: f32[32,256], index: 8, kind: input, shape index: {}]   ;;  %s11012_s9 = inlined_call_operand.vmem [shape: f32[1,32], index: 9, kind: input, shape index: {}]   ;;  %s11013_s10 = inlined_call_operand.vmem [shape: f32[1,32], index: 10, kind: input, shape index: {}]   ;;  %s11014_s11 = inlined_call_operand.vmem [shape: bf16[3,8,16], index: 11, kind: input, shape index: {}]   ;;  %s11015_s12 = inlined_call_operand.vmem [shape: bf16[3,256,256], index: 12, kind: input, shape index: {}]   ;;  %s11016_s13 = inlined_call_operand.vmem [shape: f32[1,256], index: 13, kind: input, shape index: {}]   ;;  %s11017_s14 = inlined_call_operand.vmem [shape: f32[256,64], index: 14, kind: input, shape index: {}]   ;;  %s11018_s15 = inlined_call_operand.vmem [shape: f32[64,256], index: 15, kind: input, shape index: {}]   ;;  %s11019_s16 = inlined_call_operand.vmem [shape: f32[1,64], index: 16, kind: input, shape index: {}]   ;;  %s11020_s17 = inlined_call_operand.vmem [shape: f32[1,64], index: 17, kind: input, shape index: {}]   ;;  %s11021_s18 = inlined_call_operand.vmem [shape: bf16[3,4,8], index: 18, kind: input, shape index: {}]   ;;  %s11022_s19 = inlined_call_operand.vmem [shape: bf16[3,256,256], index: 19, kind: input, shape index: {}]   ;;  %s11023_s20 = inlined_call_operand.vmem [shape: f32[1,256], index: 20, kind: input, shape index: {}]   ;;  %s11024_s21 = inlined_call_operand.vmem [shape: f32[256,128], index: 21, kind: input, shape index: {}]   ;;  %s11025_s22 = inlined_call_operand.vmem [shape: f32[128,256], index: 22, kind: input, shape index: {}]   ;;  %s11026_s23 = inlined_call_operand.vmem [shape: f32[1,128], index: 23, kind: input, shape index: {}]   ;;  %s11027_s24 = inlined_call_operand.vmem [shape: f32[1,128], index: 24, kind: input, shape index: {}]   ;;  %s11028_s25 = inlined_call_operand.vmem [shape: bf16[2,2,4], index: 25, kind: input, shape index: {}]   ;;  %s11029_s26 = inlined_call_operand.vmem [shape: bf16[2,256,300], index: 26, kind: input, shape index: {}]   ;;  %s11030_s27 = inlined_call_operand.vmem [shape: f32[1,300], index: 27, kind: input, shape index: {}]   ;;  %s11031_s28 = inlined_call_operand.hbm [shape: f32[2,300], index: 28, kind: output, shape index: {}]  }
   0x1   :  { %11041 = sst [smem:[#allocation5_spill]] %s11003_s0 }
   0x2   :  { %11042 = sst [smem:[#allocation6_spill]] %s11004_s1 }
   0x3   :  { %11043 = sst [smem:[#allocation7_spill]] %s11005_s2 }
   0x4   :  { %11044 = sst [smem:[#allocation8_spill]] %s11006_s3 }
   0x5   :  { %11045 = sst [smem:[#allocation9_spill]] %s11007_s4 }
   0x6   :  { %11046 = sst [smem:[#allocation10_spill]] %s11008_s5 }
   0x7   :  { %11047 = sst [smem:[#allocation11_spill]] %s11009_s6 }
   0x8   :  { %11048 = sst [smem:[#allocation12_spill]] %s11010_s7 }
   0x9   :  { %11049 = sst [smem:[#allocation13_spill]] %s11011_s8 }
   0xa   :  { %11050 = sst [smem:[#allocation14_spill]] %s11012_s9 }
   0xb   :  { %11051 = sst [smem:[#allocation15_spill]] %s11013_s10 }
   0xc   :  { %11052 = sst [smem:[#allocation16_spill]] %s11014_s11 }
   0xd   :  { %11053 = sst [smem:[#allocation17_spill]] %s11015_s12 }
   0xe   :  { %s11054_s9 = sld [smem:[#allocation5_spill]] }
   0xf   :  { %s11055_s8 = sld [smem:[#allocation7_spill]] }
  0x14   :  { %v97_v0 = vld [vmem:[%s11054_s9 + $0x30] sm:$0xff]  ;;  %v98_v1 = vld [vmem:[%s11054_s9 + $0x38] sm:$0xff]  ;;  %v95_v2 = vld [vmem:[%s11054_s9 + $0x20] sm:$0xff] }
  0x15   :  { %v7680_v3 = vpack.c.bf16 %v98_v1, %v97_v0  ;;  %v96_v4 = vld [vmem:[%s11054_s9 + $0x28] sm:$0xff]  ;;  %v93_v6 = vld [vmem:[%s11054_s9 + $0x10] sm:$0xff]  ;;  %v94_v7 = vld [vmem:[%s11054_s9 + $0x18] sm:$0xff] }
  0x16   :  { %v7686_v5 = vpack.c.bf16 %v96_v4, %v95_v2  ;;  %v5068_v8 = vld [vmem:[%s11055_s8 + $0xb0] sm:$0xf]  ;;  %v7078_v9 = vld [vmem:[%s11055_s8 + $0xb4] sm:$0xf0]  ;;  %v7077_v10 = vld [vmem:[%s11055_s8 + $0xb4] sm:$0xf]  ;;  %v7720_v18 = vpack.c.bf16 %v94_v7, %v93_v6 }
  0x17   :  { %182 = vmatpush.bf16.msra.mxu1 %v7680_v3  ;;  %128 = vmatpush.bf16.msra.mxu0 %v7680_v3  ;;  %v5069_v11 = vor.u32 %v7078_v9, %v5068_v8  ;;  %v5070_v12 = vld [vmem:[%s11055_s8 + $0xb8] sm:$0xf0]  ;;  %v5060_v13 = vld [vmem:[%s11055_s8 + $0xa0] sm:$0xf]  ;;  %v7076_v14 = vld [vmem:[%s11055_s8 + $0xa4] sm:$0xf0] }
  0x18   :  { %v5073_v15 = vor.u32 %v7077_v10, %v5070_v12  ;;  %v7075_v16 = vld [vmem:[%s11055_s8 + $0xa4] sm:$0xf]  ;;  %v5062_v17 = vld [vmem:[%s11055_s8 + $0xa8] sm:$0xf0]  ;;  %v5061_v21 = vor.u32 %v7076_v14, %v5060_v13  ;;  %v5120_v23 = vld [vmem:[%s11055_s8 + $0x50] sm:$0xf] }
  0x19   :  { %v91_v19 = vld [vmem:[%s11054_s9] sm:$0xff]  ;;  %v92_v20 = vld [vmem:[%s11054_s9 + $0x8] sm:$0xff]  ;;  %281 = vmatpush.bf16.msra.mxu2 %v5069_v11  ;;  %v5065_v22 = vor.u32 %v7075_v16, %v5062_v17  ;;  %v7064_v24 = vld [vmem:[%s11055_s8 + $0x54] sm:$0xf0] }
  0x1a   :  { %300 = vmatpush.bf16.msra.mxu3 %v5073_v15  ;;  %v7063_v25 = vld [vmem:[%s11055_s8 + $0x54] sm:$0xf]  ;;  %v5122_v26 = vld [vmem:[%s11055_s8 + $0x58] sm:$0xf0]  ;;  %v5052_v27 = vld [vmem:[%s11055_s8 + $0x90] sm:$0xf] }
  0x1b   :  { %183 = vmatpush.bf16.msra.mxu1 %v7686_v5  ;;  %129 = vmatpush.bf16.msra.mxu0 %v7686_v5  ;;  %v7074_v28 = vld [vmem:[%s11055_s8 + $0x94] sm:$0xf0]  ;;  %v7073_v29 = vld [vmem:[%s11055_s8 + $0x94] sm:$0xf]  ;;  %v5054_v30 = vld [vmem:[%s11055_s8 + $0x98] sm:$0xf0] }
  0x1c   :  { %33 = vsyncpa [#allocation3], 0  ;;  %v7754_v31 = vpack.c.bf16 %v92_v20, %v91_v19  ;;  %v5121_v32 = vor.u32 %v7064_v24, %v5120_v23  ;;  %v5125_v33 = vor.u32 %v7063_v25, %v5122_v26  ;;  %v5112_v34 = vld [vmem:[%s11055_s8 + $0x40] sm:$0xf]  ;;  %v5053_v35 = vor.u32 %v7074_v28, %v5052_v27  ;;  %v7062_v37 = vld [vmem:[%s11055_s8 + $0x44] sm:$0xf0] }
  0x1d   :  { %282 = vmatpush.bf16.msra.mxu2 %v5061_v21  ;;  %v5057_v36 = vor.u32 %v7073_v29, %v5054_v30  ;;  %v7061_v38 = vld [vmem:[%s11055_s8 + $0x44] sm:$0xf]  ;;  %v5114_v39 = vld [vmem:[%s11055_s8 + $0x48] sm:$0xf0]  ;;  %s11056_s6 = sld [smem:[#allocation6_spill]]  ;;  %vm117_vm0 = vcmask 523264   ;;  %v5113_v42 = vor.u32 %v7062_v37, %v5112_v34 }
  0x1e   :  { %301 = vmatpush.bf16.msra.mxu3 %v5065_v22  ;;  %v5117_v43 = vor.u32 %v7061_v38, %v5114_v39  ;;  %v5044_v46 = vld [vmem:[%s11055_s8 + $0x80] sm:$0xf]  ;;  %v7072_v47 = vld [vmem:[%s11055_s8 + $0x84] sm:$0xf0]  ;;  %v7071_v48 = vld [vmem:[%s11055_s8 + $0x84] sm:$0xf] }
  0x1f   :  { %184 = vmatpush.bf16.msra.mxu1 %v7720_v18  ;;  %130 = vmatpush.bf16.msra.mxu0 %v7720_v18  ;;  %v5045_v49 = vor.u32 %v7072_v47, %v5044_v46  ;;  %v5046_v50 = vld [vmem:[%s11055_s8 + $0x88] sm:$0xf0]  ;;  %v5104_v52 = vld [vmem:[%s11055_s8 + $0x30] sm:$0xf]  ;;  %v7060_v53 = vld [vmem:[%s11055_s8 + $0x34] sm:$0xf0] }
  0x20   :  { %v5049_v51 = vor.u32 %v7071_v48, %v5046_v50  ;;  %v7059_v54 = vld [vmem:[%s11055_s8 + $0x34] sm:$0xf]  ;;  %v5105_v55 = vor.u32 %v7060_v53, %v5104_v52  ;;  %v5106_v56 = vld [vmem:[%s11055_s8 + $0x38] sm:$0xf0]  ;;  %v5036_v57 = vld [vmem:[%s11055_s8 + $0x70] sm:$0xf] }
  0x21   :  { %283 = vmatpush.bf16.msra.mxu2 %v5053_v35  ;;  %v7070_v58 = vld [vmem:[%s11055_s8 + $0x74] sm:$0xf0]  ;;  %v5109_v59 = vor.u32 %v7059_v54, %v5106_v56  ;;  %v7069_v61 = vld [vmem:[%s11055_s8 + $0x74] sm:$0xf]  ;;  %v5038_v62 = vld [vmem:[%s11055_s8 + $0x78] sm:$0xf0] }
  0x22   :  { %302 = vmatpush.bf16.msra.mxu3 %v5057_v36  ;;  %v5037_v60 = vor.u32 %v7070_v58, %v5036_v57  ;;  %v5096_v63 = vld [vmem:[%s11055_s8 + $0x20] sm:$0xf]  ;;  %v5041_v0 = vor.u32 %v7069_v61, %v5038_v62  ;;  %v7058_v1 = vld [vmem:[%s11055_s8 + $0x24] sm:$0xf0]  ;;  %v7057_v2 = vld [vmem:[%s11055_s8 + $0x24] sm:$0xf] }
  0x23   :  { %v7065_v40 = vld [vmem:[%s11056_s6 + $0x10] sm:$0xff]  ;;  %v7051_v41 = vld [vmem:[%s11056_s6] sm:$0xff]  ;;  %185 = vmatpush.bf16.msra.mxu1 %v7754_v31  ;;  %131 = vmatpush.bf16.msra.mxu0 %v7754_v31  ;;  %v7066_v44 = vld [vmem:[%s11056_s6 + $0x18] sm:$0xff]  ;;  %v5097_v6 = vor.u32 %v7058_v1, %v5096_v63  ;;  %vm272_vm1 = vcmask 785408   ;;  %s11057_s4 = sld [smem:[#allocation8_spill]]  ;;  %vm637_vm10 = vcmask 261120  }
  0x24   :  { %v7052_v45 = vld [vmem:[%s11056_s6 + $0x8] sm:$0xff]  ;;  %v5028_v8 = vld [vmem:[%s11055_s8 + $0x60] sm:$0xf]  ;;  %v7067_v10 = vld [vmem:[%s11055_s8 + $0x64] sm:$0xf]  ;;  %s11058_s5 = sld [smem:[#allocation10_spill]] }
  0x25   :  { %284 = vmatpush.bf16.msra.mxu2 %v5045_v49  ;;  %v5098_v4 = vld [vmem:[%s11055_s8 + $0x28] sm:$0xf0]  ;;  %v7068_v9 = vld [vmem:[%s11055_s8 + $0x64] sm:$0xf0]  ;;  %v5088_v14 = vld [vmem:[%s11055_s8 + $0x10] sm:$0xf] }
  0x26   :  { %5012 = vmatmul.msk.bf16.vlgmr.msra.gmra.mxu1 %vm117_vm0, %v7065_v40  ;;  %4998 = vmatmul.msk.bf16.vlgmr.msra.gmra.mxu0 %vm117_vm0, %v7051_v41  ;;  %v5101_v7 = vor.u32 %v7057_v2, %v5098_v4  ;;  %v5029_v11 = vor.u32 %v7068_v9, %v5028_v8  ;;  %v5030_v12 = vld [vmem:[%s11055_s8 + $0x68] sm:$0xf0]  ;;  %v7056_v15 = vld [vmem:[%s11055_s8 + $0x14] sm:$0xf0]  ;;  %v7055_v16 = vld [vmem:[%s11055_s8 + $0x14] sm:$0xf] }
  0x27   :  { %385 = vmatpush.bf16.msrb.mxu0 %v5121_v32  ;;  %404 = vmatpush.bf16.msrb.mxu1 %v5125_v33  ;;  %v5033_v13 = vor.u32 %v7067_v10, %v5030_v12  ;;  %v5089_v17 = vor.u32 %v7056_v15, %v5088_v14  ;;  %v5090_v19 = vld [vmem:[%s11055_s8 + $0x18] sm:$0xf0]  ;;  %v5080_v21 = vld [vmem:[%s11055_s8] sm:$0xf]  ;;  %v7054_v22 = vld [vmem:[%s11055_s8 + $0x4] sm:$0xf0] }
  0x28   :  { %303 = vmatpush.bf16.msra.mxu3 %v5049_v51  ;;  %v5093_v20 = vor.u32 %v7055_v16, %v5090_v19  ;;  %v7053_v23 = vld [vmem:[%s11055_s8 + $0x4] sm:$0xf]  ;;  %v5081_v24 = vor.u32 %v7054_v22, %v5080_v21  ;;  %v5082_v25 = vld [vmem:[%s11055_s8 + $0x8] sm:$0xf0]  ;;  %v5198_v38 = vld [vmem:[%s11055_s8 + $0x110] sm:$0xf] }
  0x29   :  { %285 = vmatpush.bf16.msra.mxu2 %v5037_v60  ;;  %v7079_v36 = vld [vmem:[%s11056_s6 + $0x20] sm:$0xff]  ;;  %v7080_v37 = vld [vmem:[%s11056_s6 + $0x28] sm:$0xff]  ;;  %v7092_v39 = vld [vmem:[%s11055_s8 + $0x114] sm:$0xf0]  ;;  %s11059_s1 = sld [smem:[#allocation9_spill]] }
  0x2a   :  { %v7091_v40 = vld [vmem:[%s11055_s8 + $0x114] sm:$0xf]  ;;  %v5199_v41 = vor.u32 %v7092_v39, %v5198_v38  ;;  %v7089_v46 = vld [vmem:[%s11055_s8 + $0x104] sm:$0xf]  ;;  %v5192_v48 = vld [vmem:[%s11055_s8 + $0x108] sm:$0xf0] }
  0x2b   :  { %386 = vmatpush.bf16.msrb.mxu0 %v5113_v42  ;;  %405 = vmatpush.bf16.msrb.mxu1 %v5117_v43  ;;  %v5200_v42 = vld [vmem:[%s11055_s8 + $0x118] sm:$0xf0]  ;;  %v5195_v49 = vor.u32 %v7089_v46, %v5192_v48  ;;  %v5182_v50 = vld [vmem:[%s11055_s8 + $0xf0] sm:$0xf]  ;;  %v7088_v51 = vld [vmem:[%s11055_s8 + $0xf4] sm:$0xf0] }
  0x2c   :  { %304 = vmatpush.bf16.msra.mxu3 %v5041_v0  ;;  %v5203_v43 = vor.u32 %v7091_v40, %v5200_v42  ;;  %v7087_v52 = vld [vmem:[%s11055_s8 + $0xf4] sm:$0xf]  ;;  %v5183_v53 = vor.u32 %v7088_v51, %v5182_v50  ;;  %v5184_v54 = vld [vmem:[%s11055_s8 + $0xf8] sm:$0xf0]  ;;  %v5174_v56 = vld [vmem:[%s11055_s8 + $0xe0] sm:$0xf] }
  0x2d   :  { %286 = vmatpush.bf16.msra.mxu2 %v5029_v11  ;;  %v7086_v57 = vld [vmem:[%s11055_s8 + $0xe4] sm:$0xf0]  ;;  %v7085_v58 = vld [vmem:[%s11055_s8 + $0xe4] sm:$0xf]  ;;  %v5176_v60 = vld [vmem:[%s11055_s8 + $0xe8] sm:$0xf0] }
  0x2e   :  { %v5179_v61 = vor.u32 %v7085_v58, %v5176_v60  ;;  %v5166_v63 = vld [vmem:[%s11055_s8 + $0xd0] sm:$0xf]  ;;  %v7084_v0 = vld [vmem:[%s11055_s8 + $0xd4] sm:$0xf0]  ;;  %v7083_v1 = vld [vmem:[%s11055_s8 + $0xd4] sm:$0xf] }
  0x2f   :  { %387 = vmatpush.bf16.msrb.mxu0 %v5105_v55  ;;  %406 = vmatpush.bf16.msrb.mxu1 %v5109_v59  ;;  %v5187_v55 = vor.u32 %v7087_v52, %v5184_v54  ;;  %v5175_v59 = vor.u32 %v7086_v57, %v5174_v56  ;;  %v5167_v2 = vor.u32 %v7084_v0, %v5166_v63  ;;  %v5168_v4 = vld [vmem:[%s11055_s8 + $0xd8] sm:$0xf0]  ;;  %v7082_v8 = vld [vmem:[%s11055_s8 + $0xc4] sm:$0xf0]  ;;  %v7081_v9 = vld [vmem:[%s11055_s8 + $0xc4] sm:$0xf] }
  0x30   :  { %305 = vmatpush.bf16.msra.mxu3 %v5033_v13  ;;  %v5160_v11 = vld [vmem:[%s11055_s8 + $0xc8] sm:$0xf0]  ;;  %s11060_s10 = sld [smem:[#allocation12_spill]] }
  0x31   :  { %446 = vmatpush.bf16.msrb.mxu2 %v7680_v3  ;;  %v5085_v3 = vor.u32 %v7053_v23, %v5082_v25  ;;  %v5163_v12 = vor.u32 %v7081_v9, %v5160_v11  ;;  %s11061_s29 = sld [smem:[#allocation11_spill]] }
  0x32   :  { %s11062_s9 = sld [smem:[#allocation13_spill]] }
  0x33   :  { %388 = vmatpush.bf16.msrb.mxu0 %v5097_v6  ;;  %407 = vmatpush.bf16.msrb.mxu1 %v5101_v7  ;;  %v5171_v6 = vor.u32 %v7083_v1, %v5168_v4  ;;  %v5158_v7 = vld [vmem:[%s11055_s8 + $0xc0] sm:$0xf]  ;;  %s11064_s11 = sld [smem:[#allocation15_spill]] }
  0x34   :  { %544 = vmatpush.bf16.msrb.mxu3 %v5199_v41  ;;  %v5159_v10 = vor.u32 %v7082_v8, %v5158_v7 }
  0x35   :  { %447 = vmatpush.bf16.msrb.mxu2 %v7686_v5 }
  0x36   :  { %5013 = vmatmul.msk.bf16.gmra.mxu1 %vm117_vm0, %v7066_v44  ;;  %4999 = vmatmul.msk.bf16.gmra.mxu0 %vm117_vm0, %v7052_v45  ;;  %v5190_v44 = vld [vmem:[%s11055_s8 + $0x100] sm:$0xf]  ;;  %v7090_v45 = vld [vmem:[%s11055_s8 + $0x104] sm:$0xf0] }
  0x37   :  { %389 = vmatpush.bf16.msrb.mxu0 %v5089_v17  ;;  %408 = vmatpush.bf16.msrb.mxu1 %v5093_v20  ;;  %v5191_v47 = vor.u32 %v7090_v45, %v5190_v44 }
  0x39   :  { %448 = vmatpush.bf16.msrb.mxu2 %v7720_v18  ;;  %545 = vmatpush.bf16.msrb.mxu3 %v5191_v47 }
  0x3b   :  { %390 = vmatpush.bf16.msrb.mxu0 %v5081_v24  ;;  %409 = vmatpush.bf16.msrb.mxu1 %v5085_v3 }
  0x3d   :  { %449 = vmatpush.bf16.msrb.mxu2 %v7754_v31  ;;  %546 = vmatpush.bf16.msrb.mxu3 %v5183_v53 }
  0x3f   :  { %563 = vmatpush.bf16.msra.mxu0 %v5203_v43 }
  0x41   :  { %547 = vmatpush.bf16.msrb.mxu3 %v5175_v59 }
  0x43   :  { %564 = vmatpush.bf16.msra.mxu0 %v5195_v49 }
  0x45   :  { %548 = vmatpush.bf16.msrb.mxu3 %v5167_v2 }
  0x47   :  { %565 = vmatpush.bf16.msra.mxu0 %v5187_v55 }
  0x49   :  { %549 = vmatpush.bf16.msrb.mxu3 %v5159_v10 }
  0x4b   :  { %566 = vmatpush.bf16.msra.mxu0 %v5179_v61 }
  0x4f   :  { %567 = vmatpush.bf16.msra.mxu0 %v5171_v6 }
  0x53   :  { %568 = vmatpush.bf16.msra.mxu0 %v5163_v12 }
  0xa3   :  { %v187_v26 = vpop.f32.mrf.mxu1  ;;  %v133_v27 = vpop.f32.mrf.mxu0 }
  0xab   :  { %v189_v28 = vpop.f32.mrf.mxu1  ;;  %v135_v29 = vpop.f32.mrf.mxu0 }
  0xac   :  { %v197_v30 = vpack.c.bf16 %v189_v28, %v187_v26  ;;  %v143_v32 = vpack.c.bf16 %v135_v29, %v133_v27 }
  0xae   :  { %5074 = vmatmul.msk.bf16.vlgmr.msra.gmra.mxu2 %vm272_vm1, %v197_v30  ;;  %5076 = vmatmul.msk.bf16.vlgmr.msra.gmra.mxu3 %vm272_vm1, %v197_v30 }
  0xaf   :  { %5126 = vmatmul.msk.bf16.vlgmr.msrb.gmra.mxu0 %vm272_vm1, %v143_v32  ;;  %5128 = vmatmul.msk.bf16.vlgmr.msrb.gmra.mxu1 %vm272_vm1, %v143_v32 }
  0xb3   :  { %v192_v5 = vpop.f32.mrf.mxu1  ;;  %v138_v33 = vpop.f32.mrf.mxu0 }
  0xbb   :  { %v194_v18 = vpop.f32.mrf.mxu1  ;;  %v140_v34 = vpop.f32.mrf.mxu0 }
  0xbc   :  { %v198_v31 = vpack.c.bf16 %v194_v18, %v192_v5  ;;  %v144_v35 = vpack.c.bf16 %v140_v34, %v138_v33  ;;  %v588_v34 = vld [vmem:[%s11057_s4] sm:$0x3] }
  0xbd   :  { %v591_v51 = vperm.slane %v588_v34, 1 }
  0xbe   :  { %5075 = vmatmul.msk.bf16.gmra.mxu2 %vm272_vm1, %v198_v31  ;;  %5077 = vmatmul.msk.bf16.gmra.mxu3 %vm272_vm1, %v198_v31 }
  0xbf   :  { %5127 = vmatmul.msk.bf16.gmra.mxu0 %vm272_vm1, %v144_v35  ;;  %5129 = vmatmul.msk.bf16.gmra.mxu1 %vm272_vm1, %v144_v35 }
  0xce   :  { %5142 = vmatmul.msk.bf16.vlgmr.msrb.gmra.mxu2 %vm117_vm0, %v7079_v36  ;;  %v590_v36 = vperm.slane %v588_v34, 0 }
  0xde   :  { %5143 = vmatmul.msk.bf16.gmra.mxu2 %vm117_vm0, %v7080_v37 }
 0x12c   :  { %v392_v23 = vpop.f32.mrf.mxu0  ;;  %v411_v28 = vpop.f32.mrf.mxu1 }
 0x131   :  { %v288_v62 = vpop.f32.mrf.mxu2  ;;  %v307_v24 = vpop.f32.mrf.mxu3 }
 0x132   :  { %v393_v18 = vadd.f32 %v392_v23, %v288_v62  ;;  %v412_v49 = vadd.f32 %v411_v28, %v307_v24 }
 0x134   :  { %v394_v25 = vpop.f32.mrf.mxu0  ;;  %v413_v32 = vpop.f32.mrf.mxu1 }
 0x139   :  { %v290_v13 = vpop.f32.mrf.mxu2  ;;  %v309_v3 = vpop.f32.mrf.mxu3 }
 0x13a   :  { %v395_v38 = vadd.f32 %v394_v25, %v290_v13  ;;  %v414_v46 = vadd.f32 %v413_v32, %v309_v3  ;;  %v5376_v25 = vld [vmem:[%s11058_s5 + $0x1f0] sm:$0xf]  ;;  %v7158_v3 = vld [vmem:[%s11058_s5 + $0x1f4] sm:$0xf0] }
 0x13b   :  { %v5377_v32 = vor.u32 %v7158_v3, %v5376_v25  ;;  %v7133_v25 = vld [vmem:[%s11058_s5 + $0x134] sm:$0xf]  ;;  %v5282_v3 = vld [vmem:[%s11058_s5 + $0x138] sm:$0xf0] }
 0x13c   :  { %v397_v26 = vpop.f32.mrf.mxu0  ;;  %v416_v37 = vpop.f32.mrf.mxu1 }
 0x141   :  { %v293_v14 = vpop.f32.mrf.mxu2  ;;  %v312_v27 = vpop.f32.mrf.mxu3 }
 0x142   :  { %v417_v43 = vadd.f32 %v416_v37, %v312_v27  ;;  %v398_v58 = vadd.f32 %v397_v26, %v293_v14  ;;  %v5296_v27 = vld [vmem:[%s11058_s5 + $0x150] sm:$0xf]  ;;  %v7141_v37 = vld [vmem:[%s11058_s5 + $0x174] sm:$0xf] }
 0x144   :  { %v399_v29 = vpop.f32.mrf.mxu0  ;;  %v418_v50 = vpop.f32.mrf.mxu1 }
 0x149   :  { %v295_v15 = vpop.f32.mrf.mxu2  ;;  %v314_v30 = vpop.f32.mrf.mxu3 }
 0x14a   :  { %v419_v59 = vadd.f32 %v418_v50, %v314_v30  ;;  %v400_v6 = vadd.f32 %v399_v29, %v295_v15  ;;  %v5304_v15 = vld [vmem:[%s11058_s5 + $0x160] sm:$0xf]  ;;  %v7138_v30 = vld [vmem:[%s11058_s5 + $0x154] sm:$0xf0]  ;;  %v5306_v50 = vld [vmem:[%s11058_s5 + $0x168] sm:$0xf0] }
 0x151   :  { %v451_v16 = vpop.f32.mrf.mxu2 }
 0x159   :  { %v453_v17 = vpop.f32.mrf.mxu2 }
 0x15a   :  { %v461_v19 = vpack.c.bf16 %v453_v17, %v451_v16  ;;  %v5312_v16 = vld [vmem:[%s11058_s5 + $0x170] sm:$0xf]  ;;  %v7142_v17 = vld [vmem:[%s11058_s5 + $0x174] sm:$0xf0] }
 0x15c   :  { %5204 = vmatmul.msk.bf16.vlgmr.msrb.gmra.mxu3 %vm272_vm1, %v461_v19  ;;  %5206 = vmatmul.msk.bf16.vlgmr.msra.gmra.mxu0 %vm272_vm1, %v461_v19 }
 0x161   :  { %v456_v20 = vpop.f32.mrf.mxu2 }
 0x169   :  { %v458_v21 = vpop.f32.mrf.mxu2 }
 0x16a   :  { %v462_v22 = vpack.c.bf16 %v458_v21, %v456_v20  ;;  %v5313_v20 = vor.u32 %v7142_v17, %v5312_v16  ;;  %v7140_v21 = vld [vmem:[%s11058_s5 + $0x164] sm:$0xf0]  ;;  %v7153_v16 = vld [vmem:[%s11058_s5 + $0x1d4] sm:$0xf]  ;;  %v5362_v17 = vld [vmem:[%s11058_s5 + $0x1d8] sm:$0xf0] }
 0x16b   :  { %v5305_v26 = vor.u32 %v7140_v21, %v5304_v15  ;;  %v5336_v21 = vld [vmem:[%s11058_s5 + $0x1a0] sm:$0xf] }
 0x16c   :  { %5205 = vmatmul.msk.bf16.gmra.mxu3 %vm272_vm1, %v462_v22  ;;  %5207 = vmatmul.msk.bf16.gmra.mxu0 %vm272_vm1, %v462_v22 }
 0x16d   :  { %937 = vmatpush.bf16.msrb.mxu0 %v5313_v20 }
 0x171   :  { %938 = vmatpush.bf16.msrb.mxu0 %v5305_v26  ;;  %v5365_v26 = vor.u32 %v7153_v16, %v5362_v17  ;;  %v5408_v16 = vld [vmem:[%s11058_s5 + $0x30] sm:$0xf]  ;;  %v7101_v17 = vld [vmem:[%s11058_s5 + $0x34] sm:$0xf0] }
 0x1d9   :  { %v570_v5 = vpop.f32.mrf.mxu0 }
 0x1da   :  { %v581_v55 = vadd.f32 %v570_v5, %v412_v49  ;;  %v7139_v49 = vld [vmem:[%s11058_s5 + $0x164] sm:$0xf] }
 0x1dc   :  { %v595_v1 = vadd.f32 %v591_v51, %v581_v55  ;;  %v5309_v55 = vor.u32 %v7139_v49, %v5306_v50  ;;  %v7144_v49 = vld [vmem:[%s11058_s5 + $0x184] sm:$0xf0]  ;;  %v7129_v50 = vld [vmem:[%s11058_s5 + $0x114] sm:$0xf] }
 0x1de   :  { %v611_v10 = vmul.f32 0.2, %v595_v1  ;;  %vm603_vm7 = vcmp.ge.f32.partialorder %v595_v1, 0.0 }
 0x1df   :  { %v551_v33 = vpop.f32.mrf.mxu3 }
 0x1e0   :  { %v580_v35 = vadd.f32 %v551_v33, %v393_v18  ;;  %v619_v29 = vsel %vm603_vm7, %v595_v1, %v611_v10  ;;  %v5368_v33 = vld [vmem:[%s11058_s5 + $0x1e0] sm:$0xf]  ;;  %v7156_v18 = vld [vmem:[%s11058_s5 + $0x1e4] sm:$0xf0]  ;;  %v7155_v1 = vld [vmem:[%s11058_s5 + $0x1e4] sm:$0xf] }
 0x1e1   :  { %v572_v31 = vpop.f32.mrf.mxu0  ;;  %v5264_v10 = vld [vmem:[%s11058_s5 + $0x110] sm:$0xf] }
 0x1e2   :  { %v594_v39 = vadd.f32 %v590_v36, %v580_v35  ;;  %v583_v52 = vadd.f32 %v572_v31, %v414_v46  ;;  %v7154_v46 = vld [vmem:[%s11058_s5 + $0x1d4] sm:$0xf0] }
 0x1e4   :  { %v610_v44 = vmul.f32 0.2, %v594_v39  ;;  %vm602_vm2 = vcmp.ge.f32.partialorder %v594_v39, 0.0  ;;  %v597_v62 = vadd.f32 %v591_v51, %v583_v52  ;;  %v7157_v52 = vld [vmem:[%s11058_s5 + $0x1f4] sm:$0xf] }
 0x1e6   :  { %v618_v53 = vsel %vm602_vm2, %v594_v39, %v610_v44  ;;  %v613_v7 = vmul.f32 0.2, %v597_v62  ;;  %vm605_vm6 = vcmp.ge.f32.partialorder %v597_v62, 0.0  ;;  %v7093_v39 = vld [vmem:[%s11059_s1] sm:$0xff] }
 0x1e7   :  { %v553_v40 = vpop.f32.mrf.mxu3 }
 0x1e8   :  { %v582_v41 = vadd.f32 %v553_v40, %v395_v38  ;;  %v621_v24 = vsel %vm605_vm6, %v597_v62, %v613_v7  ;;  %v5314_v38 = vld [vmem:[%s11058_s5 + $0x178] sm:$0xf0]  ;;  %v5288_v40 = vld [vmem:[%s11058_s5 + $0x140] sm:$0xf]  ;;  %v5344_v7 = vld [vmem:[%s11058_s5 + $0x1b0] sm:$0xf] }
 0x1e9   :  { %v575_v42 = vpop.f32.mrf.mxu0  ;;  %v7999_v5 = vpack.c.bf16 %v621_v24, %v619_v29  ;;  %v5317_v44 = vor.u32 %v7141_v37, %v5314_v38  ;;  %v5298_v62 = vld [vmem:[%s11058_s5 + $0x158] sm:$0xf0]  ;;  %v5256_v24 = vld [vmem:[%s11058_s5 + $0x100] sm:$0xf]  ;;  %v5354_v29 = vld [vmem:[%s11058_s5 + $0x1c8] sm:$0xf0] }
 0x1ea   :  { %v596_v45 = vadd.f32 %v590_v36, %v582_v41  ;;  %v585_v48 = vadd.f32 %v575_v42, %v417_v43  ;;  %v7136_v41 = vld [vmem:[%s11058_s5 + $0x144] sm:$0xf0]  ;;  %v5369_v42 = vor.u32 %v7156_v18, %v5368_v33  ;;  %v5285_v18 = vor.u32 %v7133_v25, %v5282_v3  ;;  %v7131_v37 = vld [vmem:[%s11058_s5 + $0x124] sm:$0xf]  ;;  %v5274_v38 = vld [vmem:[%s11058_s5 + $0x128] sm:$0xf0] }
 0x1eb   :  { %v8030_v43 = vld [vmem:[%s11059_s1 + $0x8] sm:$0xff]  ;;  %v7145_v25 = vld [vmem:[%s11058_s5 + $0x194] sm:$0xf]  ;;  %v5330_v3 = vld [vmem:[%s11058_s5 + $0x198] sm:$0xf0] }
 0x1ec   :  { %vm604_vm3 = vcmp.ge.f32.partialorder %v596_v45, 0.0  ;;  %v612_v47 = vmul.f32 0.2, %v596_v45  ;;  %v599_v60 = vadd.f32 %v591_v51, %v585_v48  ;;  %v5280_v48 = vld [vmem:[%s11058_s5 + $0x130] sm:$0xf] }
 0x1ee   :  { %v620_v54 = vsel %vm604_vm3, %v596_v45, %v612_v47  ;;  %v615_v2 = vmul.f32 0.2, %v599_v60  ;;  %vm607_vm4 = vcmp.ge.f32.partialorder %v599_v60, 0.0  ;;  %v5360_v45 = vld [vmem:[%s11058_s5 + $0x1d0] sm:$0xf]  ;;  %v5289_v47 = vor.u32 %v7136_v41, %v5288_v40 }
 0x1ef   :  { %v556_v56 = vpop.f32.mrf.mxu3  ;;  %v7970_v57 = vpack.c.bf16 %v620_v54, %v618_v53  ;;  %v5378_v53 = vld [vmem:[%s11058_s5 + $0x1f8] sm:$0xf0]  ;;  %v5361_v54 = vor.u32 %v7154_v46, %v5360_v45  ;;  %v7149_v41 = vld [vmem:[%s11058_s5 + $0x1b4] sm:$0xf]  ;;  %v7107_v45 = vld [vmem:[%s11058_s5 + $0x64] sm:$0xf0] }
 0x1f0   :  { %v584_v63 = vadd.f32 %v556_v56, %v398_v58  ;;  %v623_v12 = vsel %vm607_vm4, %v599_v60, %v615_v2  ;;  %v5352_v56 = vld [vmem:[%s11058_s5 + $0x1c0] sm:$0xf]  ;;  %v7152_v58 = vld [vmem:[%s11058_s5 + $0x1c4] sm:$0xf0]  ;;  %v5370_v2 = vld [vmem:[%s11058_s5 + $0x1e8] sm:$0xf0] }
 0x1f1   :  { %v577_v61 = vpop.f32.mrf.mxu0  ;;  %v5272_v60 = vld [vmem:[%s11058_s5 + $0x120] sm:$0xf]  ;;  %vm1806_vm4 = vcmask 130048  }
 0x1f2   :  { %v587_v0 = vadd.f32 %v577_v61, %v419_v59  ;;  %v598_v8 = vadd.f32 %v590_v36, %v584_v63  ;;  %v7137_v61 = vld [vmem:[%s11058_s5 + $0x154] sm:$0xf]  ;;  %v5381_v63 = vor.u32 %v7157_v52, %v5378_v53  ;;  %v5504_v52 = vld [vmem:[%s11058_s5 + $0xf0] sm:$0xf]  ;;  %v7125_v53 = vld [vmem:[%s11058_s5 + $0xf4] sm:$0xf0] }
 0x1f4   :  { %v601_v4 = vadd.f32 %v591_v51, %v587_v0  ;;  %v614_v22 = vmul.f32 0.2, %v598_v8  ;;  %vm606_vm8 = vcmp.ge.f32.partialorder %v598_v8, 0.0  ;;  %v7134_v51 = vld [vmem:[%s11058_s5 + $0x134] sm:$0xf0] }
 0x1f5   :  { %v5281_v59 = vor.u32 %v7134_v51, %v5280_v48  ;;  %v7132_v0 = vld [vmem:[%s11058_s5 + $0x124] sm:$0xf0]  ;;  %v5320_v48 = vld [vmem:[%s11058_s5 + $0x180] sm:$0xf]  ;;  %v5266_v51 = vld [vmem:[%s11058_s5 + $0x118] sm:$0xf0] }
 0x1f6   :  { %vm609_vm5 = vcmp.ge.f32.partialorder %v601_v4, 0.0  ;;  %v617_v9 = vmul.f32 0.2, %v601_v4  ;;  %v622_v34 = vsel %vm606_vm8, %v598_v8, %v614_v22  ;;  %v7150_v8 = vld [vmem:[%s11058_s5 + $0x1b4] sm:$0xf0] }
 0x1f7   :  { %v558_v11 = vpop.f32.mrf.mxu3  ;;  %v5345_v15 = vor.u32 %v7150_v8, %v5344_v7  ;;  %v7148_v22 = vld [vmem:[%s11058_s5 + $0x1a4] sm:$0xf0]  ;;  %v7108_v8 = vld [vmem:[%s11058_s5 + $0x74] sm:$0xf] }
 0x1f8   :  { %v625_v13 = vsel %vm609_vm5, %v601_v4, %v617_v9  ;;  %v586_v14 = vadd.f32 %v558_v11, %v400_v6  ;;  %v5353_v4 = vor.u32 %v7152_v58, %v5352_v56  ;;  %v5301_v6 = vor.u32 %v7137_v61, %v5298_v62  ;;  %v7135_v11 = vld [vmem:[%s11058_s5 + $0x144] sm:$0xf]  ;;  %v5424_v56 = vld [vmem:[%s11058_s5 + $0x50] sm:$0xf]  ;;  %v7105_v58 = vld [vmem:[%s11058_s5 + $0x54] sm:$0xf0] }
 0x1f9   :  { %v7981_v19 = vpack.c.bf16 %v625_v13, %v623_v12  ;;  %v5273_v9 = vor.u32 %v7132_v0, %v5272_v60  ;;  %v5290_v12 = vld [vmem:[%s11058_s5 + $0x148] sm:$0xf0]  ;;  %v5373_v13 = vor.u32 %v7155_v1, %v5370_v2  ;;  %v5337_v33 = vor.u32 %v7148_v22, %v5336_v21  ;;  %v7127_v1 = vld [vmem:[%s11058_s5 + $0x104] sm:$0xf]  ;;  %v7123_v7 = vld [vmem:[%s11058_s5 + $0xe4] sm:$0xf0] }
 0x1fa   :  { %v600_v23 = vadd.f32 %v590_v36, %v586_v14  ;;  %v5297_v36 = vor.u32 %v7138_v30, %v5296_v27  ;;  %v7130_v14 = vld [vmem:[%s11058_s5 + $0x114] sm:$0xf0]  ;;  %v5293_v20 = vor.u32 %v7135_v11, %v5290_v12  ;;  %v7128_v27 = vld [vmem:[%s11058_s5 + $0x104] sm:$0xf0]  ;;  %v5440_v30 = vld [vmem:[%s11058_s5 + $0x70] sm:$0xf]  ;;  %v5269_v60 = vor.u32 %v7129_v50, %v5266_v51 }
 0x1fb   :  { %661 = vmatpush.bf16.msra.mxu2 %v7981_v19  ;;  %v5505_v61 = vor.u32 %v7125_v53, %v5504_v52  ;;  %v5425_v62 = vor.u32 %v7105_v58, %v5424_v56  ;;  %v5258_v2 = vld [vmem:[%s11058_s5 + $0x108] sm:$0xf0]  ;;  %v7147_v11 = vld [vmem:[%s11058_s5 + $0x1a4] sm:$0xf]  ;;  %v7121_v21 = vld [vmem:[%s11058_s5 + $0xd4] sm:$0xf0] }
 0x1fc   :  { %vm608_vm9 = vcmp.ge.f32.partialorder %v600_v23, 0.0  ;;  %v616_v28 = vmul.f32 0.2, %v600_v23  ;;  %939 = vmatpush.bf16.msrb.mxu0 %v5297_v36  ;;  %v5257_v36 = vor.u32 %v7128_v27, %v5256_v24  ;;  %v5338_v12 = vld [vmem:[%s11058_s5 + $0x1a8] sm:$0xf0]  ;;  %v5333_v27 = vor.u32 %v7145_v25, %v5330_v3 }
 0x1fd   :  { %v7106_v22 = vld [vmem:[%s11058_s5 + $0x64] sm:$0xf]  ;;  %v5434_v24 = vld [vmem:[%s11058_s5 + $0x68] sm:$0xf0]  ;;  %v5384_v53 = vld [vmem:[%s11058_s5] sm:$0xf] }
 0x1fe   :  { %v624_v31 = vsel %vm608_vm9, %v600_v23, %v616_v28  ;;  %v5265_v23 = vor.u32 %v7130_v14, %v5264_v10  ;;  %v7151_v28 = vld [vmem:[%s11058_s5 + $0x1c4] sm:$0xf]  ;;  %v5442_v10 = vld [vmem:[%s11058_s5 + $0x78] sm:$0xf0]  ;;  %v5341_v14 = vor.u32 %v7147_v11, %v5338_v12  ;;  %v5418_v51 = vld [vmem:[%s11058_s5 + $0x48] sm:$0xf0] }
 0x1ff   :  { %662 = vmatpush.bf16.msra.mxu2 %v7999_v5  ;;  %v8008_v35 = vpack.c.bf16 %v624_v31, %v622_v34  ;;  %v5328_v34 = vld [vmem:[%s11058_s5 + $0x190] sm:$0xf]  ;;  %v7146_v31 = vld [vmem:[%s11058_s5 + $0x194] sm:$0xf0]  ;;  %v5498_v58 = vld [vmem:[%s11058_s5 + $0xe8] sm:$0xf0] }
 0x200   :  { %940 = vmatpush.bf16.msrb.mxu0 %v5289_v47  ;;  %v5329_v46 = vor.u32 %v7146_v31, %v5328_v34  ;;  %v5277_v47 = vor.u32 %v7131_v37, %v5274_v38  ;;  %v5426_v31 = vld [vmem:[%s11058_s5 + $0x58] sm:$0xf0]  ;;  %v5322_v37 = vld [vmem:[%s11058_s5 + $0x188] sm:$0xf0]  ;;  %v7118_v12 = vld [vmem:[%s11058_s5 + $0xc4] sm:$0xf] }
 0x201   :  { %647 = vmatpush.bf16.msra.mxu1 %v8008_v35  ;;  %720 = vmatpush.bf16.msra.mxu3 %v8008_v35  ;;  %v7094_v3 = vld [vmem:[%s11058_s5 + $0x4] sm:$0xf] }
 0x202   :  { %5213 = vmatmul.msk.bf16.vlgmr.msra.gmra.mxu2 %vm637_vm10, %v7093_v39 }
 0x203   :  { %951 = vmatpush.bf16.msrb.mxu2 %v5377_v32  ;;  %v7109_v32 = vld [vmem:[%s11058_s5 + $0x74] sm:$0xf0] }
 0x204   :  { %941 = vmatpush.bf16.msrb.mxu0 %v5281_v59  ;;  %v5441_v40 = vor.u32 %v7109_v32, %v5440_v30  ;;  %v5321_v59 = vor.u32 %v7144_v49, %v5320_v48  ;;  %v5480_v32 = vld [vmem:[%s11058_s5 + $0xc0] sm:$0xf]  ;;  %v7117_v48 = vld [vmem:[%s11058_s5 + $0xb4] sm:$0xf0]  ;;  %v7102_v49 = vld [vmem:[%s11058_s5 + $0x44] sm:$0xf] }
 0x205   :  { %648 = vmatpush.bf16.msra.mxu1 %v7970_v57  ;;  %721 = vmatpush.bf16.msra.mxu3 %v7970_v57  ;;  %v5421_v52 = vor.u32 %v7102_v49, %v5418_v51  ;;  %v5610_v51 = vld [vmem:[%s11058_s5 + $0x278] sm:$0xf0] }
 0x207   :  { %952 = vmatpush.bf16.msrb.mxu2 %v5369_v42  ;;  %v5346_v42 = vld [vmem:[%s11058_s5 + $0x1b8] sm:$0xf0] }
 0x208   :  { %5212 = vmatmul.msk.bf16.vlgmr.msra.gmra.mxu1 %vm637_vm10, %v7093_v39  ;;  %5220 = vmatmul.msk.bf16.vlgmr.msra.gmra.mxu3 %vm637_vm10, %v8030_v43  ;;  %v5357_v39 = vor.u32 %v7151_v28, %v5354_v29  ;;  %v5400_v28 = vld [vmem:[%s11058_s5 + $0x20] sm:$0xf]  ;;  %v7099_v29 = vld [vmem:[%s11058_s5 + $0x24] sm:$0xf0] }
 0x209   :  { %734 = vmatpush.bf16.msrb.mxu1 %v7981_v19  ;;  %965 = vmatpush.bf16.msrb.mxu3 %v5317_v44  ;;  %v5432_v44 = vld [vmem:[%s11058_s5 + $0x60] sm:$0xf]  ;;  %v5401_v30 = vor.u32 %v7099_v29, %v5400_v28  ;;  %v7114_v28 = vld [vmem:[%s11058_s5 + $0xa4] sm:$0xf]  ;;  %v5466_v29 = vld [vmem:[%s11058_s5 + $0xa8] sm:$0xf0] }
 0x20a   :  { %942 = vmatpush.bf16.msrb.mxu0 %v5273_v9 }
 0x20b   :  { %953 = vmatpush.bf16.msrb.mxu2 %v5361_v54  ;;  %v5349_v54 = vor.u32 %v7149_v41, %v5346_v42  ;;  %v7097_v41 = vld [vmem:[%s11058_s5 + $0x14] sm:$0xf0]  ;;  %v7124_v42 = vld [vmem:[%s11058_s5 + $0xf4] sm:$0xf] }
 0x20d   :  { %735 = vmatpush.bf16.msrb.mxu1 %v7999_v5  ;;  %966 = vmatpush.bf16.msrb.mxu3 %v5309_v55  ;;  %v5433_v55 = vor.u32 %v7107_v45, %v5432_v44  ;;  %v5506_v45 = vld [vmem:[%s11058_s5 + $0xf8] sm:$0xf0] }
 0x20e   :  { %943 = vmatpush.bf16.msrb.mxu0 %v5265_v23 }
 0x20f   :  { %954 = vmatpush.bf16.msrb.mxu2 %v5353_v4  ;;  %v5261_v4 = vor.u32 %v7127_v1, %v5258_v2  ;;  %v7120_v1 = vld [vmem:[%s11058_s5 + $0xd4] sm:$0xf]  ;;  %v5490_v2 = vld [vmem:[%s11058_s5 + $0xd8] sm:$0xf0] }
 0x211   :  { %979 = vmatpush.bf16.msra.mxu1 %v5381_v63  ;;  %967 = vmatpush.bf16.msrb.mxu3 %v5301_v6  ;;  %v7103_v63 = vld [vmem:[%s11058_s5 + $0x44] sm:$0xf0]  ;;  %v5496_v6 = vld [vmem:[%s11058_s5 + $0xe0] sm:$0xf] }
 0x212   :  { %944 = vmatpush.bf16.msrb.mxu0 %v5257_v36  ;;  %v5497_v9 = vor.u32 %v7123_v7, %v5496_v6  ;;  %v7143_v36 = vld [vmem:[%s11058_s5 + $0x184] sm:$0xf]  ;;  %v5456_v6 = vld [vmem:[%s11058_s5 + $0x90] sm:$0xf]  ;;  %v7113_v7 = vld [vmem:[%s11058_s5 + $0x94] sm:$0xf0] }
 0x213   :  { %955 = vmatpush.bf16.msrb.mxu2 %v5345_v15  ;;  %v5409_v15 = vor.u32 %v7101_v17, %v5408_v16  ;;  %v5448_v16 = vld [vmem:[%s11058_s5 + $0x80] sm:$0xf]  ;;  %v7111_v17 = vld [vmem:[%s11058_s5 + $0x84] sm:$0xf0] }
 0x215   :  { %980 = vmatpush.bf16.msra.mxu1 %v5373_v13  ;;  %968 = vmatpush.bf16.msrb.mxu3 %v5293_v20  ;;  %v5445_v13 = vor.u32 %v7108_v8, %v5442_v10  ;;  %v5488_v20 = vld [vmem:[%s11058_s5 + $0xd0] sm:$0xf]  ;;  %v7098_v8 = vld [vmem:[%s11058_s5 + $0x24] sm:$0xf]  ;;  %v5402_v10 = vld [vmem:[%s11058_s5 + $0x28] sm:$0xf0] }
 0x216   :  { %1153 = vmatpush.bf16.msra.mxu0 %v5441_v40  ;;  %v5489_v23 = vor.u32 %v7121_v21, %v5488_v20  ;;  %v5392_v40 = vld [vmem:[%s11058_s5 + $0x10] sm:$0xf]  ;;  %v5405_v11 = vor.u32 %v7098_v8, %v5402_v10  ;;  %v5449_v20 = vor.u32 %v7111_v17, %v5448_v16  ;;  %v5394_v21 = vld [vmem:[%s11058_s5 + $0x18] sm:$0xf0]  ;;  %v7191_v10 = vld [vmem:[%s11058_s5 + $0x2f4] sm:$0xf0] }
 0x217   :  { %956 = vmatpush.bf16.msrb.mxu2 %v5337_v33  ;;  %v7119_v33 = vld [vmem:[%s11058_s5 + $0xc4] sm:$0xf0]  ;;  %v5393_v44 = vor.u32 %v7097_v41, %v5392_v40  ;;  %v7167_v16 = vld [vmem:[%s11058_s5 + $0x234] sm:$0xf0] }
 0x218   :  { %5221 = vmatmul.msk.bf16.vlgmr.msrb.gmra.mxu1 %vm637_vm10, %v8030_v43  ;;  %v5416_v43 = vld [vmem:[%s11058_s5 + $0x40] sm:$0xf]  ;;  %v5481_v34 = vor.u32 %v7119_v33, %v5480_v32  ;;  %v7112_v33 = vld [vmem:[%s11058_s5 + $0x94] sm:$0xf] }
 0x219   :  { %981 = vmatpush.bf16.msra.mxu1 %v5365_v26  ;;  %969 = vmatpush.bf16.msrb.mxu3 %v5285_v18  ;;  %v5417_v0 = vor.u32 %v7103_v63, %v5416_v43  ;;  %v5437_v26 = vor.u32 %v7106_v22, %v5434_v24  ;;  %v7104_v18 = vld [vmem:[%s11058_s5 + $0x54] sm:$0xf]  ;;  %v5410_v63 = vld [vmem:[%s11058_s5 + $0x38] sm:$0xf0] }
 0x21a   :  { %1154 = vmatpush.bf16.msra.mxu0 %v5433_v55  ;;  %v5429_v38 = vor.u32 %v7104_v18, %v5426_v31  ;;  %v7122_v55 = vld [vmem:[%s11058_s5 + $0xe4] sm:$0xf]  ;;  %v5474_v24 = vld [vmem:[%s11058_s5 + $0xb8] sm:$0xf0] }
 0x21b   :  { %957 = vmatpush.bf16.msrb.mxu2 %v5329_v46  ;;  %v5509_v46 = vor.u32 %v7124_v42, %v5506_v45  ;;  %v5458_v18 = vld [vmem:[%s11058_s5 + $0x98] sm:$0xf0]  ;;  %v7110_v31 = vld [vmem:[%s11058_s5 + $0x84] sm:$0xf] }
 0x21d   :  { %982 = vmatpush.bf16.msra.mxu1 %v5357_v39  ;;  %970 = vmatpush.bf16.msrb.mxu3 %v5277_v47  ;;  %v5325_v39 = vor.u32 %v7143_v36, %v5322_v37  ;;  %v5472_v47 = vld [vmem:[%s11058_s5 + $0xb0] sm:$0xf]  ;;  %v5450_v36 = vld [vmem:[%s11058_s5 + $0x88] sm:$0xf0] }
 0x21e   :  { %1155 = vmatpush.bf16.msra.mxu0 %v5425_v62  ;;  %v5473_v50 = vor.u32 %v7117_v48, %v5472_v47  ;;  %v7100_v62 = vld [vmem:[%s11058_s5 + $0x34] sm:$0xf]  ;;  %v5453_v37 = vor.u32 %v7110_v31, %v5450_v36  ;;  %v5656_v31 = vld [vmem:[%s11058_s5 + $0x2d0] sm:$0xf]  ;;  %v7187_v36 = vld [vmem:[%s11058_s5 + $0x2d4] sm:$0xf0] }
 0x21f   :  { %958 = vmatpush.bf16.msrb.mxu2 %v5321_v59  ;;  %v5501_v59 = vor.u32 %v7122_v55, %v5498_v58  ;;  %v7172_v55 = vld [vmem:[%s11058_s5 + $0x264] sm:$0xf]  ;;  %v5602_v58 = vld [vmem:[%s11058_s5 + $0x268] sm:$0xf0] }
 0x221   :  { %983 = vmatpush.bf16.msra.mxu1 %v5349_v54  ;;  %971 = vmatpush.bf16.msrb.mxu3 %v5269_v60  ;;  %v7095_v54 = vld [vmem:[%s11058_s5 + $0x4] sm:$0xf0]  ;;  %v5464_v60 = vld [vmem:[%s11058_s5 + $0xa0] sm:$0xf] }
 0x222   :  { %1156 = vmatpush.bf16.msra.mxu0 %v5417_v0  ;;  %v5385_v56 = vor.u32 %v7095_v54, %v5384_v53  ;;  %v5413_v0 = vor.u32 %v7100_v62, %v5410_v63  ;;  %v5600_v53 = vld [vmem:[%s11058_s5 + $0x260] sm:$0xf]  ;;  %v7173_v54 = vld [vmem:[%s11058_s5 + $0x264] sm:$0xf0]  ;;  %v7170_v62 = vld [vmem:[%s11058_s5 + $0x254] sm:$0xf] }
 0x223   :  { %1167 = vmatpush.bf16.msra.mxu2 %v5505_v61  ;;  %v7115_v61 = vld [vmem:[%s11058_s5 + $0xa4] sm:$0xf0]  ;;  %v5594_v63 = vld [vmem:[%s11058_s5 + $0x258] sm:$0xf0] }
 0x224   :  { %v5465_v43 = vor.u32 %v7115_v61, %v5464_v60  ;;  %v5592_v60 = vld [vmem:[%s11058_s5 + $0x250] sm:$0xf]  ;;  %v7171_v61 = vld [vmem:[%s11058_s5 + $0x254] sm:$0xf0] }
 0x225   :  { %972 = vmatpush.bf16.msrb.mxu3 %v5261_v4  ;;  %984 = vmatpush.bf16.msra.mxu1 %v5341_v14  ;;  %v5493_v4 = vor.u32 %v7120_v1, %v5490_v2  ;;  %v5584_v1 = vld [vmem:[%s11058_s5 + $0x240] sm:$0xf]  ;;  %v7169_v2 = vld [vmem:[%s11058_s5 + $0x244] sm:$0xf0] }
 0x226   :  { %1157 = vmatpush.bf16.msra.mxu0 %v5409_v15  ;;  %v7096_v15 = vld [vmem:[%s11058_s5 + $0x14] sm:$0xf] }
 0x227   :  { %1168 = vmatpush.bf16.msra.mxu2 %v5497_v9  ;;  %v5457_v9 = vor.u32 %v7113_v7, %v5456_v6  ;;  %v5397_v22 = vor.u32 %v7096_v15, %v5394_v21  ;;  %v5585_v6 = vor.u32 %v7169_v2, %v5584_v1  ;;  %v5586_v7 = vld [vmem:[%s11058_s5 + $0x248] sm:$0xf0]  ;;  %v5578_v21 = vld [vmem:[%s11058_s5 + $0x238] sm:$0xf0]  ;;  %v7180_v1 = vld [vmem:[%s11058_s5 + $0x2a4] sm:$0xf] }
 0x229   :  { %1181 = vmatpush.bf16.msra.mxu3 %v5445_v13  ;;  %985 = vmatpush.bf16.msra.mxu1 %v5333_v27  ;;  %v5482_v13 = vld [vmem:[%s11058_s5 + $0xc8] sm:$0xf0] }
 0x22a   :  { %1158 = vmatpush.bf16.msra.mxu0 %v5401_v30  ;;  %v5485_v14 = vor.u32 %v7118_v12, %v5482_v13  ;;  %v5469_v30 = vor.u32 %v7114_v28, %v5466_v29  ;;  %v5674_v13 = vld [vmem:[%s11058_s5 + $0x2f8] sm:$0xf0]  ;;  %v7165_v28 = vld [vmem:[%s11058_s5 + $0x224] sm:$0xf0] }
 0x22b   :  { %1169 = vmatpush.bf16.msra.mxu2 %v5489_v23  ;;  %v7116_v23 = vld [vmem:[%s11058_s5 + $0xb4] sm:$0xf] }
 0x22c   :  { %v5477_v25 = vor.u32 %v7116_v23, %v5474_v24  ;;  %v5664_v23 = vld [vmem:[%s11058_s5 + $0x2e0] sm:$0xf]  ;;  %v7189_v24 = vld [vmem:[%s11058_s5 + $0x2e4] sm:$0xf0] }
 0x22d   :  { %1182 = vmatpush.bf16.msra.mxu3 %v5437_v26  ;;  %986 = vmatpush.bf16.msra.mxu1 %v5325_v39  ;;  %v5386_v26 = vld [vmem:[%s11058_s5 + $0x8] sm:$0xf0] }
 0x22e   :  { %1159 = vmatpush.bf16.msra.mxu0 %v5393_v44  ;;  %v5389_v27 = vor.u32 %v7094_v3, %v5386_v26  ;;  %v5665_v3 = vor.u32 %v7189_v24, %v5664_v23  ;;  %v5666_v26 = vld [vmem:[%s11058_s5 + $0x2e8] sm:$0xf0] }
 0x22f   :  { %1170 = vmatpush.bf16.msra.mxu2 %v5481_v34  ;;  %v5461_v34 = vor.u32 %v7112_v33, %v5458_v18  ;;  %v7164_v33 = vld [vmem:[%s11058_s5 + $0x224] sm:$0xf]  ;;  %v5570_v18 = vld [vmem:[%s11058_s5 + $0x228] sm:$0xf0] }
 0x230   :  { %v5618_v23 = vld [vmem:[%s11058_s5 + $0x288] sm:$0xf0] }
 0x231   :  { %1183 = vmatpush.bf16.msra.mxu3 %v5429_v38  ;;  %1195 = vmatpush.bf16.msrb.mxu1 %v5509_v46 }
 0x232   :  { %1160 = vmatpush.bf16.msra.mxu0 %v5385_v56  ;;  %v5601_v56 = vor.u32 %v7173_v54, %v5600_v53  ;;  %v7160_v54 = vld [vmem:[%s11058_s5 + $0x204] sm:$0xf] }
 0x233   :  { %1171 = vmatpush.bf16.msra.mxu2 %v5473_v50 }
 0x235   :  { %1184 = vmatpush.bf16.msra.mxu3 %v5421_v52  ;;  %1196 = vmatpush.bf16.msrb.mxu1 %v5501_v59  ;;  %v5605_v59 = vor.u32 %v7172_v55, %v5602_v58  ;;  %v5554_v55 = vld [vmem:[%s11058_s5 + $0x208] sm:$0xf0]  ;;  %v7183_v58 = vld [vmem:[%s11058_s5 + $0x2b4] sm:$0xf0] }
 0x237   :  { %1172 = vmatpush.bf16.msra.mxu2 %v5465_v43  ;;  %v5593_v43 = vor.u32 %v7171_v61, %v5592_v60  ;;  %v5557_v60 = vor.u32 %v7160_v54, %v5554_v55  ;;  %v1545_v55 = vld [vmem:[%s11060_s10 + $0x30] sm:$0xff] }
 0x239   :  { %1185 = vmatpush.bf16.msra.mxu3 %v5413_v0  ;;  %1197 = vmatpush.bf16.msrb.mxu1 %v5493_v4  ;;  %v5597_v0 = vor.u32 %v7170_v62, %v5594_v63  ;;  %v7168_v4 = vld [vmem:[%s11058_s5 + $0x244] sm:$0xf]  ;;  %v5642_v62 = vld [vmem:[%s11058_s5 + $0x2b8] sm:$0xf0]  ;;  %v5632_v63 = vld [vmem:[%s11058_s5 + $0x2a0] sm:$0xf] }
 0x23a   :  { %v5589_v8 = vor.u32 %v7168_v4, %v5586_v7  ;;  %v5634_v4 = vld [vmem:[%s11058_s5 + $0x2a8] sm:$0xf0] }
 0x23b   :  { %1173 = vmatpush.bf16.msra.mxu2 %v5457_v9  ;;  %v5672_v9 = vld [vmem:[%s11058_s5 + $0x2f0] sm:$0xf] }
 0x23c   :  { %v5673_v12 = vor.u32 %v7191_v10, %v5672_v9  ;;  %v5624_v9 = vld [vmem:[%s11058_s5 + $0x290] sm:$0xf]  ;;  %v7179_v10 = vld [vmem:[%s11058_s5 + $0x294] sm:$0xf0] }
 0x23d   :  { %1186 = vmatpush.bf16.msra.mxu3 %v5405_v11  ;;  %1198 = vmatpush.bf16.msrb.mxu1 %v5485_v14  ;;  %v7190_v11 = vld [vmem:[%s11058_s5 + $0x2f4] sm:$0xf]  ;;  %v5576_v14 = vld [vmem:[%s11058_s5 + $0x230] sm:$0xf] }
 0x23e   :  { %v5677_v17 = vor.u32 %v7190_v11, %v5674_v13  ;;  %v5577_v15 = vor.u32 %v7167_v16, %v5576_v14  ;;  %v7178_v11 = vld [vmem:[%s11058_s5 + $0x294] sm:$0xf]  ;;  %v5625_v13 = vor.u32 %v7179_v10, %v5624_v9  ;;  %v5626_v14 = vld [vmem:[%s11058_s5 + $0x298] sm:$0xf0] }
 0x23f   :  { %1174 = vmatpush.bf16.msra.mxu2 %v5449_v20  ;;  %v7166_v20 = vld [vmem:[%s11058_s5 + $0x234] sm:$0xf]  ;;  %v5629_v16 = vor.u32 %v7178_v11, %v5626_v14  ;;  %v1503_v11 = vld [vmem:[%s11061_s29] sm:$0x3] }
 0x241   :  { %1187 = vmatpush.bf16.msra.mxu3 %v5397_v22  ;;  %1199 = vmatpush.bf16.msrb.mxu1 %v5477_v25  ;;  %v5581_v22 = vor.u32 %v7166_v20, %v5578_v21  ;;  %v7188_v25 = vld [vmem:[%s11058_s5 + $0x2e4] sm:$0xf]  ;;  %v7177_v20 = vld [vmem:[%s11058_s5 + $0x284] sm:$0xf0] }
 0x242   :  { %v7176_v21 = vld [vmem:[%s11058_s5 + $0x284] sm:$0xf] }
 0x245   :  { %1188 = vmatpush.bf16.msra.mxu3 %v5389_v27  ;;  %1200 = vmatpush.bf16.msrb.mxu1 %v5469_v30  ;;  %v5568_v27 = vld [vmem:[%s11058_s5 + $0x220] sm:$0xf]  ;;  %v5669_v30 = vor.u32 %v7188_v25, %v5666_v26 }
 0x249   :  { %1201 = vmatpush.bf16.msrb.mxu1 %v5461_v34  ;;  %v5573_v34 = vor.u32 %v7164_v33, %v5570_v18 }
 0x24d   :  { %1202 = vmatpush.bf16.msrb.mxu1 %v5453_v37  ;;  %v7186_v37 = vld [vmem:[%s11058_s5 + $0x2d4] sm:$0xf] }
 0x285   :  { %v650_v32 = vpop.f32.mrf.mxu1  ;;  %v664_v46 = vpop.f32.mrf.mxu2 }
 0x28b   :  { %v723_v38 = vpop.f32.mrf.mxu3 }
 0x28d   :  { %v652_v39 = vpop.f32.mrf.mxu1  ;;  %v666_v48 = vpop.f32.mrf.mxu2 }
 0x28e   :  { %v669_v47 = vpack.c.bf16 %v652_v39, %v650_v32  ;;  %v670_v49 = vpack.c.bf16 %v666_v48, %v664_v46  ;;  %v5569_v32 = vor.u32 %v7165_v28, %v5568_v27  ;;  %v5658_v39 = vld [vmem:[%s11058_s5 + $0x2d8] sm:$0xf0]  ;;  %v5648_v48 = vld [vmem:[%s11058_s5 + $0x2c0] sm:$0xf] }
 0x28f   :  { %v5562_v46 = vld [vmem:[%s11058_s5 + $0x218] sm:$0xf0] }
 0x293   :  { %v725_v40 = vpop.f32.mrf.mxu3 }
 0x294   :  { %v742_v41 = vpack.c.bf16 %v725_v40, %v723_v38  ;;  %v5657_v38 = vor.u32 %v7187_v36, %v5656_v31  ;;  %v5560_v40 = vld [vmem:[%s11058_s5 + $0x210] sm:$0xf] }
 0x295   :  { %v737_v42 = vpop.f32.mrf.mxu1 }
 0x296   :  { %945 = vmatmul.bf16.vlgmr.msrb.gmra.mxu0 %v742_v41  ;;  %973 = vmatmul.bf16.vlgmr.msrb.gmra.mxu3 %v742_v41  ;;  %v7163_v41 = vld [vmem:[%s11058_s5 + $0x214] sm:$0xf0] }
 0x297   :  { %1226 = vmatpush.bf16.msrb.mxu0 %v8008_v35  ;;  %v7174_v35 = vld [vmem:[%s11058_s5 + $0x274] sm:$0xf] }
 0x298   :  { %v5613_v52 = vor.u32 %v7174_v35, %v5610_v51  ;;  %v5552_v35 = vld [vmem:[%s11058_s5 + $0x200] sm:$0xf] }
 0x29b   :  { %1227 = vmatpush.bf16.msrb.mxu0 %v7970_v57  ;;  %v7159_v57 = vld [vmem:[%s11059_s1 + $0x10] sm:$0xff]  ;;  %s11065_s1 = sld [smem:[#allocation17_spill]] }
 0x29d   :  { %v739_v44 = vpop.f32.mrf.mxu1 }
 0x29e   :  { %v743_v45 = vpack.c.bf16 %v739_v44, %v737_v42  ;;  %v5661_v42 = vor.u32 %v7186_v37, %v5658_v39  ;;  %v5561_v44 = vor.u32 %v7163_v41, %v5560_v40  ;;  %v1554_v39 = vld [vmem:[%s11060_s10 + $0x78] sm:$0xff]  ;;  %v1553_v41 = vld [vmem:[%s11060_s10 + $0x70] sm:$0xff] }
 0x2a0   :  { %959 = vmatmul.bf16.vlgmr.msrb.gmra.mxu2 %v743_v45  ;;  %987 = vmatmul.bf16.vlgmr.msra.gmra.mxu1 %v743_v45  ;;  %v7162_v45 = vld [vmem:[%s11058_s5 + $0x214] sm:$0xf] }
 0x2a1   :  { %1240 = vmatpush.bf16.msrb.mxu2 %v7981_v19  ;;  %v5608_v19 = vld [vmem:[%s11058_s5 + $0x270] sm:$0xf]  ;;  %1471 = vmatpush.bf16.msra.mxu1 %v5613_v52 }
 0x2a5   :  { %1241 = vmatpush.bf16.msrb.mxu2 %v7999_v5  ;;  %v7175_v5 = vld [vmem:[%s11058_s5 + $0x274] sm:$0xf0]  ;;  %1472 = vmatpush.bf16.msra.mxu1 %v5605_v59  ;;  %v7182_v59 = vld [vmem:[%s11058_s5 + $0x2b4] sm:$0xf] }
 0x2a6   :  { %1161 = vmatmul.bf16.vlgmr.msra.gmra.mxu0 %v669_v47  ;;  %1189 = vmatmul.bf16.vlgmr.msra.gmra.mxu3 %v669_v47  ;;  %v5609_v50 = vor.u32 %v7175_v5, %v5608_v19  ;;  %v5565_v47 = vor.u32 %v7162_v45, %v5562_v46  ;;  %v5650_v5 = vld [vmem:[%s11058_s5 + $0x2c8] sm:$0xf0]  ;;  %v1570_v45 = vld [vmem:[%s11060_s10 + $0xf8] sm:$0xff] }
 0x2a7   :  { %1457 = vmatpush.bf16.msra.mxu0 %v5673_v12 }
 0x2a8   :  { %1443 = vmatpush.bf16.msrb.mxu3 %v5609_v50  ;;  %v7161_v50 = vld [vmem:[%s11058_s5 + $0x204] sm:$0xf0] }
 0x2a9   :  { %1473 = vmatpush.bf16.msra.mxu1 %v5597_v0  ;;  %v5553_v53 = vor.u32 %v7161_v50, %v5552_v35  ;;  %v7181_v0 = vld [vmem:[%s11058_s5 + $0x2a4] sm:$0xf0]  ;;  %v1567_v35 = vld [vmem:[%s11060_s10 + $0xe0] sm:$0xff] }
 0x2aa   :  { %v5633_v2 = vor.u32 %v7181_v0, %v5632_v63  ;;  %v1547_v50 = vld [vmem:[%s11060_s10 + $0x40] sm:$0xff]  ;;  %v1561_v63 = vld [vmem:[%s11060_s10 + $0xb0] sm:$0xff] }
 0x2ab   :  { %1458 = vmatpush.bf16.msra.mxu0 %v5665_v3  ;;  %v5621_v3 = vor.u32 %v7176_v21, %v5618_v23  ;;  %v1541_v0 = vld [vmem:[%s11060_s10 + $0x10] sm:$0xff]  ;;  %v1505_v21 = vperm.slane %v1503_v11, 0 }
 0x2ac   :  { %1444 = vmatpush.bf16.msrb.mxu3 %v5601_v56  ;;  %v5640_v56 = vld [vmem:[%s11058_s5 + $0x2b0] sm:$0xf] }
 0x2ad   :  { %1474 = vmatpush.bf16.msra.mxu1 %v5589_v8  ;;  %v5641_v61 = vor.u32 %v7183_v58, %v5640_v56  ;;  %v5637_v8 = vor.u32 %v7180_v1, %v5634_v4  ;;  %v1564_v56 = vld [vmem:[%s11060_s10 + $0xc8] sm:$0xff]  ;;  %v1559_v4 = vld [vmem:[%s11060_s10 + $0xa0] sm:$0xff] }
 0x2ae   :  { %v1544_v58 = vld [vmem:[%s11060_s10 + $0x28] sm:$0xff] }
 0x2af   :  { %1459 = vmatpush.bf16.msra.mxu0 %v5657_v38  ;;  %v1560_v1 = vld [vmem:[%s11060_s10 + $0xa8] sm:$0xff] }
 0x2b0   :  { %1175 = vmatmul.bf16.vlgmr.msra.gmra.mxu2 %v670_v49  ;;  %1203 = vmatmul.bf16.vlgmr.msrb.gmra.mxu1 %v670_v49  ;;  %v7185_v49 = vld [vmem:[%s11058_s5 + $0x2c4] sm:$0xf0] }
 0x2b1   :  { %1445 = vmatpush.bf16.msrb.mxu3 %v5593_v43  ;;  %1485 = vmatpush.bf16.msra.mxu2 %v5677_v17  ;;  %v5649_v19 = vor.u32 %v7185_v49, %v5648_v48  ;;  %v5645_v43 = vor.u32 %v7182_v59, %v5642_v62  ;;  %v1569_v48 = vld [vmem:[%s11060_s10 + $0xf0] sm:$0xff]  ;;  %v1563_v59 = vld [vmem:[%s11060_s10 + $0xc0] sm:$0xff]  ;;  %v1562_v62 = vld [vmem:[%s11060_s10 + $0xb8] sm:$0xff] }
 0x2b2   :  { %1475 = vmatpush.bf16.msra.mxu1 %v5581_v22  ;;  %v1549_v49 = vld [vmem:[%s11060_s10 + $0x50] sm:$0xff] }
 0x2b3   :  { %1460 = vmatpush.bf16.msra.mxu0 %v5649_v19 }
 0x2b5   :  { %1446 = vmatpush.bf16.msrb.mxu3 %v5585_v6  ;;  %1486 = vmatpush.bf16.msra.mxu2 %v5669_v30 }
 0x2b6   :  { %5516 = vmatmul.msk.bf16.vlgmr.msrb.gmra.mxu0 %vm637_vm10, %v7159_v57  ;;  %1476 = vmatpush.bf16.msra.mxu1 %v5573_v34 }
 0x2b7   :  { %1461 = vmatpush.bf16.msra.mxu0 %v5641_v61  ;;  %v1543_v61 = vld [vmem:[%s11060_s10 + $0x20] sm:$0xff] }
 0x2b9   :  { %1447 = vmatpush.bf16.msrb.mxu3 %v5577_v15  ;;  %1487 = vmatpush.bf16.msra.mxu2 %v5661_v42  ;;  %v5616_v15 = vld [vmem:[%s11058_s5 + $0x280] sm:$0xf]  ;;  %v1552_v42 = vld [vmem:[%s11060_s10 + $0x68] sm:$0xff] }
 0x2ba   :  { %1477 = vmatpush.bf16.msra.mxu1 %v5565_v47  ;;  %v5617_v22 = vor.u32 %v7177_v20, %v5616_v15  ;;  %v1550_v47 = vld [vmem:[%s11060_s10 + $0x58] sm:$0xff] }
 0x2bb   :  { %1462 = vmatpush.bf16.msra.mxu0 %v5633_v2  ;;  %v1540_v2 = vld [vmem:[%s11060_s10 + $0x8] sm:$0xff] }
 0x2bd   :  { %1448 = vmatpush.bf16.msrb.mxu3 %v5569_v32 }
 0x2be   :  { %1478 = vmatpush.bf16.msra.mxu1 %v5557_v60 }
 0x2bf   :  { %1463 = vmatpush.bf16.msra.mxu0 %v5625_v13 }
 0x2c0   :  { %5517 = vmatmul.msk.bf16.vlgmr.msrb.gmra.mxu2 %vm637_vm10, %v7159_v57  ;;  %v7184_v57 = vld [vmem:[%s11058_s5 + $0x2c4] sm:$0xf]  ;;  %s11063_s5 = sld [smem:[#allocation14_spill]] }
 0x2c1   :  { %1449 = vmatpush.bf16.msrb.mxu3 %v5561_v44  ;;  %v5653_v52 = vor.u32 %v7184_v57, %v5650_v5  ;;  %v1551_v44 = vld [vmem:[%s11060_s10 + $0x60] sm:$0xff]  ;;  %v1568_v57 = vld [vmem:[%s11060_s10 + $0xe8] sm:$0xff] }
 0x2c2   :  { %1629 = vmatpush.msrb.mxu1 %v1554_v39  ;;  %v1548_v5 = vld [vmem:[%s11060_s10 + $0x48] sm:$0xff] }
 0x2c3   :  { %1488 = vmatpush.bf16.msra.mxu2 %v5653_v52  ;;  %1464 = vmatpush.bf16.msra.mxu0 %v5617_v22  ;;  %v1546_v52 = vld [vmem:[%s11060_s10 + $0x38] sm:$0xff]  ;;  %v1555_v22 = vld [vmem:[%s11060_s10 + $0x80] sm:$0xff] }
 0x2c4   :  { %1630 = vmatpush.msrb.mxu1 %v1553_v41 }
 0x2c5   :  { %1450 = vmatpush.bf16.msrb.mxu3 %v5553_v53  ;;  %v1565_v53 = vld [vmem:[%s11060_s10 + $0xd0] sm:$0xff] }
 0x2c6   :  { %1631 = vmatpush.msrb.mxu1 %v1552_v42 }
 0x2c7   :  { %1489 = vmatpush.bf16.msra.mxu2 %v5645_v43  ;;  %1591 = vmatpush.msrb.mxu0 %v1570_v45  ;;  %v1542_v43 = vld [vmem:[%s11060_s10 + $0x18] sm:$0xff] }
 0x2c8   :  { %1632 = vmatpush.msrb.mxu1 %v1551_v44 }
 0x2c9   :  { %1571 = vmatpush.msra.mxu3 %v1554_v39  ;;  %1592 = vmatpush.msrb.mxu0 %v1569_v48 }
 0x2ca   :  { %1633 = vmatpush.msrb.mxu1 %v1550_v47 }
 0x2cb   :  { %1490 = vmatpush.bf16.msra.mxu2 %v5637_v8  ;;  %1572 = vmatpush.msra.mxu3 %v1553_v41  ;;  %v1558_v8 = vld [vmem:[%s11060_s10 + $0x98] sm:$0xff] }
 0x2cc   :  { %1593 = vmatpush.msrb.mxu0 %v1568_v57  ;;  %1634 = vmatpush.msrb.mxu1 %v1549_v49 }
 0x2cd   :  { %1573 = vmatpush.msra.mxu3 %v1552_v42 }
 0x2ce   :  { %1594 = vmatpush.msrb.mxu0 %v1567_v35  ;;  %1635 = vmatpush.msrb.mxu1 %v1548_v5 }
 0x2cf   :  { %1491 = vmatpush.bf16.msra.mxu2 %v5629_v16  ;;  %1574 = vmatpush.msra.mxu3 %v1551_v44  ;;  %v1556_v16 = vld [vmem:[%s11060_s10 + $0x88] sm:$0xff] }
 0x2d0   :  { %1636 = vmatpush.msrb.mxu1 %v1547_v50 }
 0x2d1   :  { %1575 = vmatpush.msra.mxu3 %v1550_v47 }
 0x2d2   :  { %1637 = vmatpush.msrb.mxu1 %v1546_v52 }
 0x2d3   :  { %1492 = vmatpush.bf16.msra.mxu2 %v5621_v3  ;;  %1576 = vmatpush.msra.mxu3 %v1549_v49 }
 0x2d4   :  { %1638 = vmatpush.msrb.mxu1 %v1545_v55 }
 0x2d5   :  { %1577 = vmatpush.msra.mxu3 %v1548_v5 }
 0x2d6   :  { %1639 = vmatpush.msrb.mxu1 %v1544_v58 }
 0x2d7   :  { %1649 = vmatpush.msrb.mxu2 %v1570_v45  ;;  %1578 = vmatpush.msra.mxu3 %v1547_v50 }
 0x2d8   :  { %1640 = vmatpush.msrb.mxu1 %v1543_v61 }
 0x2d9   :  { %1650 = vmatpush.msrb.mxu2 %v1569_v48  ;;  %1579 = vmatpush.msra.mxu3 %v1546_v52 }
 0x2da   :  { %1641 = vmatpush.msrb.mxu1 %v1542_v43 }
 0x2db   :  { %1651 = vmatpush.msrb.mxu2 %v1568_v57  ;;  %1580 = vmatpush.msra.mxu3 %v1545_v55 }
 0x2dc   :  { %1642 = vmatpush.msrb.mxu1 %v1541_v0 }
 0x2dd   :  { %1652 = vmatpush.msrb.mxu2 %v1567_v35  ;;  %1581 = vmatpush.msra.mxu3 %v1544_v58 }
 0x2de   :  { %1643 = vmatpush.msrb.mxu1 %v1540_v2 }
 0x2df   :  { %1582 = vmatpush.msra.mxu3 %v1543_v61 }
 0x2e1   :  { %1583 = vmatpush.msra.mxu3 %v1542_v43 }
 0x2e3   :  { %1584 = vmatpush.msra.mxu3 %v1541_v0 }
 0x2e5   :  { %1585 = vmatpush.msra.mxu3 %v1540_v2 }
 0x313   :  { %v946_v29 = vpop.f32.mrf.mxu0 }
 0x319   :  { %v8591_v37 = vpop.f32.mrf.mxu3 }
 0x31b   :  { %v948_v51 = vpop.f32.mrf.mxu0 }
 0x31d   :  { %v8593_v38 = vpop.f32.mrf.mxu1 }
 0x31e   :  { %v989_v15 = vadd.f32 %v8593_v38, %v8591_v37 }
 0x321   :  { %v8598_v40 = vpop.f32.mrf.mxu3 }
 0x323   :  { %v960_v6 = vpop.f32.mrf.mxu2  ;;  %v1162_v7 = vpop.f32.mrf.mxu0 }
 0x324   :  { %v961_v12 = vadd.f32 %v960_v6, %v946_v29 }
 0x325   :  { %v8612_v46 = vpop.f32.mrf.mxu1 }
 0x326   :  { %v8573_v17 = vadd.f32 %v1162_v7, %v961_v12  ;;  %v1539_v7 = vld [vmem:[%s11060_s10] sm:$0xff]  ;;  %v1557_v12 = vld [vmem:[%s11060_s10 + $0x90] sm:$0xff] }
 0x327   :  { %1586 = vmatpush.msra.mxu3 %v1539_v7  ;;  %1644 = vmatpush.msrb.mxu1 %v1539_v7 }
 0x329   :  { %v8626_v19 = vpop.f32.mrf.mxu3 }
 0x32b   :  { %v962_v24 = vpop.f32.mrf.mxu2  ;;  %v1164_v25 = vpop.f32.mrf.mxu0 }
 0x32c   :  { %v963_v28 = vadd.f32 %v962_v24, %v948_v51  ;;  %v1566_v51 = vld [vmem:[%s11060_s10 + $0xd8] sm:$0xff] }
 0x32d   :  { %1595 = vmatpush.msrb.mxu0 %v1566_v51  ;;  %1653 = vmatpush.msrb.mxu2 %v1566_v51  ;;  %v8646_v54 = vpop.f32.mrf.mxu1 }
 0x32e   :  { %v1165_v29 = vadd.f32 %v1164_v25, %v963_v28 }
 0x32f   :  { %1596 = vmatpush.msrb.mxu0 %v1565_v53  ;;  %1654 = vmatpush.msrb.mxu2 %v1565_v53 }
 0x331   :  { %1597 = vmatpush.msrb.mxu0 %v1564_v56  ;;  %1655 = vmatpush.msrb.mxu2 %v1564_v56  ;;  %v8660_v60 = vpop.f32.mrf.mxu3 }
 0x333   :  { %v8587_v26 = vpop.f32.mrf.mxu2  ;;  %v1229_v27 = vpop.f32.mrf.mxu0  ;;  %1598 = vmatpush.msrb.mxu0 %v1563_v59  ;;  %1656 = vmatpush.msrb.mxu2 %v1563_v59 }
 0x334   :  { %v1177_v13 = vadd.f32 %v8587_v26, %v8573_v17  ;;  %v1191_v17 = vadd.f32 %v8626_v19, %v989_v15 }
 0x335   :  { %1599 = vmatpush.msrb.mxu0 %v1562_v62  ;;  %1657 = vmatpush.msrb.mxu2 %v1562_v62  ;;  %v1206_v6 = vpop.f32.mrf.mxu1 }
 0x336   :  { %v1205_v25 = vadd.f32 %v8646_v54, %v1191_v17 }
 0x337   :  { %1600 = vmatpush.msrb.mxu0 %v1561_v63  ;;  %1658 = vmatpush.msrb.mxu2 %v1561_v63 }
 0x339   :  { %1601 = vmatpush.msrb.mxu0 %v1560_v1  ;;  %1659 = vmatpush.msrb.mxu2 %v1560_v1 }
 0x33b   :  { %v1178_v30 = vpop.f32.mrf.mxu2  ;;  %v1231_v32 = vpop.f32.mrf.mxu0  ;;  %1602 = vmatpush.msrb.mxu0 %v1559_v4  ;;  %1660 = vmatpush.msrb.mxu2 %v1559_v4 }
 0x33c   :  { %v8589_v33 = vadd.f32 %v1178_v30, %v1165_v29  ;;  %v1248_v18 = vpack.c.bf16 %v1231_v32, %v1229_v27  ;;  %v1506_v27 = vperm.slane %v1503_v11, 1 }
 0x33d   :  { %1603 = vmatpush.msrb.mxu0 %v1558_v8  ;;  %1661 = vmatpush.msrb.mxu2 %v1558_v8 }
 0x33e   :  { %1451 = vmatmul.bf16.vlgmr.msrb.gmra.mxu3 %v1248_v18  ;;  %1479 = vmatmul.bf16.vlgmr.msra.gmra.mxu1 %v1248_v18  ;;  %v991_v18 = vadd.f32 %v8612_v46, %v8598_v40 }
 0x33f   :  { %1604 = vmatpush.msrb.mxu0 %v1557_v12  ;;  %1662 = vmatpush.msrb.mxu2 %v1557_v12 }
 0x341   :  { %1605 = vmatpush.msrb.mxu0 %v1556_v16  ;;  %1663 = vmatpush.msrb.mxu2 %v1556_v16 }
 0x343   :  { %v1243_v34 = vpop.f32.mrf.mxu2  ;;  %1606 = vmatpush.msrb.mxu0 %v1555_v22  ;;  %1664 = vmatpush.msrb.mxu2 %v1555_v22 }
 0x34b   :  { %v1245_v31 = vpop.f32.mrf.mxu2 }
 0x34c   :  { %v1249_v36 = vpack.c.bf16 %v1245_v31, %v1243_v34 }
 0x34e   :  { %1465 = vmatmul.bf16.vlgmr.msra.gmra.mxu0 %v1249_v36  ;;  %1493 = vmatmul.bf16.vlgmr.msra.gmra.mxu2 %v1249_v36  ;;  %v1193_v36 = vadd.f32 %v8660_v60, %v991_v18 }
 0x350   :  { %v1207_v39 = vadd.f32 %v1206_v6, %v1193_v36  ;;  %v1697_v36 = vld [vmem:[%s11062_s9] sm:$0xff] }
 0x3bb   :  { %v1480_v23 = vpop.f32.mrf.mxu1 }
 0x3c1   :  { %v1452_v9 = vpop.f32.mrf.mxu3 }
 0x3c3   :  { %v1482_v41 = vpop.f32.mrf.mxu1 }
 0x3c9   :  { %v1454_v28 = vpop.f32.mrf.mxu3 }
 0x3cb   :  { %v1466_v10 = vpop.f32.mrf.mxu0 }
 0x3cc   :  { %v1467_v14 = vadd.f32 %v1466_v10, %v1452_v9 }
 0x3ce   :  { %v1499_v20 = vadd.f32 %v1467_v14, %v1177_v13 }
 0x3d0   :  { %v1509_v3 = vadd.f32 %v1505_v21, %v1499_v20 }
 0x3d1   :  { %v1494_v24 = vpop.f32.mrf.mxu2 }
 0x3d2   :  { %v1495_v26 = vadd.f32 %v1494_v24, %v1480_v23  ;;  %v1517_v34 = vmul.f32 0.2, %v1509_v3  ;;  %vm1513_vm11 = vcmp.ge.f32.partialorder %v1509_v3, 0.0 }
 0x3d3   :  { %v1468_v29 = vpop.f32.mrf.mxu0 }
 0x3d4   :  { %v1500_v30 = vadd.f32 %v1495_v26, %v1205_v25  ;;  %v1469_v32 = vadd.f32 %v1468_v29, %v1454_v28  ;;  %v8714_v44 = vsel %vm1513_vm11, %v1509_v3, %v1517_v34  ;;  %v1704_v28 = vld [vmem:[%s11062_s9 + $0x38] sm:$0xff]  ;;  %v1701_v29 = vld [vmem:[%s11062_s9 + $0x20] sm:$0xff]  ;;  %vm2933_vm11 = vcmask 64512  }
 0x3d5   :  { %1740 = vmatpush.msra.mxu0 %v1704_v28  ;;  %v1700_v34 = vld [vmem:[%s11062_s9 + $0x18] sm:$0xff] }
 0x3d6   :  { %v1501_v31 = vadd.f32 %v1469_v32, %v8589_v33  ;;  %v1510_v37 = vadd.f32 %v1506_v27, %v1500_v30  ;;  %v1611_v33 = vmul.f32 %v8714_v44, %v8714_v44  ;;  %v1702_v30 = vld [vmem:[%s11062_s9 + $0x28] sm:$0xff]  ;;  %v1699_v32 = vld [vmem:[%s11062_s9 + $0x10] sm:$0xff] }
 0x3d7   :  { %1741 = vmatpush.msra.mxu0 %v1702_v30 }
 0x3d8   :  { %v1511_v38 = vadd.f32 %v1505_v21, %v1501_v31  ;;  %v1518_v48 = vmul.f32 0.2, %v1510_v37  ;;  %vm1514_vm13 = vcmp.ge.f32.partialorder %v1510_v37, 0.0  ;;  %v7522_v21 = vmov 128.0  }
 0x3d9   :  { %v1496_v42 = vpop.f32.mrf.mxu2  ;;  %7484 = vrcp.f32 %v7522_v21  ;;  %1742 = vmatpush.msra.mxu0 %v1700_v34  ;;  %v7255_v21 = vld [vmem:[%s11065_s1 + $0x1f4] sm:$0xf0] }
 0x3da   :  { %vm1515_vm12 = vcmp.ge.f32.partialorder %v1511_v38, 0.0  ;;  %v1519_v45 = vmul.f32 0.2, %v1511_v38  ;;  %v1497_v47 = vadd.f32 %v1496_v42, %v1482_v41  ;;  %v8724_v5 = vsel %vm1514_vm13, %v1510_v37, %v1518_v48  ;;  %v1698_v37 = vld [vmem:[%s11062_s9 + $0x8] sm:$0xff] }
 0x3db   :  { %v1612_v54 = vmul.f32 %v8724_v5, %v8724_v5  ;;  %1743 = vmatpush.msra.mxu0 %v1698_v37 }
 0x3dc   :  { %v8716_v49 = vsel %vm1515_vm12, %v1511_v38, %v1519_v45  ;;  %v1502_v40 = vadd.f32 %v1497_v47, %v1207_v39 }
 0x3dd   :  { %v1525_v46 = vadd.f32 %v8716_v49, %v8714_v44  ;;  %v1613_v57 = vmul.f32 %v8716_v49, %v8716_v49 }
 0x3de   :  { %v1512_v19 = vadd.f32 %v1506_v27, %v1502_v40  ;;  %v1703_v27 = vld [vmem:[%s11062_s9 + $0x30] sm:$0xff] }
 0x3df   :  { %v1526_v35 = vrot.slane %v1525_v46, 4  ;;  %v1615_v50 = vadd.f32 %v1613_v57, %v1611_v33  ;;  %v7485_v22 = vpop.eup %7484  ;;  %1720 = vmatpush.msrb.mxu3 %v1703_v27  ;;  %1763 = vmatpush.msra.mxu1 %v1703_v27 }
 0x3e0   :  { %vm1516_vm14 = vcmp.ge.f32.partialorder %v1512_v19, 0.0  ;;  %v1520_v51 = vmul.f32 0.2, %v1512_v19  ;;  %v1670_v23 = vmul.f32 128.0, %v7485_v22  ;;  %vm1674_vm15 = vweird.f32 %v7485_v22 }
 0x3e1   :  { %v1527_v52 = vadd.f32 %v1526_v35, %v1525_v46  ;;  %v1616_v53 = vrot.slane %v1615_v50, 4  ;;  %1721 = vmatpush.msrb.mxu3 %v1701_v29  ;;  %1764 = vmatpush.msra.mxu1 %v1701_v29  ;;  %v5761_v29 = vld [vmem:[%s11065_s1 + $0x150] sm:$0xf] }
 0x3e2   :  { %v8728_v55 = vsel %vm1516_vm14, %v1512_v19, %v1520_v51  ;;  %v1671_v17 = vsub.f32 1.0, %v1670_v23  ;;  %v5843_v23 = vld [vmem:[%s11065_s1 + $0x1f8] sm:$0xf0] }
 0x3e3   :  { %v1532_v56 = vadd.f32 %v8728_v55, %v8724_v5  ;;  %v1614_v58 = vmul.f32 %v8728_v55, %v8728_v55  ;;  %v1528_v59 = vrot.slane %v1527_v52, 2  ;;  %v1617_v60 = vadd.f32 %v1616_v53, %v1615_v50  ;;  %1722 = vmatpush.msrb.mxu3 %v1699_v32  ;;  %1765 = vmatpush.msra.mxu1 %v1699_v32 }
 0x3e4   :  { %v1672_v24 = vmul.f32 %v7485_v22, %v1671_v17 }
 0x3e5   :  { %v1533_v61 = vrot.slane %v1532_v56, 4  ;;  %v1622_v62 = vadd.f32 %v1614_v58, %v1612_v54  ;;  %v1529_v43 = vadd.f32 %v1528_v59, %v1527_v52  ;;  %v1618_v63 = vrot.slane %v1617_v60, 2  ;;  %1723 = vmatpush.msrb.mxu3 %v1697_v36  ;;  %1766 = vmatpush.msra.mxu1 %v1697_v36  ;;  %v1681_v52 = vld [vmem:[%s11063_s5] sm:$0x1]  ;;  %s11066_s5 = sld [smem:[#allocation16_spill]] }
 0x3e6   :  { %v1673_v26 = vadd.f32 %v7485_v22, %v1672_v24  ;;  %v7234_v36 = vld [vmem:[%s11065_s1 + $0x154] sm:$0xf] }
 0x3e7   :  { %v1530_v0 = vrot.slane %v1529_v43, 1  ;;  %v1619_v1 = vadd.f32 %v1618_v63, %v1617_v60  ;;  %v1534_v2 = vadd.f32 %v1533_v61, %v1532_v56  ;;  %v1623_v4 = vrot.slane %v1622_v62, 4  ;;  %v1694_v56 = vld [vmem:[%s11064_s11] sm:$0x1] }
 0x3e8   :  { %v1675_v31 = vsel %vm1674_vm15, %v7485_v22, %v1673_v26  ;;  %v7254_v22 = vld [vmem:[%s11065_s1 + $0x1f4] sm:$0xf]  ;;  %v5771_v26 = vld [vmem:[%s11065_s1 + $0x168] sm:$0xf0] }
 0x3e9   :  { %v1531_v6 = vadd.f32 %v1530_v0, %v1529_v43  ;;  %v1620_v7 = vrot.slane %v1619_v1, 1  ;;  %v1535_v8 = vrot.slane %v1534_v2, 2  ;;  %v1624_v9 = vadd.f32 %v1623_v4, %v1622_v62  ;;  %v7239_v4 = vld [vmem:[%s11065_s1 + $0x174] sm:$0xf0] }
 0x3eb   :  { %1587 = vmatmul.f32.vlgmr.msra.gmra.mxu3 %v1531_v6  ;;  %v1621_v10 = vadd.f32 %v1620_v7, %v1619_v1  ;;  %v1536_v11 = vadd.f32 %v1535_v8, %v1534_v2  ;;  %v1625_v12 = vrot.slane %v1624_v9, 2  ;;  %v5777_v2 = vld [vmem:[%s11065_s1 + $0x170] sm:$0xf]  ;;  %v7238_v6 = vld [vmem:[%s11065_s1 + $0x174] sm:$0xf] }
 0x3ec   :  { %1783 = vmatpush.msra.mxu3 %v1704_v28  ;;  %v5779_v7 = vld [vmem:[%s11065_s1 + $0x178] sm:$0xf0] }
 0x3ed   :  { %1645 = vmatmul.f32.vlgmr.msrb.gmra.mxu1 %v1621_v10  ;;  %v1537_v13 = vrot.slane %v1536_v11, 1  ;;  %v1626_v14 = vadd.f32 %v1625_v12, %v1624_v9  ;;  %v5782_v10 = vor.u32 %v7238_v6, %v5779_v7  ;;  %v5684_v12 = vld [vmem:[%s11066_s5 + $0x4] sm:$0xf] }
 0x3ee   :  { %1784 = vmatpush.msra.mxu3 %v1702_v30  ;;  %v7235_v30 = vld [vmem:[%s11065_s1 + $0x154] sm:$0xf0] }
 0x3ef   :  { %v1538_v16 = vadd.f32 %v1537_v13, %v1536_v11  ;;  %v1627_v15 = vrot.slane %v1626_v14, 1  ;;  %v1805_v13 = vld [vmem:[%s11066_s5] sm:$0xf] }
 0x3f0   :  { %1785 = vmatpush.msra.mxu3 %v1700_v34  ;;  %v7253_v34 = vld [vmem:[%s11065_s1 + $0x1e4] sm:$0xf0] }
 0x3f1   :  { %1607 = vmatmul.f32.vlgmr.msrb.gmra.mxu0 %v1538_v16  ;;  %v1628_v20 = vadd.f32 %v1627_v15, %v1626_v14  ;;  %v5769_v14 = vld [vmem:[%s11065_s1 + $0x160] sm:$0xf]  ;;  %v7237_v16 = vld [vmem:[%s11065_s1 + $0x164] sm:$0xf0]  ;;  %v5841_v15 = vld [vmem:[%s11065_s1 + $0x1f0] sm:$0xf] }
 0x3f2   :  { %1786 = vmatpush.msra.mxu3 %v1698_v37  ;;  %v5770_v27 = vor.u32 %v7237_v16, %v5769_v14  ;;  %v5842_v32 = vor.u32 %v7255_v21, %v5841_v15  ;;  %v5729_v16 = vld [vmem:[%s11065_s1 + $0x110] sm:$0xf]  ;;  %v7227_v15 = vld [vmem:[%s11065_s1 + $0x114] sm:$0xf0] }
 0x3f3   :  { %1665 = vmatmul.f32.vlgmr.msrb.gmra.mxu2 %v1628_v20 }
 0x46a   :  { %v1646_v39 = vpop.f32.mrf.mxu1 }
 0x46e   :  { %v1588_v25 = vpop.f32.mrf.mxu3  ;;  %v1608_v3 = vpop.f32.mrf.mxu0 }
 0x46f   :  { %v1609_v18 = vadd.f32 %v1608_v3, %v1588_v25  ;;  %v7236_v3 = vld [vmem:[%s11065_s1 + $0x164] sm:$0xf] }
 0x471   :  { %v1676_v38 = vmul.f32 %v1675_v31, %v1609_v18  ;;  %v5833_v18 = vld [vmem:[%s11065_s1 + $0x1e0] sm:$0xf] }
 0x473   :  { %v1678_v45 = vmul.f32 %v1676_v38, %v1676_v38 }
 0x476   :  { %v1666_v41 = vpop.f32.mrf.mxu2 }
 0x477   :  { %v1667_v42 = vadd.f32 %v1666_v41, %v1646_v39  ;;  %v5835_v39 = vld [vmem:[%s11065_s1 + $0x1e8] sm:$0xf0]  ;;  %v5763_v41 = vld [vmem:[%s11065_s1 + $0x158] sm:$0xf0] }
 0x479   :  { %v1677_v47 = vmul.f32 %v1675_v31, %v1667_v42  ;;  %v5846_v31 = vor.u32 %v7254_v22, %v5843_v23  ;;  %v5762_v42 = vor.u32 %v7235_v30, %v5761_v29  ;;  %v5801_v22 = vld [vmem:[%s11065_s1 + $0x1a0] sm:$0xf]  ;;  %v5905_v30 = vld [vmem:[%s11065_s1 + $0x70] sm:$0xf] }
 0x47b   :  { %v1679_v48 = vsub.f32 %v1677_v47, %v1678_v45  ;;  %v5753_v45 = vld [vmem:[%s11065_s1 + $0x140] sm:$0xf]  ;;  %v7233_v47 = vld [vmem:[%s11065_s1 + $0x144] sm:$0xf0] }
 0x47d   :  { %v1680_v40 = vmax.f32 %v1679_v48, 0.0  ;;  %v5766_v48 = vor.u32 %v7234_v36, %v5763_v41  ;;  %v5793_v36 = vld [vmem:[%s11065_s1 + $0x190] sm:$0xf]  ;;  %v5795_v41 = vld [vmem:[%s11065_s1 + $0x198] sm:$0xf0] }
 0x47f   :  { %v1682_v33 = vadd.f32 0.8, %v1680_v40  ;;  %v5834_v40 = vor.u32 %v7253_v34, %v5833_v18  ;;  %v7224_v18 = vld [vmem:[%s11065_s1 + $0x104] sm:$0xf]  ;;  %v5723_v34 = vld [vmem:[%s11065_s1 + $0x108] sm:$0xf0] }
 0x481   :  { %7486 = vrsqrt.f32 %v1682_v33  ;;  %vm1689_vm2 = vweird.f32 %v1682_v33 }
 0x487   :  { %v7487_v46 = vpop.eup %7486 }
 0x488   :  { %v1684_v57 = vmul.f32 %v7487_v46, %v1682_v33  ;;  %vm1690_vm1 = vweird.f32 %v7487_v46  ;;  %v5825_v33 = vld [vmem:[%s11065_s1 + $0x1d0] sm:$0xf] }
 0x489   :  { %vm1691_vm3 = vmor %vm1689_vm2, %vm1690_vm1 }
 0x48a   :  { %v1685_v19 = vmul.f32 %v7487_v46, %v1684_v57  ;;  %v7232_v57 = vld [vmem:[%s11065_s1 + $0x144] sm:$0xf] }
 0x48c   :  { %v1686_v35 = vmul.f32 0.5, %v1685_v19  ;;  %v5755_v19 = vld [vmem:[%s11065_s1 + $0x148] sm:$0xf0] }
 0x48e   :  { %v1687_v50 = vsub.f32 1.5, %v1686_v35  ;;  %v7251_v35 = vld [vmem:[%s11065_s1 + $0x1d4] sm:$0xf0] }
 0x490   :  { %v1688_v51 = vmul.f32 %v7487_v46, %v1687_v50  ;;  %v7250_v50 = vld [vmem:[%s11065_s1 + $0x1d4] sm:$0xf] }
 0x492   :  { %v1692_v53 = vsel %vm1691_vm3, %v7487_v46, %v1688_v51  ;;  %v5827_v51 = vld [vmem:[%s11065_s1 + $0x1d8] sm:$0xf0]  ;;  %vm4085_vm3 = vcmask 1041408  }
 0x493   :  { %v1693_v54 = vmul.f32 %v1692_v53, %v1681_v52  ;;  %v5754_v52 = vor.u32 %v7233_v47, %v5753_v45  ;;  %v5745_v53 = vld [vmem:[%s11065_s1 + $0x130] sm:$0xf]  ;;  %v5726_v45 = vor.u32 %v7224_v18, %v5723_v34  ;;  %v7220_v34 = vld [vmem:[%s11065_s1 + $0xe4] sm:$0xf] }
 0x495   :  { %5678 = vmatmul.msk.f32.vlgmr.msrb.gmra.mxu3 %vm637_vm10, %v1693_v54  ;;  %5679 = vmatmul.msk.f32.vlgmr.msra.gmra.mxu0 %vm637_vm10, %v1693_v54  ;;  %v1695_v58 = vmul.f32 %v1693_v54, %v1676_v38  ;;  %v7252_v38 = vld [vmem:[%s11065_s1 + $0x1e4] sm:$0xf]  ;;  %v7231_v54 = vld [vmem:[%s11065_s1 + $0x134] sm:$0xf0] }
 0x496   :  { %v5838_v46 = vor.u32 %v7252_v38, %v5835_v39  ;;  %v7243_v38 = vld [vmem:[%s11065_s1 + $0x194] sm:$0xf0]  ;;  %v7242_v39 = vld [vmem:[%s11065_s1 + $0x194] sm:$0xf] }
 0x497   :  { %v1696_v59 = vsub.f32 %v1694_v56, %v1695_v58  ;;  %v5758_v56 = vor.u32 %v7232_v57, %v5755_v19  ;;  %v5826_v58 = vor.u32 %v7251_v35, %v5825_v33  ;;  %v7205_v33 = vld [vmem:[%s11065_s1 + $0x64] sm:$0xf0]  ;;  %v5798_v19 = vor.u32 %v7242_v39, %v5795_v41  ;;  %v5969_v35 = vld [vmem:[%s11065_s1 + $0xf0] sm:$0xf]  ;;  %v7200_v41 = vld [vmem:[%s11065_s1 + $0x44] sm:$0xf] }
 0x498   :  { %v7241_v57 = vld [vmem:[%s11065_s1 + $0x184] sm:$0xf0] }
 0x499   :  { %5680 = vmatmul.msk.f32.vlgmr.msra.gmra.mxu1 %vm637_vm10, %v1696_v59  ;;  %v7213_v39 = vld [vmem:[%s11065_s1 + $0xa4] sm:$0xf0] }
 0x49d   :  { %5681 = vmatmul.msk.f32.vlgmr.msra.gmra.mxu3 %vm637_vm10, %v1696_v59  ;;  %v5817_v59 = vld [vmem:[%s11065_s1 + $0x1c0] sm:$0xf] }
 0x512   :  { %v1745_v43 = vpop.f32.mrf.mxu0 }
 0x513   :  { %v1792_v8 = vperm.slane %v1745_v43, 0  ;;  %v7249_v43 = vld [vmem:[%s11065_s1 + $0x1c4] sm:$0xf0] }
 0x514   :  { %v5818_v7 = vor.u32 %v7249_v43, %v5817_v59  ;;  %v7221_v59 = vld [vmem:[%s11065_s1 + $0xe4] sm:$0xf0] }
 0x515   :  { %v1794_v17 = vmul.f32 %v1792_v8, %v8724_v5  ;;  %v1796_v24 = vmul.f32 %v1792_v8, %v8728_v55  ;;  %v5774_v5 = vor.u32 %v7236_v3, %v5771_v26  ;;  %v5809_v8 = vld [vmem:[%s11065_s1 + $0x1b0] sm:$0xf]  ;;  %v7244_v3 = vld [vmem:[%s11065_s1 + $0x1a4] sm:$0xf]  ;;  %v5803_v26 = vld [vmem:[%s11065_s1 + $0x1a8] sm:$0xf0] }
 0x516   :  { %v1768_v60 = vpop.f32.mrf.mxu1  ;;  %v7201_v43 = vld [vmem:[%s11065_s1 + $0x44] sm:$0xf0] }
 0x517   :  { %v1797_v63 = vperm.slane %v1768_v60, 0  ;;  %v5830_v60 = vor.u32 %v7250_v50, %v5827_v51  ;;  %v7223_v50 = vld [vmem:[%s11065_s1 + $0xf4] sm:$0xf0] }
 0x518   :  { %v1725_v61 = vpop.f32.mrf.mxu3 }
 0x519   :  { %v1791_v62 = vperm.slane %v1725_v61, 0  ;;  %v7230_v61 = vld [vmem:[%s11065_s1 + $0x134] sm:$0xf] }
 0x51b   :  { %v1793_v0 = vmul.f32 %v1791_v62, %v8714_v44  ;;  %v1795_v1 = vmul.f32 %v1791_v62, %v8716_v49  ;;  %v5778_v49 = vor.u32 %v7239_v4, %v5777_v2  ;;  %v5747_v62 = vld [vmem:[%s11065_s1 + $0x138] sm:$0xf0]  ;;  %v5737_v2 = vld [vmem:[%s11065_s1 + $0x120] sm:$0xf]  ;;  %v7229_v4 = vld [vmem:[%s11065_s1 + $0x124] sm:$0xf0] }
 0x51c   :  { %v5750_v6 = vor.u32 %v7230_v61, %v5747_v62  ;;  %v5738_v14 = vor.u32 %v7229_v4, %v5737_v2  ;;  %v5881_v62 = vld [vmem:[%s11065_s1 + $0x40] sm:$0xf]  ;;  %v5873_v4 = vld [vmem:[%s11065_s1 + $0x30] sm:$0xf] }
 0x51d   :  { %v1799_v44 = vadd.f32 %v1797_v63, %v1793_v0  ;;  %v1801_v9 = vadd.f32 %v1797_v63, %v1795_v1  ;;  %v7248_v63 = vld [vmem:[%s11065_s1 + $0x1c4] sm:$0xf]  ;;  %v5819_v0 = vld [vmem:[%s11065_s1 + $0x1c8] sm:$0xf0]  ;;  %v5746_v1 = vor.u32 %v7231_v54, %v5745_v53  ;;  %v5970_v53 = vor.u32 %v7223_v50, %v5969_v35  ;;  %v5889_v54 = vld [vmem:[%s11065_s1 + $0x50] sm:$0xf] }
 0x51e   :  { %v7211_v35 = vld [vmem:[%s11065_s1 + $0x94] sm:$0xf0] }
 0x51f   :  { %v8782_v11 = vpack.c.bf16 %v1801_v9, %v1799_v44  ;;  %v5822_v44 = vor.u32 %v7248_v63, %v5819_v0  ;;  %v7228_v9 = vld [vmem:[%s11065_s1 + $0x124] sm:$0xf]  ;;  %v5953_v63 = vld [vmem:[%s11065_s1 + $0xd0] sm:$0xf]  ;;  %v7219_v0 = vld [vmem:[%s11065_s1 + $0xd4] sm:$0xf0] }
 0x520   :  { %v1788_v20 = vpop.f32.mrf.mxu3  ;;  %v5954_v2 = vor.u32 %v7219_v0, %v5953_v63  ;;  %v5867_v63 = vld [vmem:[%s11065_s1 + $0x28] sm:$0xf0]  ;;  %v7214_v0 = vld [vmem:[%s11065_s1 + $0xb4] sm:$0xf] }
 0x521   :  { %v1798_v25 = vperm.slane %v1788_v20, 0  ;;  %1817 = vmatpush.bf16.msrb.mxu0 %v8782_v11  ;;  %1882 = vmatpush.bf16.msra.mxu2 %v8782_v11 }
 0x523   :  { %v1800_v28 = vadd.f32 %v1798_v25, %v1794_v17  ;;  %v1802_v55 = vadd.f32 %v1798_v25, %v1796_v24  ;;  %v7226_v17 = vld [vmem:[%s11065_s1 + $0x114] sm:$0xf]  ;;  %v5731_v24 = vld [vmem:[%s11065_s1 + $0x118] sm:$0xf0]  ;;  %v7245_v25 = vld [vmem:[%s11065_s1 + $0x1a4] sm:$0xf0] }
 0x524   :  { %5685 = vmatmul.msk.bf16.vlgmr.msra.gmra.mxu2 %vm1806_vm4, %v5684_v12  ;;  %5682 = vmatmul.msk.bf16.vlgmr.msrb.gmra.mxu0 %vm1806_vm4, %v1805_v13  ;;  %v5802_v29 = vor.u32 %v7245_v25, %v5801_v22  ;;  %v7206_v22 = vld [vmem:[%s11065_s1 + $0x74] sm:$0xf]  ;;  %v5899_v25 = vld [vmem:[%s11065_s1 + $0x68] sm:$0xf0] }
 0x525   :  { %2096 = vmatpush.bf16.msra.mxu0 %v5778_v49  ;;  %2122 = vmatpush.bf16.msrb.mxu2 %v5782_v10  ;;  %v8835_v37 = vpack.c.bf16 %v1802_v55, %v1800_v28  ;;  %v5739_v49 = vld [vmem:[%s11065_s1 + $0x128] sm:$0xf0]  ;;  %v7247_v10 = vld [vmem:[%s11065_s1 + $0x1b4] sm:$0xf0]  ;;  %v7225_v28 = vld [vmem:[%s11065_s1 + $0x104] sm:$0xf0]  ;;  %v5734_v55 = vor.u32 %v7226_v17, %v5731_v24 }
 0x526   :  { %v5742_v20 = vor.u32 %v7228_v9, %v5739_v49  ;;  %v5810_v21 = vor.u32 %v7247_v10, %v5809_v8  ;;  %v7217_v8 = vld [vmem:[%s11065_s1 + $0xc4] sm:$0xf0]  ;;  %v5865_v49 = vld [vmem:[%s11065_s1 + $0x20] sm:$0xf]  ;;  %v7204_v24 = vld [vmem:[%s11065_s1 + $0x64] sm:$0xf] }
 0x527   :  { %1830 = vmatpush.bf16.msrb.mxu1 %v8835_v37  ;;  %1895 = vmatpush.bf16.msrb.mxu3 %v8835_v37  ;;  %v7197_v10 = vld [vmem:[%s11065_s1 + $0x24] sm:$0xf0] }
 0x529   :  { %2097 = vmatpush.bf16.msra.mxu0 %v5770_v27  ;;  %2123 = vmatpush.bf16.msrb.mxu2 %v5774_v5  ;;  %v5730_v27 = vor.u32 %v7227_v15, %v5729_v16  ;;  %v5721_v5 = vld [vmem:[%s11065_s1 + $0x100] sm:$0xf]  ;;  %v5857_v15 = vld [vmem:[%s11065_s1 + $0x10] sm:$0xf] }
 0x52a   :  { %5686 = vmatmul.msk.bf16.vlgmr.msrb.gmra.mxu3 %vm1806_vm4, %v5684_v12  ;;  %5683 = vmatmul.msk.bf16.vlgmr.msrb.gmra.mxu1 %vm1806_vm4, %v1805_v13  ;;  %v7246_v12 = vld [vmem:[%s11065_s1 + $0x1b4] sm:$0xf]  ;;  %v5811_v13 = vld [vmem:[%s11065_s1 + $0x1b8] sm:$0xf0] }
 0x52b   :  { %2109 = vmatpush.bf16.msra.mxu1 %v5842_v32  ;;  %2135 = vmatpush.bf16.msra.mxu3 %v5846_v31  ;;  %v5814_v23 = vor.u32 %v7246_v12, %v5811_v13  ;;  %v5806_v32 = vor.u32 %v7244_v3, %v5803_v26  ;;  %v7207_v31 = vld [vmem:[%s11065_s1 + $0x74] sm:$0xf0]  ;;  %v5937_v12 = vld [vmem:[%s11065_s1 + $0xb0] sm:$0xf]  ;;  %v7240_v3 = vld [vmem:[%s11065_s1 + $0x184] sm:$0xf] }
 0x52c   :  { %v5906_v47 = vor.u32 %v7207_v31, %v5905_v30  ;;  %v7215_v13 = vld [vmem:[%s11065_s1 + $0xb4] sm:$0xf0]  ;;  %v5787_v26 = vld [vmem:[%s11065_s1 + $0x188] sm:$0xf0]  ;;  %v7202_v30 = vld [vmem:[%s11065_s1 + $0x54] sm:$0xf] }
 0x52d   :  { %2098 = vmatpush.bf16.msra.mxu0 %v5762_v42  ;;  %2124 = vmatpush.bf16.msrb.mxu2 %v5766_v48  ;;  %v5722_v42 = vor.u32 %v7225_v28, %v5721_v5  ;;  %v5794_v48 = vor.u32 %v7243_v38, %v5793_v36  ;;  %v5938_v16 = vor.u32 %v7215_v13, %v5937_v12  ;;  %v7222_v28 = vld [vmem:[%s11065_s1 + $0xf4] sm:$0xf]  ;;  %v5963_v31 = vld [vmem:[%s11065_s1 + $0xe8] sm:$0xf0]  ;;  %v5929_v38 = vld [vmem:[%s11065_s1 + $0xa0] sm:$0xf] }
 0x52e   :  { %v5790_v5 = vor.u32 %v7240_v3, %v5787_v26  ;;  %v5966_v36 = vor.u32 %v7220_v34, %v5963_v31  ;;  %v5851_v12 = vld [vmem:[%s11065_s1 + $0x8] sm:$0xf0]  ;;  %v6070_v31 = vld [vmem:[%s11065_s1 + $0x278] sm:$0xf0] }
 0x52f   :  { %2110 = vmatpush.bf16.msra.mxu1 %v5834_v40  ;;  %2136 = vmatpush.bf16.msra.mxu3 %v5838_v46  ;;  %v5897_v40 = vld [vmem:[%s11065_s1 + $0x60] sm:$0xf] }
 0x530   :  { %v5785_v46 = vld [vmem:[%s11065_s1 + $0x180] sm:$0xf]  ;;  %v5898_v51 = vor.u32 %v7205_v33, %v5897_v40  ;;  %v7218_v40 = vld [vmem:[%s11065_s1 + $0xd4] sm:$0xf] }
 0x531   :  { %2099 = vmatpush.bf16.msra.mxu0 %v5754_v52  ;;  %2125 = vmatpush.bf16.msrb.mxu2 %v5758_v56  ;;  %v5786_v52 = vor.u32 %v7241_v57, %v5785_v46  ;;  %v7203_v56 = vld [vmem:[%s11065_s1 + $0x54] sm:$0xf0]  ;;  %v5955_v57 = vld [vmem:[%s11065_s1 + $0xd8] sm:$0xf0] }
 0x532   :  { %v5958_v50 = vor.u32 %v7218_v40, %v5955_v57 }
 0x533   :  { %2111 = vmatpush.bf16.msra.mxu1 %v5826_v58  ;;  %2137 = vmatpush.bf16.msra.mxu3 %v5830_v60  ;;  %v5961_v58 = vld [vmem:[%s11065_s1 + $0xe0] sm:$0xf]  ;;  %v5890_v60 = vor.u32 %v7203_v56, %v5889_v54  ;;  %v7216_v54 = vld [vmem:[%s11065_s1 + $0xc4] sm:$0xf]  ;;  %v5947_v56 = vld [vmem:[%s11065_s1 + $0xc8] sm:$0xf0] }
 0x534   :  { %v5962_v61 = vor.u32 %v7221_v59, %v5961_v58  ;;  %v5950_v59 = vor.u32 %v7216_v54, %v5947_v56  ;;  %v6124_v54 = vld [vmem:[%s11065_s1 + $0x2e0] sm:$0xf]  ;;  %v7285_v56 = vld [vmem:[%s11065_s1 + $0x2e4] sm:$0xf0] }
 0x535   :  { %2100 = vmatpush.bf16.msra.mxu0 %v5746_v1  ;;  %2126 = vmatpush.bf16.msrb.mxu2 %v5750_v6  ;;  %v5882_v1 = vor.u32 %v7201_v43, %v5881_v62  ;;  %v7199_v6 = vld [vmem:[%s11065_s1 + $0x34] sm:$0xf0]  ;;  %v7196_v62 = vld [vmem:[%s11065_s1 + $0x24] sm:$0xf] }
 0x537   :  { %2112 = vmatpush.bf16.msra.mxu1 %v5818_v7  ;;  %2138 = vmatpush.bf16.msra.mxu3 %v5822_v44  ;;  %v5945_v7 = vld [vmem:[%s11065_s1 + $0xc0] sm:$0xf]  ;;  %v5874_v44 = vor.u32 %v7199_v6, %v5873_v4  ;;  %v7212_v6 = vld [vmem:[%s11065_s1 + $0xa4] sm:$0xf] }
 0x538   :  { %v5946_v9 = vor.u32 %v7217_v8, %v5945_v7  ;;  %v5931_v7 = vld [vmem:[%s11065_s1 + $0xa8] sm:$0xf0]  ;;  %v7194_v8 = vld [vmem:[%s11065_s1 + $0x14] sm:$0xf] }
 0x539   :  { %2101 = vmatpush.bf16.msra.mxu0 %v5738_v14  ;;  %2127 = vmatpush.bf16.msrb.mxu2 %v5742_v20  ;;  %v5866_v14 = vor.u32 %v7197_v10, %v5865_v49  ;;  %v7195_v20 = vld [vmem:[%s11065_s1 + $0x14] sm:$0xf0]  ;;  %v7192_v10 = vld [vmem:[%s11065_s1 + $0x4] sm:$0xf] }
 0x53a   :  { %v5854_v13 = vor.u32 %v7192_v10, %v5851_v12  ;;  %v6036_v10 = vld [vmem:[%s11065_s1 + $0x230] sm:$0xf]  ;;  %v7263_v12 = vld [vmem:[%s11065_s1 + $0x234] sm:$0xf0] }
 0x53b   :  { %2113 = vmatpush.bf16.msra.mxu1 %v5810_v21  ;;  %2139 = vmatpush.bf16.msra.mxu3 %v5814_v23  ;;  %v5858_v21 = vor.u32 %v7195_v20, %v5857_v15  ;;  %v5907_v23 = vld [vmem:[%s11065_s1 + $0x78] sm:$0xf0]  ;;  %v7208_v20 = vld [vmem:[%s11065_s1 + $0x84] sm:$0xf] }
 0x53c   :  { %v5910_v17 = vor.u32 %v7206_v22, %v5907_v23 }
 0x53d   :  { %2102 = vmatpush.bf16.msra.mxu0 %v5730_v27  ;;  %2128 = vmatpush.bf16.msrb.mxu2 %v5734_v55  ;;  %v5902_v27 = vor.u32 %v7204_v24, %v5899_v25  ;;  %v5971_v55 = vld [vmem:[%s11065_s1 + $0xf8] sm:$0xf0] }
 0x53f   :  { %2114 = vmatpush.bf16.msra.mxu1 %v5802_v29  ;;  %2140 = vmatpush.bf16.msra.mxu3 %v5806_v32  ;;  %v5974_v29 = vor.u32 %v7222_v28, %v5971_v55  ;;  %v5891_v32 = vld [vmem:[%s11065_s1 + $0x58] sm:$0xf0] }
 0x540   :  { %v5894_v18 = vor.u32 %v7202_v30, %v5891_v32  ;;  %v5975_v32 = vld [vmem:[%s11066_s5 + $0x8] sm:$0xf] }
 0x541   :  { %2103 = vmatpush.bf16.msra.mxu0 %v5722_v42  ;;  %2129 = vmatpush.bf16.msrb.mxu2 %v5726_v45  ;;  %v5930_v42 = vor.u32 %v7213_v39, %v5929_v38  ;;  %v5883_v45 = vld [vmem:[%s11065_s1 + $0x48] sm:$0xf0]  ;;  %v6060_v38 = vld [vmem:[%s11065_s1 + $0x260] sm:$0xf]  ;;  %v7269_v39 = vld [vmem:[%s11065_s1 + $0x264] sm:$0xf0] }
 0x542   :  { %v5886_v33 = vor.u32 %v7200_v41, %v5883_v45  ;;  %v7268_v41 = vld [vmem:[%s11065_s1 + $0x264] sm:$0xf]  ;;  %v7287_v45 = vld [vmem:[%s11065_s1 + $0x2f4] sm:$0xf0] }
 0x543   :  { %2115 = vmatpush.bf16.msra.mxu1 %v5794_v48  ;;  %2141 = vmatpush.bf16.msra.mxu3 %v5798_v19  ;;  %v7193_v48 = vld [vmem:[%s11065_s1 + $0x4] sm:$0xf0]  ;;  %v5921_v19 = vld [vmem:[%s11065_s1 + $0x90] sm:$0xf] }
 0x545   :  { %2308 = vmatpush.bf16.msrb.mxu0 %v5906_v47  ;;  %2334 = vmatpush.bf16.msra.mxu2 %v5910_v17  ;;  %v5849_v47 = vld [vmem:[%s11065_s1] sm:$0xf] }
 0x546   :  { %v5850_v46 = vor.u32 %v7193_v48, %v5849_v47  ;;  %v7286_v47 = vld [vmem:[%s11065_s1 + $0x2f4] sm:$0xf]  ;;  %v6061_v48 = vor.u32 %v7269_v39, %v6060_v38  ;;  %v6022_v38 = vld [vmem:[%s11065_s1 + $0x218] sm:$0xf0]  ;;  %v6092_v39 = vld [vmem:[%s11065_s1 + $0x2a0] sm:$0xf] }
 0x547   :  { %2116 = vmatpush.bf16.msra.mxu1 %v5786_v52  ;;  %2142 = vmatpush.bf16.msra.mxu3 %v5790_v5  ;;  %v5922_v52 = vor.u32 %v7211_v35, %v5921_v19  ;;  %v6052_v35 = vld [vmem:[%s11065_s1 + $0x250] sm:$0xf] }
 0x549   :  { %2309 = vmatpush.bf16.msrb.mxu0 %v5898_v51  ;;  %2335 = vmatpush.bf16.msra.mxu2 %v5902_v27  ;;  %v7198_v51 = vld [vmem:[%s11065_s1 + $0x34] sm:$0xf] }
 0x54b   :  { %2321 = vmatpush.bf16.msrb.mxu1 %v5970_v53  ;;  %2347 = vmatpush.bf16.msrb.mxu3 %v5974_v29  ;;  %v5875_v53 = vld [vmem:[%s11065_s1 + $0x38] sm:$0xf0] }
 0x54c   :  { %v5878_v58 = vor.u32 %v7198_v51, %v5875_v53  ;;  %v7266_v51 = vld [vmem:[%s11065_s1 + $0x254] sm:$0xf]  ;;  %v6054_v53 = vld [vmem:[%s11065_s1 + $0x258] sm:$0xf0] }
 0x54d   :  { %2310 = vmatpush.bf16.msrb.mxu0 %v5890_v60  ;;  %2336 = vmatpush.bf16.msra.mxu2 %v5894_v18  ;;  %v5913_v60 = vld [vmem:[%s11065_s1 + $0x80] sm:$0xf]  ;;  %v7270_v18 = vld [vmem:[%s11065_s1 + $0x274] sm:$0xf] }
 0x54f   :  { %2322 = vmatpush.bf16.msrb.mxu1 %v5962_v61  ;;  %2348 = vmatpush.bf16.msrb.mxu3 %v5966_v36  ;;  %v7209_v61 = vld [vmem:[%s11065_s1 + $0x84] sm:$0xf0]  ;;  %v6073_v36 = vor.u32 %v7270_v18, %v6070_v31  ;;  %v6020_v18 = vld [vmem:[%s11065_s1 + $0x210] sm:$0xf]  ;;  %v7258_v31 = vld [vmem:[%s11065_s1 + $0x214] sm:$0xf] }
 0x550   :  { %v5914_v43 = vor.u32 %v7209_v61, %v5913_v60  ;;  %v6125_v60 = vor.u32 %v7285_v56, %v6124_v54  ;;  %v6126_v61 = vld [vmem:[%s11065_s1 + $0x2e8] sm:$0xf0]  ;;  %v7256_v56 = vld [vmem:[%s11065_s1 + $0x204] sm:$0xf] }
 0x551   :  { %2311 = vmatpush.bf16.msrb.mxu0 %v5882_v1  ;;  %2337 = vmatpush.bf16.msra.mxu2 %v5886_v33  ;;  %v5939_v1 = vld [vmem:[%s11065_s1 + $0xb8] sm:$0xf0] }
 0x552   :  { %v5942_v4 = vor.u32 %v7214_v0, %v5939_v1  ;;  %v6134_v33 = vld [vmem:[%s11065_s1 + $0x2f8] sm:$0xf0]  ;;  %v7282_v0 = vld [vmem:[%s11065_s1 + $0x2d4] sm:$0xf] }
 0x553   :  { %2323 = vmatpush.bf16.msrb.mxu1 %v5954_v2  ;;  %2349 = vmatpush.bf16.msrb.mxu3 %v5958_v50  ;;  %v5870_v2 = vor.u32 %v7196_v62, %v5867_v63  ;;  %v6137_v57 = vor.u32 %v7286_v47, %v6134_v33  ;;  %v7267_v50 = vld [vmem:[%s11065_s1 + $0x254] sm:$0xf0]  ;;  %v6084_v33 = vld [vmem:[%s11065_s1 + $0x290] sm:$0xf] }
 0x554   :  { %v7283_v63 = vld [vmem:[%s11065_s1 + $0x2d4] sm:$0xf0] }
 0x555   :  { %2312 = vmatpush.bf16.msrb.mxu0 %v5874_v44  ;;  %2338 = vmatpush.bf16.msra.mxu2 %v5878_v58  ;;  %v5859_v44 = vld [vmem:[%s11065_s1 + $0x18] sm:$0xf0]  ;;  %v7284_v58 = vld [vmem:[%s11065_s1 + $0x2e4] sm:$0xf] }
 0x556   :  { %v5862_v49 = vor.u32 %v7194_v8, %v5859_v44  ;;  %v6129_v62 = vor.u32 %v7284_v58, %v6126_v61  ;;  %v7264_v44 = vld [vmem:[%s11065_s1 + $0x244] sm:$0xf]  ;;  %v6014_v58 = vld [vmem:[%s11065_s1 + $0x208] sm:$0xf0]  ;;  %v7273_v61 = vld [vmem:[%s11065_s1 + $0x284] sm:$0xf0] }
 0x557   :  { %2324 = vmatpush.bf16.msrb.mxu1 %v5946_v9  ;;  %2350 = vmatpush.bf16.msrb.mxu3 %v5950_v59  ;;  %v5934_v9 = vor.u32 %v7212_v6, %v5931_v7  ;;  %v6057_v59 = vor.u32 %v7266_v51, %v6054_v53  ;;  %v7265_v6 = vld [vmem:[%s11065_s1 + $0x244] sm:$0xf0] }
 0x558   :  { %v7257_v51 = vld [vmem:[%s11065_s1 + $0x204] sm:$0xf0] }
 0x559   :  { %2313 = vmatpush.bf16.msrb.mxu0 %v5866_v14  ;;  %2339 = vmatpush.bf16.msra.mxu2 %v5870_v2  ;;  %v7210_v14 = vld [vmem:[%s11065_s1 + $0x94] sm:$0xf]  ;;  %v6118_v2 = vld [vmem:[%s11065_s1 + $0x2d8] sm:$0xf0] }
 0x55a   :  { %v6121_v7 = vor.u32 %v7282_v0, %v6118_v2 }
 0x55b   :  { %2325 = vmatpush.bf16.msrb.mxu1 %v5938_v16  ;;  %2351 = vmatpush.bf16.msrb.mxu3 %v5942_v4  ;;  %v5923_v16 = vld [vmem:[%s11065_s1 + $0x98] sm:$0xf0]  ;;  %v6044_v4 = vld [vmem:[%s11065_s1 + $0x240] sm:$0xf] }
 0x55c   :  { %v5926_v15 = vor.u32 %v7210_v14, %v5923_v16  ;;  %v6045_v8 = vor.u32 %v7265_v6, %v6044_v4  ;;  %v6037_v14 = vor.u32 %v7263_v12, %v6036_v10  ;;  %v6038_v16 = vld [vmem:[%s11065_s1 + $0x238] sm:$0xf0]  ;;  %v2696_v10 = vld [vmem:[%s11017_s14 + $0xf0] sm:$0xff] }
 0x55d   :  { %2314 = vmatpush.bf16.msrb.mxu0 %v5858_v21  ;;  %2340 = vmatpush.bf16.msra.mxu2 %v5862_v49  ;;  %v5915_v21 = vld [vmem:[%s11065_s1 + $0x88] sm:$0xf0]  ;;  %v2681_v12 = vld [vmem:[%s11017_s14 + $0x78] sm:$0xff] }
 0x55e   :  { %v5918_v22 = vor.u32 %v7208_v20, %v5915_v21  ;;  %v7281_v20 = vld [vmem:[%s11065_s1 + $0x2c4] sm:$0xf0]  ;;  %v7280_v21 = vld [vmem:[%s11065_s1 + $0x2c4] sm:$0xf] }
 0x55f   :  { %2326 = vmatpush.bf16.msrb.mxu1 %v5930_v42  ;;  %2352 = vmatpush.bf16.msrb.mxu3 %v5934_v9  ;;  %v6132_v42 = vld [vmem:[%s11065_s1 + $0x2f0] sm:$0xf]  ;;  %v6046_v9 = vld [vmem:[%s11065_s1 + $0x248] sm:$0xf0] }
 0x560   :  { %v6133_v40 = vor.u32 %v7287_v45, %v6132_v42  ;;  %v6049_v49 = vor.u32 %v7264_v44, %v6046_v9  ;;  %v7276_v42 = vld [vmem:[%s11065_s1 + $0x2a4] sm:$0xf]  ;;  %v6025_v45 = vor.u32 %v7258_v31, %v6022_v38  ;;  %v2692_v31 = vld [vmem:[%s11017_s14 + $0xd0] sm:$0xff]  ;;  %v2691_v38 = vld [vmem:[%s11017_s14 + $0xc8] sm:$0xff] }
 0x561   :  { %2315 = vmatpush.bf16.msrb.mxu0 %v5850_v46  ;;  %2341 = vmatpush.bf16.msra.mxu2 %v5854_v13  ;;  %v6062_v46 = vld [vmem:[%s11065_s1 + $0x268] sm:$0xf0]  ;;  %v7262_v13 = vld [vmem:[%s11065_s1 + $0x234] sm:$0xf] }
 0x562   :  { %v6065_v19 = vor.u32 %v7268_v41, %v6062_v46  ;;  %v7277_v41 = vld [vmem:[%s11065_s1 + $0x2a4] sm:$0xf0]  ;;  %v7275_v46 = vld [vmem:[%s11065_s1 + $0x294] sm:$0xf0] }
 0x563   :  { %2327 = vmatpush.bf16.msrb.mxu1 %v5922_v52  ;;  %2353 = vmatpush.bf16.msrb.mxu3 %v5926_v15  ;;  %v6053_v52 = vor.u32 %v7267_v50, %v6052_v35  ;;  %v6108_v15 = vld [vmem:[%s11065_s1 + $0x2c0] sm:$0xf]  ;;  %v6093_v47 = vor.u32 %v7277_v41, %v6092_v39  ;;  %v6086_v35 = vld [vmem:[%s11065_s1 + $0x298] sm:$0xf0] }
 0x564   :  { %v6012_v50 = vld [vmem:[%s11065_s1 + $0x200] sm:$0xf]  ;;  %v2677_v39 = vld [vmem:[%s11017_s14 + $0x58] sm:$0xff] }
 0x565   :  { %v6013_v54 = vor.u32 %v7257_v51, %v6012_v50  ;;  %v2690_v41 = vld [vmem:[%s11017_s14 + $0xc0] sm:$0xff]  ;;  %v2671_v50 = vld [vmem:[%s11017_s14 + $0x28] sm:$0xff]  ;;  %v2684_v51 = vld [vmem:[%s11017_s14 + $0x90] sm:$0xff] }
 0x567   :  { %2328 = vmatpush.bf16.msrb.mxu1 %v5914_v43  ;;  %2354 = vmatpush.bf16.msrb.mxu3 %v5918_v22  ;;  %v6116_v43 = vld [vmem:[%s11065_s1 + $0x2d0] sm:$0xf]  ;;  %v6041_v22 = vor.u32 %v7262_v13, %v6038_v16  ;;  %v2695_v16 = vld [vmem:[%s11017_s14 + $0xe8] sm:$0xff] }
 0x568   :  { %v6117_v1 = vor.u32 %v7283_v63, %v6116_v43  ;;  %v6078_v63 = vld [vmem:[%s11065_s1 + $0x288] sm:$0xf0]  ;;  %v2680_v13 = vld [vmem:[%s11017_s14 + $0x70] sm:$0xff] }
 0x5a1   :  { %v1819_v23 = vpop.f32.mrf.mxu0 }
 0x5a2   :  { %v1836_v29 = vpack.c.bf16 %v1819_v23, %v1819_v23  ;;  %v6109_v23 = vor.u32 %v7281_v20, %v6108_v15  ;;  %v2694_v20 = vld [vmem:[%s11017_s14 + $0xe0] sm:$0xff] }
 0x5a7   :  { %v1884_v17 = vpop.f32.mrf.mxu2  ;;  %v1832_v24 = vpop.f32.mrf.mxu1 }
 0x5a8   :  { %v1901_v25 = vpack.c.bf16 %v1884_v17, %v1884_v17  ;;  %v1837_v30 = vpack.c.bf16 %v1832_v24, %v1832_v24  ;;  %v6110_v17 = vld [vmem:[%s11065_s1 + $0x2c8] sm:$0xf0] }
 0x5a9   :  { %v1821_v3 = vpop.f32.mrf.mxu0  ;;  %v6113_v24 = vor.u32 %v7280_v21, %v6110_v17 }
 0x5aa   :  { %2104 = vmatmul.bf16.vlgmr.msra.gmra.mxu0 %v1901_v25  ;;  %2130 = vmatmul.bf16.vlgmr.msrb.gmra.mxu2 %v1901_v25  ;;  %v6028_v25 = vld [vmem:[%s11065_s1 + $0x220] sm:$0xf]  ;;  %v7261_v3 = vld [vmem:[%s11065_s1 + $0x224] sm:$0xf0] }
 0x5ab   :  { %2372 = vmatpush.bf16.msra.mxu0 %v8782_v11  ;;  %v6068_v11 = vld [vmem:[%s11065_s1 + $0x270] sm:$0xf] }
 0x5ad   :  { %v1897_v26 = vpop.f32.mrf.mxu3 }
 0x5ae   :  { %v1902_v27 = vpack.c.bf16 %v1897_v26, %v1897_v26  ;;  %v7260_v26 = vld [vmem:[%s11065_s1 + $0x224] sm:$0xf] }
 0x5af   :  { %v1886_v5 = vpop.f32.mrf.mxu2  ;;  %v1834_v28 = vpop.f32.mrf.mxu1 }
 0x5b0   :  { %2117 = vmatmul.bf16.vlgmr.msra.gmra.mxu1 %v1902_v27  ;;  %2143 = vmatmul.bf16.vlgmr.msra.gmra.mxu3 %v1902_v27  ;;  %v6100_v27 = vld [vmem:[%s11065_s1 + $0x2b0] sm:$0xf]  ;;  %v7279_v5 = vld [vmem:[%s11065_s1 + $0x2b4] sm:$0xf0]  ;;  %v7278_v28 = vld [vmem:[%s11065_s1 + $0x2b4] sm:$0xf] }
 0x5b1   :  { %2385 = vmatpush.bf16.msra.mxu1 %v8835_v37  ;;  %v7271_v37 = vld [vmem:[%s11065_s1 + $0x274] sm:$0xf0]  ;;  %2599 = vmatpush.bf16.msra.mxu3 %v6133_v40 }
 0x5b2   :  { %v6069_v34 = vor.u32 %v7271_v37, %v6068_v11 }
 0x5b4   :  { %2586 = vmatpush.bf16.msrb.mxu2 %v6069_v34  ;;  %v7259_v34 = vld [vmem:[%s11065_s1 + $0x214] sm:$0xf0] }
 0x5b5   :  { %v1899_v55 = vpop.f32.mrf.mxu3  ;;  %2600 = vmatpush.bf16.msra.mxu3 %v6125_v60  ;;  %v6076_v60 = vld [vmem:[%s11065_s1 + $0x280] sm:$0xf] }
 0x5b6   :  { %v6029_v55 = vor.u32 %v7261_v3, %v6028_v25  ;;  %v6077_v43 = vor.u32 %v7273_v61, %v6076_v60  ;;  %v2666_v60 = vld [vmem:[%s11017_s14] sm:$0xff] }
 0x5b8   :  { %2587 = vmatpush.bf16.msrb.mxu2 %v6061_v48  ;;  %v6094_v48 = vld [vmem:[%s11065_s1 + $0x2a8] sm:$0xf0] }
 0x5b9   :  { %2601 = vmatpush.bf16.msra.mxu3 %v6117_v1  ;;  %v6097_v40 = vor.u32 %v7276_v42, %v6094_v48  ;;  %v2676_v42 = vld [vmem:[%s11017_s14 + $0x50] sm:$0xff] }
 0x5ba   :  { %2316 = vmatmul.bf16.vlgmr.msrb.gmra.mxu0 %v1836_v29  ;;  %2342 = vmatmul.bf16.vlgmr.msra.gmra.mxu2 %v1836_v29  ;;  %v6101_v29 = vor.u32 %v7279_v5, %v6100_v27  ;;  %v2688_v48 = vld [vmem:[%s11017_s14 + $0xb0] sm:$0xff] }
 0x5bb   :  { %2612 = vmatpush.bf16.msrb.mxu0 %v6073_v36  ;;  %v6021_v36 = vor.u32 %v7259_v34, %v6020_v18  ;;  %v2679_v34 = vld [vmem:[%s11017_s14 + $0x68] sm:$0xff] }
 0x5bc   :  { %2588 = vmatpush.bf16.msrb.mxu2 %v6053_v52 }
 0x5bd   :  { %2602 = vmatpush.bf16.msra.mxu3 %v6109_v23 }
 0x5bf   :  { %2613 = vmatpush.bf16.msrb.mxu0 %v6065_v19  ;;  %v6085_v19 = vor.u32 %v7275_v46, %v6084_v33  ;;  %v2687_v33 = vld [vmem:[%s11017_s14 + $0xa8] sm:$0xff]  ;;  %v2673_v46 = vld [vmem:[%s11017_s14 + $0x38] sm:$0xff] }
 0x5c0   :  { %2329 = vmatmul.bf16.vlgmr.msrb.gmra.mxu1 %v1837_v30  ;;  %2355 = vmatmul.bf16.vlgmr.msrb.gmra.mxu3 %v1837_v30  ;;  %v6102_v30 = vld [vmem:[%s11065_s1 + $0x2b8] sm:$0xf0] }
 0x5c1   :  { %2625 = vmatpush.bf16.msrb.mxu1 %v6137_v57  ;;  %2589 = vmatpush.bf16.msrb.mxu2 %v6045_v8  ;;  %v6105_v11 = vor.u32 %v7278_v28, %v6102_v30  ;;  %v7274_v57 = vld [vmem:[%s11065_s1 + $0x294] sm:$0xf] }
 0x5c2   :  { %2603 = vmatpush.bf16.msra.mxu3 %v6101_v29  ;;  %v6089_v53 = vor.u32 %v7274_v57, %v6086_v35  ;;  %v2686_v57 = vld [vmem:[%s11017_s14 + $0xa0] sm:$0xff]  ;;  %v2685_v35 = vld [vmem:[%s11017_s14 + $0x98] sm:$0xff] }
 0x5c3   :  { %2614 = vmatpush.bf16.msrb.mxu0 %v6057_v59  ;;  %v6017_v59 = vor.u32 %v7256_v56, %v6014_v58  ;;  %v2682_v56 = vld [vmem:[%s11017_s14 + $0x80] sm:$0xff]  ;;  %v2668_v58 = vld [vmem:[%s11017_s14 + $0x10] sm:$0xff] }
 0x5c5   :  { %2626 = vmatpush.bf16.msrb.mxu1 %v6129_v62  ;;  %2590 = vmatpush.bf16.msrb.mxu2 %v6037_v14  ;;  %v7272_v62 = vld [vmem:[%s11065_s1 + $0x284] sm:$0xf] }
 0x5c6   :  { %2604 = vmatpush.bf16.msra.mxu3 %v6093_v47  ;;  %v6081_v2 = vor.u32 %v7272_v62, %v6078_v63  ;;  %v2675_v47 = vld [vmem:[%s11017_s14 + $0x48] sm:$0xff]  ;;  %v2640_v62 = vld [vmem:[%s11016_s13] sm:$0x3] }
 0x5c7   :  { %2615 = vmatpush.bf16.msrb.mxu0 %v6049_v49  ;;  %v2697_v49 = vld [vmem:[%s11017_s14 + $0xf8] sm:$0xff] }
 0x5c9   :  { %2627 = vmatpush.bf16.msrb.mxu1 %v6121_v7  ;;  %2591 = vmatpush.bf16.msrb.mxu2 %v6029_v55 }
 0x5ca   :  { %5976 = vmatmul.msk.bf16.vlgmr.msra.gmra.mxu0 %vm1806_vm4, %v5975_v32  ;;  %2605 = vmatpush.bf16.msra.mxu3 %v6085_v19  ;;  %v2672_v19 = vld [vmem:[%s11017_s14 + $0x30] sm:$0xff] }
 0x5cb   :  { %2616 = vmatpush.bf16.msrb.mxu0 %v6041_v22  ;;  %v2693_v22 = vld [vmem:[%s11017_s14 + $0xd8] sm:$0xff] }
 0x5cd   :  { %2628 = vmatpush.bf16.msrb.mxu1 %v6113_v24  ;;  %2592 = vmatpush.bf16.msrb.mxu2 %v6021_v36  ;;  %v2678_v36 = vld [vmem:[%s11017_s14 + $0x60] sm:$0xff] }
 0x5ce   :  { %2606 = vmatpush.bf16.msra.mxu3 %v6077_v43 }
 0x5d0   :  { %5977 = vmatmul.msk.bf16.vlgmr.msra.gmra.mxu1 %vm1806_vm4, %v5975_v32  ;;  %v6030_v32 = vld [vmem:[%s11065_s1 + $0x228] sm:$0xf0]  ;;  %vm4081_vm4 = vcmask 31744  }
 0x5d1   :  { %v6033_v37 = vor.u32 %v7260_v26, %v6030_v32  ;;  %2629 = vmatpush.bf16.msrb.mxu1 %v6105_v11  ;;  %2593 = vmatpush.bf16.msrb.mxu2 %v6013_v54  ;;  %v2669_v54 = vld [vmem:[%s11017_s14 + $0x18] sm:$0xff] }
 0x5d2   :  { %2718 = vmatpush.msrb.mxu3 %v2697_v49 }
 0x5d3   :  { %2617 = vmatpush.bf16.msrb.mxu0 %v6033_v37 }
 0x5d4   :  { %2719 = vmatpush.msrb.mxu3 %v2696_v10 }
 0x5d5   :  { %2630 = vmatpush.bf16.msrb.mxu1 %v6097_v40  ;;  %2698 = vmatpush.msra.mxu2 %v2681_v12  ;;  %v2674_v40 = vld [vmem:[%s11017_s14 + $0x40] sm:$0xff] }
 0x5d6   :  { %2720 = vmatpush.msrb.mxu3 %v2695_v16 }
 0x5d7   :  { %2618 = vmatpush.bf16.msrb.mxu0 %v6025_v45  ;;  %2699 = vmatpush.msra.mxu2 %v2680_v13  ;;  %v2689_v45 = vld [vmem:[%s11017_s14 + $0xb8] sm:$0xff] }
 0x5d8   :  { %2721 = vmatpush.msrb.mxu3 %v2694_v20 }
 0x5d9   :  { %2631 = vmatpush.bf16.msrb.mxu1 %v6089_v53  ;;  %2700 = vmatpush.msra.mxu2 %v2679_v34  ;;  %v2683_v53 = vld [vmem:[%s11017_s14 + $0x88] sm:$0xff] }
 0x5da   :  { %2722 = vmatpush.msrb.mxu3 %v2693_v22 }
 0x5db   :  { %2619 = vmatpush.bf16.msrb.mxu0 %v6017_v59  ;;  %2701 = vmatpush.msra.mxu2 %v2678_v36  ;;  %v2667_v59 = vld [vmem:[%s11017_s14 + $0x8] sm:$0xff] }
 0x5dc   :  { %2723 = vmatpush.msrb.mxu3 %v2692_v31 }
 0x5dd   :  { %2632 = vmatpush.bf16.msrb.mxu1 %v6081_v2  ;;  %2702 = vmatpush.msra.mxu2 %v2677_v39 }
 0x5de   :  { %2724 = vmatpush.msrb.mxu3 %v2691_v38 }
 0x5df   :  { %2752 = vmatpush.msra.mxu0 %v2681_v12  ;;  %2703 = vmatpush.msra.mxu2 %v2676_v42 }
 0x5e0   :  { %2725 = vmatpush.msrb.mxu3 %v2690_v41 }
 0x5e1   :  { %2772 = vmatpush.msra.mxu1 %v2697_v49  ;;  %2753 = vmatpush.msra.mxu0 %v2680_v13 }
 0x5e2   :  { %2726 = vmatpush.msrb.mxu3 %v2689_v45  ;;  %2704 = vmatpush.msra.mxu2 %v2675_v47 }
 0x5e3   :  { %2773 = vmatpush.msra.mxu1 %v2696_v10  ;;  %2754 = vmatpush.msra.mxu0 %v2679_v34 }
 0x5e4   :  { %2727 = vmatpush.msrb.mxu3 %v2688_v48  ;;  %2705 = vmatpush.msra.mxu2 %v2674_v40 }
 0x5e5   :  { %2774 = vmatpush.msra.mxu1 %v2695_v16  ;;  %2755 = vmatpush.msra.mxu0 %v2678_v36 }
 0x5e6   :  { %2728 = vmatpush.msrb.mxu3 %v2687_v33  ;;  %2706 = vmatpush.msra.mxu2 %v2673_v46 }
 0x5e7   :  { %2775 = vmatpush.msra.mxu1 %v2694_v20  ;;  %2756 = vmatpush.msra.mxu0 %v2677_v39 }
 0x5e8   :  { %2729 = vmatpush.msrb.mxu3 %v2686_v57  ;;  %2707 = vmatpush.msra.mxu2 %v2672_v19 }
 0x5e9   :  { %2776 = vmatpush.msra.mxu1 %v2693_v22  ;;  %2757 = vmatpush.msra.mxu0 %v2676_v42 }
 0x5ea   :  { %2730 = vmatpush.msrb.mxu3 %v2685_v35  ;;  %2708 = vmatpush.msra.mxu2 %v2671_v50 }
 0x5eb   :  { %2777 = vmatpush.msra.mxu1 %v2692_v31  ;;  %2758 = vmatpush.msra.mxu0 %v2675_v47  ;;  %v7523_v47 = vmov 32.0  }
 0x5ec   :  { %2731 = vmatpush.msrb.mxu3 %v2684_v51  ;;  %7488 = vrcp.f32 %v7523_v47 }
 0x5ed   :  { %2778 = vmatpush.msra.mxu1 %v2691_v38  ;;  %2759 = vmatpush.msra.mxu0 %v2674_v40 }
 0x5ee   :  { %2732 = vmatpush.msrb.mxu3 %v2683_v53 }
 0x5ef   :  { %2779 = vmatpush.msra.mxu1 %v2690_v41  ;;  %2760 = vmatpush.msra.mxu0 %v2673_v46  ;;  %v2835_v46 = vld [vmem:[%s11018_s15 + $0x78] sm:$0xff] }
 0x5f0   :  { %2733 = vmatpush.msrb.mxu3 %v2682_v56 }
 0x5f1   :  { %2780 = vmatpush.msra.mxu1 %v2689_v45  ;;  %2761 = vmatpush.msra.mxu0 %v2672_v19  ;;  %v2833_v19 = vld [vmem:[%s11018_s15 + $0x68] sm:$0xff] }
 0x5f3   :  { %2781 = vmatpush.msra.mxu1 %v2688_v48  ;;  %2762 = vmatpush.msra.mxu0 %v2671_v50  ;;  %v7489_v48 = vpop.eup %7488  ;;  %v2830_v50 = vld [vmem:[%s11018_s15 + $0x50] sm:$0xff] }
 0x5f4   :  { %v2793_v40 = vmul.f32 32.0, %v7489_v48  ;;  %vm2797_vm7 = vweird.f32 %v7489_v48 }
 0x5f5   :  { %2782 = vmatpush.msra.mxu1 %v2687_v33  ;;  %v2834_v33 = vld [vmem:[%s11018_s15 + $0x70] sm:$0xff] }
 0x5f7   :  { %2783 = vmatpush.msra.mxu1 %v2686_v57  ;;  %v2832_v57 = vld [vmem:[%s11018_s15 + $0x60] sm:$0xff] }
 0x5f9   :  { %2784 = vmatpush.msra.mxu1 %v2685_v35  ;;  %v2794_v35 = vsub.f32 1.0, %v2793_v40  ;;  %v7333_v40 = vld [vmem:[%s11022_s19 + $0x164] sm:$0xf0] }
 0x5fb   :  { %2785 = vmatpush.msra.mxu1 %v2684_v51  ;;  %v2831_v51 = vld [vmem:[%s11018_s15 + $0x58] sm:$0xff] }
 0x5fd   :  { %2786 = vmatpush.msra.mxu1 %v2683_v53  ;;  %v2829_v53 = vld [vmem:[%s11018_s15 + $0x48] sm:$0xff] }
 0x5ff   :  { %2787 = vmatpush.msra.mxu1 %v2682_v56  ;;  %v2826_v56 = vld [vmem:[%s11018_s15 + $0x30] sm:$0xff] }
 0x627   :  { %v2105_v52 = vpop.f32.mrf.mxu0 }
 0x62d   :  { %v2118_v0 = vpop.f32.mrf.mxu1  ;;  %v2131_v1 = vpop.f32.mrf.mxu2 }
 0x62e   :  { %v2119_v4 = vadd.f32 %v2118_v0, %v2105_v52  ;;  %v2670_v52 = vld [vmem:[%s11017_s14 + $0x20] sm:$0xff] }
 0x62f   :  { %v2107_v6 = vpop.f32.mrf.mxu0  ;;  %2709 = vmatpush.msra.mxu2 %v2670_v52  ;;  %2763 = vmatpush.msra.mxu0 %v2670_v52  ;;  %v2828_v52 = vld [vmem:[%s11018_s15 + $0x40] sm:$0xff] }
 0x631   :  { %2710 = vmatpush.msra.mxu2 %v2669_v54  ;;  %2764 = vmatpush.msra.mxu0 %v2669_v54  ;;  %v2795_v54 = vmul.f32 %v7489_v48, %v2794_v35  ;;  %v7350_v35 = vld [vmem:[%s11022_s19 + $0x1f4] sm:$0xf] }
 0x633   :  { %v2144_v7 = vpop.f32.mrf.mxu3  ;;  %2711 = vmatpush.msra.mxu2 %v2668_v58  ;;  %2765 = vmatpush.msra.mxu0 %v2668_v58  ;;  %v2827_v58 = vld [vmem:[%s11018_s15 + $0x38] sm:$0xff] }
 0x634   :  { %v2145_v8 = vadd.f32 %v2144_v7, %v2131_v1  ;;  %v2643_v1 = vperm.slane %v2640_v62, 1 }
 0x635   :  { %v2120_v44 = vpop.f32.mrf.mxu1  ;;  %v2133_v9 = vpop.f32.mrf.mxu2  ;;  %2712 = vmatpush.msra.mxu2 %v2667_v59  ;;  %2766 = vmatpush.msra.mxu0 %v2667_v59  ;;  %v2824_v59 = vld [vmem:[%s11018_s15 + $0x20] sm:$0xff] }
 0x636   :  { %v2642_v9 = vperm.slane %v2640_v62, 0  ;;  %v2796_v62 = vadd.f32 %v7489_v48, %v2795_v54  ;;  %v7349_v54 = vld [vmem:[%s11022_s19 + $0x1e4] sm:$0xf0] }
 0x637   :  { %v2317_v14 = vpop.f32.mrf.mxu0  ;;  %2713 = vmatpush.msra.mxu2 %v2666_v60  ;;  %2767 = vmatpush.msra.mxu0 %v2666_v60  ;;  %v2825_v60 = vld [vmem:[%s11018_s15 + $0x28] sm:$0xff] }
 0x638   :  { %v2318_v15 = vadd.f32 %v2317_v14, %v2119_v4 }
 0x63b   :  { %v2146_v21 = vpop.f32.mrf.mxu3 }
 0x63d   :  { %v2330_v23 = vpop.f32.mrf.mxu1  ;;  %v2343_v17 = vpop.f32.mrf.mxu2 }
 0x63e   :  { %v9394_v24 = vadd.f32 %v2330_v23, %v2318_v15  ;;  %v2344_v25 = vadd.f32 %v2343_v17, %v2145_v8 }
 0x63f   :  { %v2319_v3 = vpop.f32.mrf.mxu0 }
 0x643   :  { %v2356_v26 = vpop.f32.mrf.mxu3 }
 0x644   :  { %v9396_v27 = vadd.f32 %v2356_v26, %v2344_v25 }
 0x645   :  { %v2332_v5 = vpop.f32.mrf.mxu1  ;;  %v2345_v28 = vpop.f32.mrf.mxu2 }
 0x647   :  { %v2374_v55 = vpop.f32.mrf.mxu0 }
 0x648   :  { %v2391_v29 = vpack.c.bf16 %v2374_v55, %v2374_v55 }
 0x64a   :  { %2594 = vmatmul.bf16.vlgmr.msrb.gmra.mxu2 %v2391_v29  ;;  %2620 = vmatmul.bf16.vlgmr.msrb.gmra.mxu0 %v2391_v29 }
 0x64b   :  { %v2358_v30 = vpop.f32.mrf.mxu3  ;;  %2847 = vmatpush.msrb.mxu2 %v2834_v33  ;;  %2890 = vmatpush.msrb.mxu0 %v2834_v33  ;;  %v7334_v33 = vld [vmem:[%s11022_s19 + $0x174] sm:$0xf] }
 0x64d   :  { %v2387_v32 = vpop.f32.mrf.mxu1  ;;  %2848 = vmatpush.msrb.mxu2 %v2832_v57  ;;  %2891 = vmatpush.msrb.mxu0 %v2832_v57 }
 0x64e   :  { %v2392_v11 = vpack.c.bf16 %v2387_v32, %v2387_v32 }
 0x64f   :  { %v2376_v37 = vpop.f32.mrf.mxu0  ;;  %2849 = vmatpush.msrb.mxu2 %v2830_v50  ;;  %2892 = vmatpush.msrb.mxu0 %v2830_v50  ;;  %v6303_v50 = vld [vmem:[%s11022_s19 + $0x1f8] sm:$0xf0] }
 0x650   :  { %2607 = vmatmul.bf16.vlgmr.msra.gmra.mxu3 %v2392_v11  ;;  %2633 = vmatmul.bf16.vlgmr.msrb.gmra.mxu1 %v2392_v11 }
 0x651   :  { %2867 = vmatpush.msra.mxu3 %v2835_v46  ;;  %2910 = vmatpush.msrb.mxu1 %v2835_v46 }
 0x652   :  { %2850 = vmatpush.msrb.mxu2 %v2828_v52  ;;  %2893 = vmatpush.msrb.mxu0 %v2828_v52 }
 0x653   :  { %2868 = vmatpush.msra.mxu3 %v2833_v19  ;;  %2911 = vmatpush.msrb.mxu1 %v2833_v19  ;;  %v6239_v19 = vld [vmem:[%s11022_s19 + $0x178] sm:$0xf0] }
 0x654   :  { %2851 = vmatpush.msrb.mxu2 %v2826_v56  ;;  %2894 = vmatpush.msrb.mxu0 %v2826_v56  ;;  %v2932_v56 = vld [vmem:[%s11021_s18] sm:$0x3] }
 0x655   :  { %v2389_v18 = vpop.f32.mrf.mxu1  ;;  %2869 = vmatpush.msra.mxu3 %v2831_v51  ;;  %2912 = vmatpush.msrb.mxu1 %v2831_v51 }
 0x656   :  { %2852 = vmatpush.msrb.mxu2 %v2824_v59  ;;  %2895 = vmatpush.msrb.mxu0 %v2824_v59  ;;  %v6221_v59 = vld [vmem:[%s11022_s19 + $0x150] sm:$0xf] }
 0x657   :  { %2870 = vmatpush.msra.mxu3 %v2829_v53  ;;  %2913 = vmatpush.msrb.mxu1 %v2829_v53  ;;  %v6293_v53 = vld [vmem:[%s11022_s19 + $0x1e0] sm:$0xf] }
 0x659   :  { %2871 = vmatpush.msra.mxu3 %v2827_v58  ;;  %2914 = vmatpush.msrb.mxu1 %v2827_v58  ;;  %v6144_v58 = vld [vmem:[%s11021_s18 + $0x2] sm:$0x3] }
 0x65b   :  { %2872 = vmatpush.msra.mxu3 %v2825_v60  ;;  %2915 = vmatpush.msrb.mxu1 %v2825_v60  ;;  %v6242_v60 = vor.u32 %v7334_v33, %v6239_v19  ;;  %v7340_v19 = vld [vmem:[%s11022_s19 + $0x1a4] sm:$0xf] }
 0x6c7   :  { %v2621_v61 = vpop.f32.mrf.mxu0 }
 0x6cd   :  { %v2634_v43 = vpop.f32.mrf.mxu1  ;;  %v2595_v63 = vpop.f32.mrf.mxu2 }
 0x6ce   :  { %v2635_v0 = vadd.f32 %v2634_v43, %v2621_v61  ;;  %v2822_v43 = vld [vmem:[%s11018_s15 + $0x10] sm:$0xff] }
 0x6cf   :  { %v2623_v2 = vpop.f32.mrf.mxu0  ;;  %2853 = vmatpush.msrb.mxu2 %v2822_v43  ;;  %2896 = vmatpush.msrb.mxu0 %v2822_v43 }
 0x6d0   :  { %v2639_v4 = vadd.f32 %v2635_v0, %v9396_v27 }
 0x6d2   :  { %v2647_v6 = vadd.f32 %v2643_v1, %v2639_v4  ;;  %v2820_v4 = vld [vmem:[%s11018_s15] sm:$0xff] }
 0x6d3   :  { %v2608_v7 = vpop.f32.mrf.mxu3  ;;  %2854 = vmatpush.msrb.mxu2 %v2820_v4  ;;  %2897 = vmatpush.msrb.mxu0 %v2820_v4  ;;  %v7331_v4 = vld [vmem:[%s11022_s19 + $0x154] sm:$0xf0] }
 0x6d4   :  { %vm2649_vm5 = vcmp.ge.f32.partialorder %v2647_v6, 0.0  ;;  %v2651_v8 = vmul.f32 0.2, %v2647_v6  ;;  %v2609_v44 = vadd.f32 %v2608_v7, %v2595_v63  ;;  %v2823_v63 = vld [vmem:[%s11018_s15 + $0x18] sm:$0xff] }
 0x6d5   :  { %v2636_v49 = vpop.f32.mrf.mxu1  ;;  %v2597_v10 = vpop.f32.mrf.mxu2  ;;  %2873 = vmatpush.msra.mxu3 %v2823_v63  ;;  %2916 = vmatpush.msrb.mxu1 %v2823_v63  ;;  %v6294_v63 = vor.u32 %v7349_v54, %v6293_v53  ;;  %v6253_v53 = vld [vmem:[%s11022_s19 + $0x190] sm:$0xf]  ;;  %v7339_v54 = vld [vmem:[%s11022_s19 + $0x194] sm:$0xf0] }
 0x6d6   :  { %v9477_v12 = vsel %vm2649_vm5, %v2647_v6, %v2651_v8  ;;  %v2638_v13 = vadd.f32 %v2609_v44, %v9394_v24  ;;  %v2821_v6 = vld [vmem:[%s11018_s15 + $0x8] sm:$0xff]  ;;  %v2798_v44 = vsel %vm2797_vm7, %v7489_v48, %v2796_v62  ;;  %v6229_v48 = vld [vmem:[%s11022_s19 + $0x160] sm:$0xf]  ;;  %v7332_v62 = vld [vmem:[%s11022_s19 + $0x164] sm:$0xf]  ;;  %vm4969_vm5 = vcmask 1043458  }
 0x6d7   :  { %v2660_v14 = vrot.slane %v9477_v12, 4  ;;  %v2739_v16 = vmul.f32 %v9477_v12, %v9477_v12  ;;  %2874 = vmatpush.msra.mxu3 %v2821_v6  ;;  %2917 = vmatpush.msrb.mxu1 %v2821_v6  ;;  %v6230_v43 = vor.u32 %v7333_v40, %v6229_v48  ;;  %v6285_v6 = vld [vmem:[%s11022_s19 + $0x1d0] sm:$0xf]  ;;  %v7324_v40 = vld [vmem:[%s11022_s19 + $0x124] sm:$0xf]  ;;  %vm4971_vm7 = vcmask 357380  }
 0x6d8   :  { %v2646_v15 = vadd.f32 %v2642_v9, %v2638_v13 }
 0x6d9   :  { %v2661_v20 = vadd.f32 %v2660_v14, %v9477_v12  ;;  %v2746_v21 = vrot.slane %v2739_v16, 4 }
 0x6da   :  { %vm2648_vm6 = vcmp.ge.f32.partialorder %v2646_v15, 0.0  ;;  %v2650_v22 = vmul.f32 0.2, %v2646_v15 }
 0x6db   :  { %v2662_v23 = vrot.slane %v2661_v20, 2  ;;  %v2747_v17 = vadd.f32 %v2746_v21, %v2739_v16  ;;  %v2610_v25 = vpop.f32.mrf.mxu3 }
 0x6dc   :  { %v9484_v3 = vsel %vm2648_vm6, %v2646_v15, %v2650_v22  ;;  %vm4970_vm6 = vmor %vm4969_vm5, %vm4085_vm3 }
 0x6dd   :  { %v2654_v26 = vrot.slane %v9484_v3, 4  ;;  %v2738_v24 = vmul.f32 %v9484_v3, %v9484_v3  ;;  %v2663_v27 = vadd.f32 %v2662_v23, %v2661_v20  ;;  %v2748_v5 = vrot.slane %v2747_v17, 2 }
 0x6df   :  { %v2655_v28 = vadd.f32 %v2654_v26, %v9484_v3  ;;  %v2740_v55 = vrot.slane %v2738_v24, 4  ;;  %v2664_v29 = vrot.slane %v2663_v27, 1  ;;  %v2749_v30 = vadd.f32 %v2748_v5, %v2747_v17  ;;  %v2804_v17 = vld [vmem:[%s11019_s16] sm:$0x1] }
 0x6e1   :  { %v2656_v32 = vrot.slane %v2655_v28, 2  ;;  %v2741_v11 = vadd.f32 %v2740_v55, %v2738_v24  ;;  %v2665_v37 = vadd.f32 %v2664_v29, %v2663_v27  ;;  %v2750_v18 = vrot.slane %v2749_v30, 1  ;;  %v2817_v27 = vld [vmem:[%s11020_s17] sm:$0x1] }
 0x6e3   :  { %2734 = vmatmul.f32.vlgmr.msrb.gmra.mxu3 %v2665_v37  ;;  %v2751_v34 = vadd.f32 %v2750_v18, %v2749_v30  ;;  %v2657_v31 = vadd.f32 %v2656_v32, %v2655_v28  ;;  %v2742_v36 = vrot.slane %v2741_v11, 2 }
 0x6e5   :  { %2788 = vmatmul.f32.vlgmr.msra.gmra.mxu1 %v2751_v34  ;;  %v2658_v38 = vrot.slane %v2657_v31, 1  ;;  %v2743_v39 = vadd.f32 %v2742_v36, %v2741_v11 }
 0x6e7   :  { %v2659_v41 = vadd.f32 %v2658_v38, %v2657_v31  ;;  %v2744_v42 = vrot.slane %v2743_v39, 1  ;;  %v6237_v38 = vld [vmem:[%s11022_s19 + $0x170] sm:$0xf] }
 0x6e9   :  { %2714 = vmatmul.f32.vlgmr.msra.gmra.mxu2 %v2659_v41  ;;  %v2745_v45 = vadd.f32 %v2744_v42, %v2743_v39  ;;  %v7335_v42 = vld [vmem:[%s11022_s19 + $0x174] sm:$0xf0] }
 0x6ea   :  { %v6238_v46 = vor.u32 %v7335_v42, %v6237_v38  ;;  %v6207_v38 = vld [vmem:[%s11022_s19 + $0x138] sm:$0xf0]  ;;  %v7325_v42 = vld [vmem:[%s11022_s19 + $0x124] sm:$0xf0] }
 0x6eb   :  { %2768 = vmatmul.f32.vlgmr.msra.gmra.mxu0 %v2745_v45  ;;  %v6301_v45 = vld [vmem:[%s11022_s19 + $0x1f0] sm:$0xf] }
 0x762   :  { %v2789_v0 = vpop.f32.mrf.mxu1 }
 0x766   :  { %v2735_v1 = vpop.f32.mrf.mxu3 }
 0x768   :  { %v2769_v61 = vpop.f32.mrf.mxu0 }
 0x769   :  { %v2790_v7 = vadd.f32 %v2789_v0, %v2769_v61  ;;  %v6306_v61 = vor.u32 %v7350_v35, %v6303_v50  ;;  %v6231_v0 = vld [vmem:[%s11022_s19 + $0x168] sm:$0xf0]  ;;  %v7323_v50 = vld [vmem:[%s11022_s19 + $0x114] sm:$0xf0] }
 0x76a   :  { %v6263_v35 = vld [vmem:[%s11022_s19 + $0x1a8] sm:$0xf0] }
 0x76b   :  { %v2800_v49 = vmul.f32 %v2798_v44, %v2790_v7  ;;  %v7347_v7 = vld [vmem:[%s11022_s19 + $0x1d4] sm:$0xf0] }
 0x76c   :  { %v2715_v2 = vpop.f32.mrf.mxu2 }
 0x76d   :  { %v2736_v8 = vadd.f32 %v2735_v1, %v2715_v2  ;;  %v7348_v1 = vld [vmem:[%s11022_s19 + $0x1e4] sm:$0xf]  ;;  %v6295_v2 = vld [vmem:[%s11022_s19 + $0x1e8] sm:$0xf0] }
 0x76f   :  { %v2799_v9 = vmul.f32 %v2798_v44, %v2736_v8  ;;  %v6213_v8 = vld [vmem:[%s11022_s19 + $0x140] sm:$0xf]  ;;  %v6234_v44 = vor.u32 %v7332_v62, %v6231_v0  ;;  %v7338_v0 = vld [vmem:[%s11022_s19 + $0x194] sm:$0xf] }
 0x771   :  { %v2801_v10 = vmul.f32 %v2799_v9, %v2799_v9 }
 0x773   :  { %v2802_v13 = vsub.f32 %v2800_v49, %v2801_v10  ;;  %v7330_v49 = vld [vmem:[%s11022_s19 + $0x154] sm:$0xf]  ;;  %v6222_v10 = vor.u32 %v7331_v4, %v6221_v59  ;;  %v7337_v4 = vld [vmem:[%s11022_s19 + $0x184] sm:$0xf0] }
 0x775   :  { %v2803_v14 = vmax.f32 %v2802_v13, 0.0  ;;  %v6286_v13 = vor.u32 %v7347_v7, %v6285_v6  ;;  %v6365_v6 = vld [vmem:[%s11022_s19 + $0x70] sm:$0xf]  ;;  %v7303_v7 = vld [vmem:[%s11022_s19 + $0x74] sm:$0xf0] }
 0x777   :  { %v2805_v16 = vadd.f32 0.8, %v2803_v14  ;;  %v6223_v14 = vld [vmem:[%s11022_s19 + $0x158] sm:$0xf0] }
 0x779   :  { %7490 = vrsqrt.f32 %v2805_v16  ;;  %vm2812_vm9 = vweird.f32 %v2805_v16 }
 0x77f   :  { %v7491_v15 = vpop.eup %7490 }
 0x780   :  { %v2807_v20 = vmul.f32 %v7491_v15, %v2805_v16  ;;  %vm2813_vm8 = vweird.f32 %v7491_v15  ;;  %v7346_v16 = vld [vmem:[%s11022_s19 + $0x1d4] sm:$0xf] }
 0x781   :  { %vm2814_vm10 = vmor %vm2812_vm9, %vm2813_vm8 }
 0x782   :  { %v2808_v21 = vmul.f32 %v7491_v15, %v2807_v20  ;;  %v7329_v20 = vld [vmem:[%s11022_s19 + $0x144] sm:$0xf0]  ;;  %vm4972_vm8 = vmor %vm4971_vm7, %vm4970_vm6 }
 0x784   :  { %v2809_v22 = vmul.f32 0.5, %v2808_v21  ;;  %v6277_v21 = vld [vmem:[%s11022_s19 + $0x1c0] sm:$0xf] }
 0x786   :  { %v2810_v23 = vsub.f32 1.5, %v2809_v22  ;;  %v7345_v22 = vld [vmem:[%s11022_s19 + $0x1c4] sm:$0xf0] }
 0x788   :  { %v2811_v25 = vmul.f32 %v7491_v15, %v2810_v23  ;;  %v6205_v23 = vld [vmem:[%s11022_s19 + $0x130] sm:$0xf] }
 0x78a   :  { %v2815_v26 = vsel %vm2814_vm10, %v7491_v15, %v2811_v25  ;;  %v6287_v15 = vld [vmem:[%s11022_s19 + $0x1d8] sm:$0xf0] }
 0x78b   :  { %v2816_v24 = vmul.f32 %v2815_v26, %v2804_v17  ;;  %v6226_v17 = vor.u32 %v7330_v49, %v6223_v14  ;;  %v6290_v25 = vor.u32 %v7346_v16, %v6287_v15  ;;  %v7328_v26 = vld [vmem:[%s11022_s19 + $0x144] sm:$0xf]  ;;  %v6357_v15 = vld [vmem:[%s11022_s19 + $0x60] sm:$0xf] }
 0x78d   :  { %v2818_v5 = vmul.f32 %v2816_v24, %v2799_v9  ;;  %6138 = vmatmul.msk.f32.vlgmr.msrb.gmra.mxu2 %vm117_vm0, %v2816_v24  ;;  %6139 = vmatmul.msk.f32.vlgmr.msra.gmra.mxu3 %vm117_vm0, %v2816_v24  ;;  %v6298_v9 = vor.u32 %v7348_v1, %v6295_v2  ;;  %v6214_v24 = vor.u32 %v7329_v20, %v6213_v8  ;;  %v6255_v1 = vld [vmem:[%s11022_s19 + $0x198] sm:$0xf0]  ;;  %v6245_v2 = vld [vmem:[%s11022_s19 + $0x180] sm:$0xf]  ;;  %v6429_v8 = vld [vmem:[%s11022_s19 + $0xf0] sm:$0xf] }
 0x78e   :  { %v6258_v49 = vor.u32 %v7338_v0, %v6255_v1  ;;  %v6246_v16 = vor.u32 %v7337_v4, %v6245_v2  ;;  %v7302_v20 = vld [vmem:[%s11022_s19 + $0x74] sm:$0xf]  ;;  %v7307_v0 = vld [vmem:[%s11022_s19 + $0x94] sm:$0xf0]  ;;  %v7316_v4 = vld [vmem:[%s11022_s19 + $0xe4] sm:$0xf] }
 0x78f   :  { %v2819_v28 = vsub.f32 %v2817_v27, %v2818_v5  ;;  %v6278_v27 = vor.u32 %v7345_v22, %v6277_v21  ;;  %v6215_v5 = vld [vmem:[%s11022_s19 + $0x148] sm:$0xf0]  ;;  %v7336_v21 = vld [vmem:[%s11022_s19 + $0x184] sm:$0xf] }
 0x790   :  { %v6247_v22 = vld [vmem:[%s11022_s19 + $0x188] sm:$0xf0] }
 0x791   :  { %6140 = vmatmul.msk.f32.vlgmr.msrb.gmra.mxu0 %vm117_vm0, %v2819_v28  ;;  %6141 = vmatmul.msk.f32.vlgmr.msrb.gmra.mxu1 %vm117_vm0, %v2819_v28  ;;  %vm2937_vm0 = vcmask 1043456   ;;  %v7344_v28 = vld [vmem:[%s11022_s19 + $0x1c4] sm:$0xf] }
 0x80e   :  { %v2899_v55 = vpop.f32.mrf.mxu0  ;;  %v2919_v29 = vpop.f32.mrf.mxu1 }
 0x80f   :  { %v2926_v18 = vperm.slane %v2899_v55, 0  ;;  %v2927_v34 = vperm.slane %v2919_v29, 0  ;;  %v6279_v55 = vld [vmem:[%s11022_s19 + $0x1c8] sm:$0xf0]  ;;  %v7327_v29 = vld [vmem:[%s11022_s19 + $0x134] sm:$0xf0] }
 0x810   :  { %v2856_v30 = vpop.f32.mrf.mxu2  ;;  %v2876_v32 = vpop.f32.mrf.mxu3 }
 0x811   :  { %v2922_v11 = vperm.slane %v2856_v30, 0  ;;  %v2923_v37 = vperm.slane %v2876_v32, 0  ;;  %v6269_v30 = vld [vmem:[%s11022_s19 + $0x1b0] sm:$0xf]  ;;  %v7343_v32 = vld [vmem:[%s11022_s19 + $0x1b4] sm:$0xf0] }
 0x813   :  { %v2924_v31 = vmul.f32 %v2922_v11, %v9484_v3  ;;  %v2925_v36 = vmul.f32 %v2923_v37, %v9477_v12  ;;  %v7351_v3 = vld [vmem:[%s11022_s19 + $0x1f4] sm:$0xf0]  ;;  %v6197_v11 = vld [vmem:[%s11022_s19 + $0x120] sm:$0xf]  ;;  %v6218_v37 = vor.u32 %v7328_v26, %v6215_v5  ;;  %v7318_v26 = vld [vmem:[%s11022_s19 + $0xf4] sm:$0xf] }
 0x814   :  { %v6302_v57 = vor.u32 %v7351_v3, %v6301_v45  ;;  %v6261_v45 = vld [vmem:[%s11022_s19 + $0x1a0] sm:$0xf]  ;;  %v7341_v3 = vld [vmem:[%s11022_s19 + $0x1a4] sm:$0xf0]  ;;  %v6198_v33 = vor.u32 %v7325_v42, %v6197_v11 }
 0x815   :  { %v2928_v39 = vadd.f32 %v2926_v18, %v2924_v31  ;;  %v2929_v41 = vadd.f32 %v2927_v34, %v2925_v36  ;;  %v6282_v18 = vor.u32 %v7344_v28, %v6279_v55  ;;  %v7326_v34 = vld [vmem:[%s11022_s19 + $0x134] sm:$0xf]  ;;  %v6206_v31 = vor.u32 %v7327_v29, %v6205_v23  ;;  %v6421_v5 = vld [vmem:[%s11022_s19 + $0xe0] sm:$0xf]  ;;  %v7317_v28 = vld [vmem:[%s11022_s19 + $0xe4] sm:$0xf0] }
 0x816   :  { %v6270_v36 = vor.u32 %v7343_v32, %v6269_v30  ;;  %v6366_v23 = vor.u32 %v7303_v7, %v6365_v6  ;;  %v6250_v29 = vor.u32 %v7336_v21, %v6247_v22  ;;  %v6423_v6 = vld [vmem:[%s11022_s19 + $0xe8] sm:$0xf0]  ;;  %v7289_v21 = vld [vmem:[%s11022_s19 + $0x4] sm:$0xf0]  ;;  %v6373_v22 = vld [vmem:[%s11022_s19 + $0x80] sm:$0xf] }
 0x817   :  { %v2930_v12 = vpack.c.bf16 %v2928_v39, %v2928_v39  ;;  %v2931_v47 = vpack.c.bf16 %v2929_v41, %v2929_v41  ;;  %v7342_v39 = vld [vmem:[%s11022_s19 + $0x1b4] sm:$0xf]  ;;  %v6271_v41 = vld [vmem:[%s11022_s19 + $0x1b8] sm:$0xf0]  ;;  %v6426_v7 = vor.u32 %v7316_v4, %v6423_v6 }
 0x818   :  { %v6274_v48 = vor.u32 %v7342_v39, %v6271_v41  ;;  %v7315_v39 = vld [vmem:[%s11022_s19 + $0xd4] sm:$0xf0]  ;;  %v6530_v4 = vld [vmem:[%s11022_s19 + $0x278] sm:$0xf0] }
 0x819   :  { %v9581_v51 = vsel %vm2937_vm0, %v2930_v12, 0  ;;  %v9584_v52 = vsel %vm2937_vm0, %v2931_v47, 0  ;;  %v6189_v12 = vld [vmem:[%s11022_s19 + $0x110] sm:$0xf]  ;;  %v6210_v47 = vor.u32 %v7326_v34, %v6207_v38  ;;  %v7300_v34 = vld [vmem:[%s11022_s19 + $0x64] sm:$0xf] }
 0x81a   :  { %2951 = vmatpush.bf16.msra.mxu2 %v9581_v51  ;;  %2964 = vmatpush.bf16.msrb.mxu3 %v9584_v52  ;;  %v6190_v62 = vor.u32 %v7323_v50, %v6189_v12  ;;  %v6413_v38 = vld [vmem:[%s11022_s19 + $0xd0] sm:$0xf]  ;;  %v7297_v12 = vld [vmem:[%s11022_s19 + $0x44] sm:$0xf0] }
 0x81b   :  { %3016 = vmatpush.bf16.msra.mxu0 %v9581_v51  ;;  %3029 = vmatpush.bf16.msra.mxu1 %v9584_v52 }
 0x81d   :  { %6142 = vmatmul.msk.bf16.vlgmr.msra.gmra.mxu2 %vm2933_vm11, %v2932_v56  ;;  %6143 = vmatmul.msk.bf16.vlgmr.msrb.gmra.mxu3 %vm2933_vm11, %v2932_v56  ;;  %v6181_v56 = vld [vmem:[%s11022_s19 + $0x100] sm:$0xf] }
 0x81e   :  { %3230 = vmatpush.bf16.msrb.mxu2 %v6238_v46  ;;  %3243 = vmatpush.bf16.msra.mxu3 %v6302_v57  ;;  %v6262_v46 = vor.u32 %v7341_v3, %v6261_v45  ;;  %v6199_v57 = vld [vmem:[%s11022_s19 + $0x128] sm:$0xf0]  ;;  %v6414_v45 = vor.u32 %v7315_v39, %v6413_v38  ;;  %v6341_v3 = vld [vmem:[%s11022_s19 + $0x40] sm:$0xf]  ;;  %v7290_v38 = vld [vmem:[%s11022_s19 + $0x14] sm:$0xf] }
 0x81f   :  { %6145 = vmatmul.msk.bf16.vlgmr.msra.gmra.mxu0 %vm2933_vm11, %v6144_v58  ;;  %6146 = vmatmul.msk.bf16.vlgmr.msra.gmra.mxu1 %vm2933_vm11, %v6144_v58  ;;  %v7321_v58 = vld [vmem:[%s11022_s19 + $0x104] sm:$0xf0]  ;;  %v6202_v59 = vor.u32 %v7324_v40, %v6199_v57  ;;  %v6342_v40 = vor.u32 %v7297_v12, %v6341_v3  ;;  %v7295_v57 = vld [vmem:[%s11022_s19 + $0x34] sm:$0xf0]  ;;  %v6319_v39 = vld [vmem:[%s11022_s19 + $0x18] sm:$0xf0] }
 0x820   :  { %3256 = vmatpush.bf16.msrb.mxu0 %v6242_v60  ;;  %3269 = vmatpush.bf16.msrb.mxu1 %v6306_v61  ;;  %v6266_v60 = vor.u32 %v7340_v19, %v6263_v35  ;;  %v7322_v61 = vld [vmem:[%s11022_s19 + $0x114] sm:$0xf]  ;;  %v6182_v14 = vor.u32 %v7321_v58, %v6181_v56  ;;  %v6397_v19 = vld [vmem:[%s11022_s19 + $0xb0] sm:$0xf]  ;;  %v7311_v35 = vld [vmem:[%s11022_s19 + $0xb4] sm:$0xf0] }
 0x821   :  { %v7293_v56 = vld [vmem:[%s11022_s19 + $0x24] sm:$0xf0]  ;;  %v6389_v58 = vld [vmem:[%s11022_s19 + $0xa0] sm:$0xf]  ;;  %v7288_v12 = vld [vmem:[%s11022_s19 + $0x4] sm:$0xf] }
 0x822   :  { %3231 = vmatpush.bf16.msrb.mxu2 %v6230_v43  ;;  %3244 = vmatpush.bf16.msra.mxu3 %v6294_v63  ;;  %v6254_v43 = vor.u32 %v7339_v54, %v6253_v53  ;;  %v6191_v63 = vld [vmem:[%s11022_s19 + $0x118] sm:$0xf0]  ;;  %v6398_v53 = vor.u32 %v7311_v35, %v6397_v19  ;;  %v6325_v54 = vld [vmem:[%s11022_s19 + $0x20] sm:$0xf] }
 0x824   :  { %3257 = vmatpush.bf16.msrb.mxu0 %v6234_v44  ;;  %3270 = vmatpush.bf16.msrb.mxu1 %v6298_v9  ;;  %v7319_v44 = vld [vmem:[%s11022_s19 + $0xf4] sm:$0xf0]  ;;  %v6194_v9 = vor.u32 %v7322_v61, %v6191_v63  ;;  %v6381_v63 = vld [vmem:[%s11022_s19 + $0x90] sm:$0xf] }
 0x825   :  { %v6382_v2 = vor.u32 %v7307_v0, %v6381_v63  ;;  %v6592_v63 = vld [vmem:[%s11022_s19 + $0x2f0] sm:$0xf] }
 0x826   :  { %3232 = vmatpush.bf16.msrb.mxu2 %v6222_v10  ;;  %3245 = vmatpush.bf16.msra.mxu3 %v6286_v13  ;;  %v7320_v10 = vld [vmem:[%s11022_s19 + $0x104] sm:$0xf]  ;;  %v6183_v13 = vld [vmem:[%s11022_s19 + $0x108] sm:$0xf0] }
 0x827   :  { %v6186_v55 = vor.u32 %v7320_v10, %v6183_v13  ;;  %v6415_v10 = vld [vmem:[%s11022_s19 + $0xd8] sm:$0xf0] }
 0x828   :  { %3258 = vmatpush.bf16.msrb.mxu0 %v6226_v17  ;;  %3271 = vmatpush.bf16.msrb.mxu1 %v6290_v25  ;;  %v6430_v17 = vor.u32 %v7319_v44, %v6429_v8  ;;  %v6367_v25 = vld [vmem:[%s11022_s19 + $0x78] sm:$0xf0]  ;;  %v7298_v8 = vld [vmem:[%s11022_s19 + $0x54] sm:$0xf] }
 0x829   :  { %v6370_v30 = vor.u32 %v7302_v20, %v6367_v25  ;;  %v6351_v44 = vld [vmem:[%s11022_s19 + $0x58] sm:$0xf0]  ;;  %v6309_v20 = vld [vmem:[%s11022_s19] sm:$0xf]  ;;  %v7305_v25 = vld [vmem:[%s11022_s19 + $0x84] sm:$0xf0] }
 0x82a   :  { %3233 = vmatpush.bf16.msrb.mxu2 %v6214_v24  ;;  %3246 = vmatpush.bf16.msra.mxu3 %v6278_v27  ;;  %v6431_v24 = vld [vmem:[%s11022_s19 + $0xf8] sm:$0xf0]  ;;  %v7301_v27 = vld [vmem:[%s11022_s19 + $0x64] sm:$0xf0] }
 0x82b   :  { %v6434_v32 = vor.u32 %v7318_v26, %v6431_v24  ;;  %v6358_v11 = vor.u32 %v7301_v27, %v6357_v15  ;;  %v7312_v15 = vld [vmem:[%s11022_s19 + $0xc4] sm:$0xf]  ;;  %v6407_v26 = vld [vmem:[%s11022_s19 + $0xc8] sm:$0xf0]  ;;  %v6374_v24 = vor.u32 %v7305_v25, %v6373_v22  ;;  %v6512_v25 = vld [vmem:[%s11022_s19 + $0x250] sm:$0xf] }
 0x82c   :  { %3259 = vmatpush.bf16.msrb.mxu0 %v6218_v37  ;;  %3272 = vmatpush.bf16.msrb.mxu1 %v6282_v18  ;;  %v6422_v37 = vor.u32 %v7317_v28, %v6421_v5  ;;  %v6349_v18 = vld [vmem:[%s11022_s19 + $0x50] sm:$0xf]  ;;  %v6410_v27 = vor.u32 %v7312_v15, %v6407_v26  ;;  %v7294_v5 = vld [vmem:[%s11022_s19 + $0x34] sm:$0xf]  ;;  %v6335_v28 = vld [vmem:[%s11022_s19 + $0x38] sm:$0xf0] }
 0x82d   :  { %v7364_v15 = vld [vmem:[%s11022_s19 + $0x264] sm:$0xf] }
 0x82e   :  { %3234 = vmatpush.bf16.msrb.mxu2 %v6206_v31  ;;  %3247 = vmatpush.bf16.msra.mxu3 %v6270_v36  ;;  %v6359_v31 = vld [vmem:[%s11022_s19 + $0x68] sm:$0xf0]  ;;  %v7299_v36 = vld [vmem:[%s11022_s19 + $0x54] sm:$0xf0] }
 0x82f   :  { %v6362_v41 = vor.u32 %v7300_v34, %v6359_v31  ;;  %v6350_v42 = vor.u32 %v7299_v36, %v6349_v18  ;;  %v7308_v34 = vld [vmem:[%s11022_s19 + $0xa4] sm:$0xf]  ;;  %v6391_v31 = vld [vmem:[%s11022_s19 + $0xa8] sm:$0xf0] }
 0x830   :  { %3260 = vmatpush.bf16.msrb.mxu0 %v6210_v47  ;;  %3273 = vmatpush.bf16.msrb.mxu1 %v6274_v48  ;;  %v6405_v47 = vld [vmem:[%s11022_s19 + $0xc0] sm:$0xf]  ;;  %v7313_v48 = vld [vmem:[%s11022_s19 + $0xc4] sm:$0xf0]  ;;  %v6394_v36 = vor.u32 %v7308_v34, %v6391_v31 }
 0x831   :  { %v6504_v34 = vld [vmem:[%s11022_s19 + $0x240] sm:$0xf]  ;;  %v7361_v31 = vld [vmem:[%s11022_s19 + $0x244] sm:$0xf0] }
 0x832   :  { %3235 = vmatpush.bf16.msrb.mxu2 %v6198_v33  ;;  %3248 = vmatpush.bf16.msra.mxu3 %v6262_v46  ;;  %v6406_v33 = vor.u32 %v7313_v48, %v6405_v47  ;;  %v6333_v46 = vld [vmem:[%s11022_s19 + $0x30] sm:$0xf]  ;;  %v6311_v47 = vld [vmem:[%s11022_s19 + $0x8] sm:$0xf0]  ;;  %v7304_v48 = vld [vmem:[%s11022_s19 + $0x84] sm:$0xf] }
 0x833   :  { %v6334_v50 = vor.u32 %v7295_v57, %v6333_v46 }
 0x834   :  { %3261 = vmatpush.bf16.msrb.mxu0 %v6202_v59  ;;  %3274 = vmatpush.bf16.msrb.mxu1 %v6266_v60  ;;  %v7309_v59 = vld [vmem:[%s11022_s19 + $0xa4] sm:$0xf0]  ;;  %v6326_v60 = vor.u32 %v7293_v56, %v6325_v54 }
 0x835   :  { %v6390_v61 = vor.u32 %v7309_v59, %v6389_v58 }
 0x836   :  { %3236 = vmatpush.bf16.msrb.mxu2 %v6190_v62  ;;  %3249 = vmatpush.bf16.msra.mxu3 %v6254_v43  ;;  %v6317_v62 = vld [vmem:[%s11022_s19 + $0x10] sm:$0xf]  ;;  %v7291_v43 = vld [vmem:[%s11022_s19 + $0x14] sm:$0xf0] }
 0x837   :  { %v6318_v1 = vor.u32 %v7291_v43, %v6317_v62  ;;  %v7367_v43 = vld [vmem:[%s11022_s19 + $0x274] sm:$0xf0] }
 0x838   :  { %3262 = vmatpush.bf16.msrb.mxu0 %v6194_v9  ;;  %3275 = vmatpush.bf16.msrb.mxu1 %v6258_v49  ;;  %v6354_v9 = vor.u32 %v7298_v8, %v6351_v44  ;;  %v7314_v49 = vld [vmem:[%s11022_s19 + $0xd4] sm:$0xf]  ;;  %v6594_v44 = vld [vmem:[%s11022_s19 + $0x2f8] sm:$0xf0] }
 0x839   :  { %v6418_v13 = vor.u32 %v7314_v49, %v6415_v10  ;;  %v7382_v8 = vld [vmem:[%s11022_s19 + $0x2f4] sm:$0xf]  ;;  %v6520_v49 = vld [vmem:[%s11022_s19 + $0x260] sm:$0xf]  ;;  %v7365_v10 = vld [vmem:[%s11022_s19 + $0x264] sm:$0xf0] }
 0x83a   :  { %3237 = vmatpush.bf16.msrb.mxu2 %v6182_v14  ;;  %3250 = vmatpush.bf16.msra.mxu3 %v6246_v16  ;;  %v7296_v14 = vld [vmem:[%s11022_s19 + $0x44] sm:$0xf]  ;;  %v6343_v16 = vld [vmem:[%s11022_s19 + $0x48] sm:$0xf0] }
 0x83c   :  { %3263 = vmatpush.bf16.msrb.mxu0 %v6186_v55  ;;  %3276 = vmatpush.bf16.msrb.mxu1 %v6250_v29  ;;  %v7310_v55 = vld [vmem:[%s11022_s19 + $0xb4] sm:$0xf]  ;;  %v6338_v29 = vor.u32 %v7294_v5, %v6335_v28  ;;  %v7379_v5 = vld [vmem:[%s11022_s19 + $0x2d4] sm:$0xf0] }
 0x83e   :  { %3442 = vmatpush.bf16.msra.mxu2 %v6366_v23  ;;  %3455 = vmatpush.bf16.msrb.mxu3 %v6430_v17  ;;  %v6346_v23 = vor.u32 %v7296_v14, %v6343_v16  ;;  %v6310_v17 = vor.u32 %v7289_v21, %v6309_v20  ;;  %v6521_v14 = vor.u32 %v7365_v10, %v6520_v49  ;;  %v7381_v16 = vld [vmem:[%s11022_s19 + $0x2e4] sm:$0xf0]  ;;  %v6522_v20 = vld [vmem:[%s11022_s19 + $0x268] sm:$0xf0] }
 0x83f   :  { %v6525_v22 = vor.u32 %v7364_v15, %v6522_v20 }
 0x840   :  { %3468 = vmatpush.bf16.msra.mxu0 %v6370_v30  ;;  %3481 = vmatpush.bf16.msra.mxu1 %v6434_v32  ;;  %v6399_v30 = vld [vmem:[%s11022_s19 + $0xb8] sm:$0xf0] }
 0x841   :  { %v6402_v32 = vor.u32 %v7310_v55, %v6399_v30  ;;  %v6514_v30 = vld [vmem:[%s11022_s19 + $0x258] sm:$0xf0] }
 0x842   :  { %3443 = vmatpush.bf16.msra.mxu2 %v6358_v11  ;;  %3456 = vmatpush.bf16.msrb.mxu3 %v6422_v37  ;;  %v7292_v11 = vld [vmem:[%s11022_s19 + $0x24] sm:$0xf]  ;;  %v6327_v37 = vld [vmem:[%s11022_s19 + $0x28] sm:$0xf0] }
 0x843   :  { %v6330_v18 = vor.u32 %v7292_v11, %v6327_v37  ;;  %v6578_v37 = vld [vmem:[%s11022_s19 + $0x2d8] sm:$0xf0] }
 0x844   :  { %3469 = vmatpush.bf16.msra.mxu0 %v6362_v41  ;;  %3482 = vmatpush.bf16.msra.mxu1 %v6426_v7  ;;  %v6322_v41 = vor.u32 %v7290_v38, %v6319_v39  ;;  %v6505_v38 = vor.u32 %v7361_v31, %v6504_v34  ;;  %v7377_v39 = vld [vmem:[%s11022_s19 + $0x2c4] sm:$0xf0]  ;;  %v6538_v34 = vld [vmem:[%s11022_s19 + $0x288] sm:$0xf0] }
 0x846   :  { %3444 = vmatpush.bf16.msra.mxu2 %v6350_v42  ;;  %3457 = vmatpush.bf16.msrb.mxu3 %v6414_v45  ;;  %v7306_v42 = vld [vmem:[%s11022_s19 + $0x94] sm:$0xf]  ;;  %v6383_v45 = vld [vmem:[%s11022_s19 + $0x98] sm:$0xf0] }
 0x847   :  { %v6386_v3 = vor.u32 %v7306_v42, %v6383_v45  ;;  %v6506_v42 = vld [vmem:[%s11022_s19 + $0x248] sm:$0xf0] }
 0x848   :  { %3470 = vmatpush.bf16.msra.mxu0 %v6354_v9  ;;  %3483 = vmatpush.bf16.msra.mxu1 %v6418_v13  ;;  %v6597_v9 = vor.u32 %v7382_v8, %v6594_v44  ;;  %v6584_v13 = vld [vmem:[%s11022_s19 + $0x2e0] sm:$0xf]  ;;  %v7355_v8 = vld [vmem:[%s11022_s19 + $0x214] sm:$0xf0]  ;;  %v6544_v44 = vld [vmem:[%s11022_s19 + $0x290] sm:$0xf] }
 0x849   :  { %v6585_v21 = vor.u32 %v7381_v16, %v6584_v13  ;;  %v7354_v13 = vld [vmem:[%s11022_s19 + $0x214] sm:$0xf] }
 0x84a   :  { %3445 = vmatpush.bf16.msra.mxu2 %v6342_v40  ;;  %3458 = vmatpush.bf16.msrb.mxu3 %v6406_v33  ;;  %v6314_v40 = vor.u32 %v7288_v12, %v6311_v47  ;;  %v6375_v33 = vld [vmem:[%s11022_s19 + $0x88] sm:$0xf0]  ;;  %v7376_v12 = vld [vmem:[%s11022_s19 + $0x2c4] sm:$0xf]  ;;  %v7370_v16 = vld [vmem:[%s11022_s19 + $0x294] sm:$0xf] }
 0x84b   :  { %v6378_v46 = vor.u32 %v7304_v48, %v6375_v33  ;;  %v6570_v47 = vld [vmem:[%s11022_s19 + $0x2c8] sm:$0xf0]  ;;  %v7359_v33 = vld [vmem:[%s11022_s19 + $0x234] sm:$0xf0] }
 0x84c   :  { %3471 = vmatpush.bf16.msra.mxu0 %v6346_v23  ;;  %3484 = vmatpush.bf16.msra.mxu1 %v6410_v27  ;;  %v7380_v23 = vld [vmem:[%s11022_s19 + $0x2e4] sm:$0xf]  ;;  %v6576_v27 = vld [vmem:[%s11022_s19 + $0x2d0] sm:$0xf]  ;;  %v6573_v48 = vor.u32 %v7376_v12, %v6570_v47  ;;  %v3815_v12 = vld [vmem:[%s11024_s21 + $0x68] sm:$0xff] }
 0x84d   :  { %v6577_v55 = vor.u32 %v7379_v5, %v6576_v27 }
 0x84e   :  { %3446 = vmatpush.bf16.msra.mxu2 %v6334_v50  ;;  %3459 = vmatpush.bf16.msrb.mxu3 %v6398_v53 }
 0x850   :  { %3472 = vmatpush.bf16.msra.mxu0 %v6338_v29  ;;  %3485 = vmatpush.bf16.msra.mxu1 %v6402_v32  ;;  %v7362_v29 = vld [vmem:[%s11022_s19 + $0x254] sm:$0xf] }
 0x851   :  { %v7378_v32 = vld [vmem:[%s11022_s19 + $0x2d4] sm:$0xf]  ;;  %v6517_v11 = vor.u32 %v7362_v29, %v6514_v30  ;;  %v7352_v29 = vld [vmem:[%s11022_s19 + $0x204] sm:$0xf]  ;;  %v6474_v30 = vld [vmem:[%s11022_s19 + $0x208] sm:$0xf0] }
 0x852   :  { %3447 = vmatpush.bf16.msra.mxu2 %v6326_v60  ;;  %3460 = vmatpush.bf16.msrb.mxu3 %v6390_v61 }
 0x854   :  { %3473 = vmatpush.bf16.msra.mxu0 %v6330_v18  ;;  %3486 = vmatpush.bf16.msra.mxu1 %v6394_v36  ;;  %v6581_v18 = vor.u32 %v7378_v32, %v6578_v37  ;;  %v6568_v36 = vld [vmem:[%s11022_s19 + $0x2c0] sm:$0xf]  ;;  %v6477_v37 = vor.u32 %v7352_v29, %v6474_v30 }
 0x855   :  { %v6569_v45 = vor.u32 %v7377_v39, %v6568_v36 }
 0x856   :  { %3448 = vmatpush.bf16.msra.mxu2 %v6318_v1  ;;  %3461 = vmatpush.bf16.msrb.mxu3 %v6382_v2  ;;  %v7383_v1 = vld [vmem:[%s11022_s19 + $0x2f4] sm:$0xf0]  ;;  %v7366_v2 = vld [vmem:[%s11022_s19 + $0x274] sm:$0xf] }
 0x857   :  { %v6593_v6 = vor.u32 %v7383_v1, %v6592_v63  ;;  %v6533_v7 = vor.u32 %v7366_v2, %v6530_v4  ;;  %v6490_v63 = vld [vmem:[%s11022_s19 + $0x228] sm:$0xf0]  ;;  %v7372_v2 = vld [vmem:[%s11022_s19 + $0x2a4] sm:$0xf] }
 0x858   :  { %3474 = vmatpush.bf16.msra.mxu0 %v6322_v41  ;;  %3487 = vmatpush.bf16.msra.mxu1 %v6386_v3  ;;  %v7360_v41 = vld [vmem:[%s11022_s19 + $0x244] sm:$0xf]  ;;  %v6554_v4 = vld [vmem:[%s11022_s19 + $0x2a8] sm:$0xf0] }
 0x859   :  { %v6509_v3 = vor.u32 %v7360_v41, %v6506_v42  ;;  %v3817_v42 = vld [vmem:[%s11024_s21 + $0x78] sm:$0xff] }
 0x85a   :  { %3449 = vmatpush.bf16.msra.mxu2 %v6310_v17  ;;  %3462 = vmatpush.bf16.msrb.mxu3 %v6374_v24  ;;  %v6586_v17 = vld [vmem:[%s11022_s19 + $0x2e8] sm:$0xf0]  ;;  %v7363_v24 = vld [vmem:[%s11022_s19 + $0x254] sm:$0xf0] }
 0x85b   :  { %v6589_v26 = vor.u32 %v7380_v23, %v6586_v17  ;;  %v6513_v28 = vor.u32 %v7363_v24, %v6512_v25  ;;  %v6472_v25 = vld [vmem:[%s11022_s19 + $0x200] sm:$0xf] }
 0x85c   :  { %3475 = vmatpush.bf16.msra.mxu0 %v6314_v40  ;;  %3488 = vmatpush.bf16.msra.mxu1 %v6378_v46  ;;  %v6496_v40 = vld [vmem:[%s11022_s19 + $0x230] sm:$0xf]  ;;  %v6536_v24 = vld [vmem:[%s11022_s19 + $0x280] sm:$0xf] }
 0x85d   :  { %v6560_v46 = vld [vmem:[%s11022_s19 + $0x2b0] sm:$0xf] }
 0x89c   :  { %v3018_v57 = vpop.f32.mrf.mxu0  ;;  %v3031_v19 = vpop.f32.mrf.mxu1 }
 0x89d   :  { %v3035_v35 = vpack.c.bf16 %v3018_v57, %v3018_v57  ;;  %v3036_v50 = vpack.c.bf16 %v3031_v19, %v3031_v19  ;;  %v6497_v57 = vor.u32 %v7359_v33, %v6496_v40  ;;  %v7375_v19 = vld [vmem:[%s11022_s19 + $0x2b4] sm:$0xf0]  ;;  %v3814_v40 = vld [vmem:[%s11024_s21 + $0x60] sm:$0xff] }
 0x89f   :  { %3238 = vmatmul.bf16.vlgmr.msrb.gmra.mxu2 %v3035_v35  ;;  %3251 = vmatmul.bf16.vlgmr.msra.gmra.mxu3 %v3036_v50 }
 0x8a0   :  { %3506 = vmatpush.bf16.msrb.mxu2 %v9581_v51  ;;  %3519 = vmatpush.bf16.msra.mxu3 %v9584_v52  ;;  %v2953_v53 = vpop.f32.mrf.mxu2  ;;  %v2966_v54 = vpop.f32.mrf.mxu3  ;;  %v6435_v51 = vld [vmem:[%s11021_s18 + $0x4] sm:$0x3]  ;;  %v6528_v52 = vld [vmem:[%s11022_s19 + $0x270] sm:$0xf] }
 0x8a1   :  { %3264 = vmatmul.bf16.vlgmr.msrb.gmra.mxu0 %v3035_v35  ;;  %3277 = vmatmul.bf16.vlgmr.msrb.gmra.mxu1 %v3036_v50  ;;  %v2970_v61 = vpack.c.bf16 %v2953_v53, %v2953_v53  ;;  %v2971_v62 = vpack.c.bf16 %v2966_v54, %v2966_v54  ;;  %v6529_v0 = vor.u32 %v7367_v43, %v6528_v52  ;;  %v7358_v35 = vld [vmem:[%s11022_s19 + $0x234] sm:$0xf]  ;;  %v6498_v50 = vld [vmem:[%s11022_s19 + $0x238] sm:$0xf0]  ;;  %v7373_v52 = vld [vmem:[%s11022_s19 + $0x2a4] sm:$0xf0] }
 0x8a2   :  { %3733 = vmatpush.bf16.msrb.mxu1 %v6593_v6  ;;  %v6561_v53 = vor.u32 %v7375_v19, %v6560_v46  ;;  %v6501_v54 = vor.u32 %v7358_v35, %v6498_v50  ;;  %v7356_v43 = vld [vmem:[%s11022_s19 + $0x224] sm:$0xf]  ;;  %v6480_v6 = vld [vmem:[%s11022_s19 + $0x210] sm:$0xf] }
 0x8a3   :  { %3720 = vmatpush.bf16.msrb.mxu0 %v6529_v0  ;;  %v6493_v1 = vor.u32 %v7356_v43, %v6490_v63  ;;  %v6481_v49 = vor.u32 %v7355_v8, %v6480_v6  ;;  %v3813_v43 = vld [vmem:[%s11024_s21 + $0x58] sm:$0xff]  ;;  %v3832_v63 = vld [vmem:[%s11024_s21 + $0xf0] sm:$0xff]  ;;  %v3810_v6 = vld [vmem:[%s11024_s21 + $0x40] sm:$0xff] }
 0x8a4   :  { %v3020_v56 = vpop.f32.mrf.mxu0  ;;  %v3033_v58 = vpop.f32.mrf.mxu1  ;;  %v3809_v8 = vld [vmem:[%s11024_s21 + $0x38] sm:$0xff] }
 0x8a5   :  { %v7374_v56 = vld [vmem:[%s11022_s19 + $0x2b4] sm:$0xf]  ;;  %v6562_v58 = vld [vmem:[%s11022_s19 + $0x2b8] sm:$0xf0] }
 0x8a6   :  { %3734 = vmatpush.bf16.msrb.mxu1 %v6585_v21 }
 0x8a7   :  { %3721 = vmatpush.bf16.msrb.mxu0 %v6521_v14  ;;  %v6482_v14 = vld [vmem:[%s11022_s19 + $0x218] sm:$0xf0] }
 0x8a8   :  { %v2955_v59 = vpop.f32.mrf.mxu2  ;;  %v2968_v60 = vpop.f32.mrf.mxu3  ;;  %v6485_v21 = vor.u32 %v7354_v13, %v6482_v14  ;;  %v3826_v13 = vld [vmem:[%s11024_s21 + $0xc0] sm:$0xff] }
 0x8a9   :  { %v6565_v59 = vor.u32 %v7374_v56, %v6562_v58  ;;  %v6488_v60 = vld [vmem:[%s11022_s19 + $0x220] sm:$0xf] }
 0x8aa   :  { %3735 = vmatpush.bf16.msrb.mxu1 %v6577_v55  ;;  %v7369_v55 = vld [vmem:[%s11022_s19 + $0x284] sm:$0xf0]  ;;  %v3806_v14 = vld [vmem:[%s11024_s21 + $0x20] sm:$0xff] }
 0x8ab   :  { %3722 = vmatpush.bf16.msrb.mxu0 %v6513_v28 }
 0x8ae   :  { %3736 = vmatpush.bf16.msrb.mxu1 %v6569_v45  ;;  %v3816_v45 = vld [vmem:[%s11024_s21 + $0x70] sm:$0xff] }
 0x8af   :  { %3450 = vmatmul.bf16.vlgmr.msra.gmra.mxu2 %v2970_v61  ;;  %3463 = vmatmul.bf16.vlgmr.msrb.gmra.mxu3 %v2971_v62 }
 0x8b0   :  { %3746 = vmatpush.bf16.msra.mxu2 %v6533_v7  ;;  %3759 = vmatpush.bf16.msrb.mxu3 %v6597_v9  ;;  %v6557_v7 = vor.u32 %v7372_v2, %v6554_v4  ;;  %v7371_v9 = vld [vmem:[%s11022_s19 + $0x294] sm:$0xf0]  ;;  %v3811_v2 = vld [vmem:[%s11024_s21 + $0x48] sm:$0xff]  ;;  %v3830_v4 = vld [vmem:[%s11024_s21 + $0xe0] sm:$0xff] }
 0x8b1   :  { %3476 = vmatmul.bf16.vlgmr.msra.gmra.mxu0 %v2970_v61  ;;  %3489 = vmatmul.bf16.vlgmr.msra.gmra.mxu1 %v2971_v62  ;;  %v7357_v61 = vld [vmem:[%s11022_s19 + $0x224] sm:$0xf0]  ;;  %v6552_v62 = vld [vmem:[%s11022_s19 + $0x2a0] sm:$0xf]  ;;  %v6545_v10 = vor.u32 %v7371_v9, %v6544_v44  ;;  %v3828_v44 = vld [vmem:[%s11024_s21 + $0xd0] sm:$0xff] }
 0x8b2   :  { %3723 = vmatpush.bf16.msrb.mxu0 %v6505_v38  ;;  %3737 = vmatpush.bf16.msrb.mxu1 %v6561_v53  ;;  %v6553_v0 = vor.u32 %v7373_v52, %v6552_v62  ;;  %v3808_v9 = vld [vmem:[%s11024_s21 + $0x30] sm:$0xff] }
 0x8b4   :  { %3747 = vmatpush.bf16.msra.mxu2 %v6525_v22  ;;  %3760 = vmatpush.bf16.msrb.mxu3 %v6589_v26  ;;  %v6546_v22 = vld [vmem:[%s11022_s19 + $0x298] sm:$0xf0]  ;;  %v7353_v26 = vld [vmem:[%s11022_s19 + $0x204] sm:$0xf0] }
 0x8b5   :  { %v6549_v17 = vor.u32 %v7370_v16, %v6546_v22  ;;  %v6473_v28 = vor.u32 %v7353_v26, %v6472_v25  ;;  %v3825_v16 = vld [vmem:[%s11024_s21 + $0xb8] sm:$0xff]  ;;  %v3823_v22 = vld [vmem:[%s11024_s21 + $0xa8] sm:$0xff]  ;;  %v3802_v25 = vld [vmem:[%s11024_s21] sm:$0xff] }
 0x8b6   :  { %3724 = vmatpush.bf16.msrb.mxu0 %v6497_v57  ;;  %3738 = vmatpush.bf16.msrb.mxu1 %v6553_v0  ;;  %v3812_v0 = vld [vmem:[%s11024_s21 + $0x50] sm:$0xff]  ;;  %v3821_v26 = vld [vmem:[%s11024_s21 + $0x98] sm:$0xff] }
 0x8b8   :  { %3748 = vmatpush.bf16.msra.mxu2 %v6517_v11  ;;  %3761 = vmatpush.bf16.msrb.mxu3 %v6581_v18  ;;  %v6537_v11 = vor.u32 %v7369_v55, %v6536_v24  ;;  %v7368_v18 = vld [vmem:[%s11022_s19 + $0x284] sm:$0xf]  ;;  %v3820_v24 = vld [vmem:[%s11024_s21 + $0x90] sm:$0xff] }
 0x8b9   :  { %v6541_v31 = vor.u32 %v7368_v18, %v6538_v34 }
 0x8ba   :  { %3739 = vmatpush.bf16.msrb.mxu1 %v6545_v10  ;;  %v3807_v10 = vld [vmem:[%s11024_s21 + $0x28] sm:$0xff] }
 0x8bc   :  { %3749 = vmatpush.bf16.msra.mxu2 %v6509_v3  ;;  %3762 = vmatpush.bf16.msrb.mxu3 %v6573_v48  ;;  %v3833_v3 = vld [vmem:[%s11024_s21 + $0xf8] sm:$0xff] }
 0x8be   :  { %3740 = vmatpush.bf16.msrb.mxu1 %v6537_v11 }
 0x8bf   :  { %6436 = vmatmul.msk.bf16.vlgmr.msrb.gmra.mxu2 %vm2933_vm11, %v6435_v51  ;;  %6437 = vmatmul.msk.bf16.vlgmr.msra.gmra.mxu3 %vm2933_vm11, %v6435_v51  ;;  %v6489_v51 = vor.u32 %v7357_v61, %v6488_v60 }
 0x8c0   :  { %3750 = vmatpush.bf16.msra.mxu2 %v6501_v54  ;;  %3763 = vmatpush.bf16.msrb.mxu3 %v6565_v59 }
 0x8c1   :  { %3725 = vmatpush.bf16.msrb.mxu0 %v6489_v51 }
 0x8c2   :  { %3854 = vmatpush.msra.mxu1 %v3833_v3 }
 0x8c4   :  { %3751 = vmatpush.bf16.msra.mxu2 %v6493_v1  ;;  %3764 = vmatpush.bf16.msrb.mxu3 %v6557_v7  ;;  %v3831_v1 = vld [vmem:[%s11024_s21 + $0xe8] sm:$0xff]  ;;  %v3829_v7 = vld [vmem:[%s11024_s21 + $0xd8] sm:$0xff] }
 0x8c5   :  { %3726 = vmatpush.bf16.msrb.mxu0 %v6481_v49  ;;  %3855 = vmatpush.msra.mxu1 %v3832_v63  ;;  %v3827_v49 = vld [vmem:[%s11024_s21 + $0xc8] sm:$0xff] }
 0x8c7   :  { %3856 = vmatpush.msra.mxu1 %v3831_v1 }
 0x8c8   :  { %3752 = vmatpush.bf16.msra.mxu2 %v6485_v21  ;;  %3765 = vmatpush.bf16.msrb.mxu3 %v6549_v17  ;;  %v3804_v21 = vld [vmem:[%s11024_s21 + $0x10] sm:$0xff]  ;;  %v3822_v17 = vld [vmem:[%s11024_s21 + $0xa0] sm:$0xff] }
 0x8c9   :  { %3727 = vmatpush.bf16.msrb.mxu0 %v6473_v28  ;;  %3857 = vmatpush.msra.mxu1 %v3830_v4  ;;  %v3774_v28 = vld [vmem:[%s11023_s20] sm:$0x3] }
 0x8cb   :  { %3858 = vmatpush.msra.mxu1 %v3829_v7 }
 0x8cc   :  { %3753 = vmatpush.bf16.msra.mxu2 %v6477_v37  ;;  %3766 = vmatpush.bf16.msrb.mxu3 %v6541_v31 }
 0x8cd   :  { %3834 = vmatpush.msra.mxu0 %v3817_v42  ;;  %3859 = vmatpush.msra.mxu1 %v3828_v44 }
 0x8cf   :  { %3835 = vmatpush.msra.mxu0 %v3816_v45  ;;  %3860 = vmatpush.msra.mxu1 %v3827_v49 }
 0x8d0   :  { %3890 = vmatpush.msrb.mxu2 %v3817_v42  ;;  %3910 = vmatpush.msra.mxu3 %v3833_v3 }
 0x8d1   :  { %3836 = vmatpush.msra.mxu0 %v3815_v12  ;;  %3861 = vmatpush.msra.mxu1 %v3826_v13 }
 0x8d2   :  { %3891 = vmatpush.msrb.mxu2 %v3816_v45  ;;  %3911 = vmatpush.msra.mxu3 %v3832_v63 }
 0x8d3   :  { %3837 = vmatpush.msra.mxu0 %v3814_v40  ;;  %3862 = vmatpush.msra.mxu1 %v3825_v16 }
 0x8d4   :  { %3892 = vmatpush.msrb.mxu2 %v3815_v12  ;;  %3912 = vmatpush.msra.mxu3 %v3831_v1 }
 0x8d5   :  { %3838 = vmatpush.msra.mxu0 %v3813_v43 }
 0x8d6   :  { %3893 = vmatpush.msrb.mxu2 %v3814_v40  ;;  %3913 = vmatpush.msra.mxu3 %v3830_v4 }
 0x8d7   :  { %3839 = vmatpush.msra.mxu0 %v3812_v0 }
 0x8d8   :  { %3894 = vmatpush.msrb.mxu2 %v3813_v43  ;;  %3914 = vmatpush.msra.mxu3 %v3829_v7 }
 0x8d9   :  { %3840 = vmatpush.msra.mxu0 %v3811_v2 }
 0x8da   :  { %3895 = vmatpush.msrb.mxu2 %v3812_v0  ;;  %3915 = vmatpush.msra.mxu3 %v3828_v44 }
 0x8db   :  { %3841 = vmatpush.msra.mxu0 %v3810_v6 }
 0x8dc   :  { %3896 = vmatpush.msrb.mxu2 %v3811_v2  ;;  %3916 = vmatpush.msra.mxu3 %v3827_v49 }
 0x8dd   :  { %3842 = vmatpush.msra.mxu0 %v3809_v8 }
 0x8de   :  { %3897 = vmatpush.msrb.mxu2 %v3810_v6  ;;  %3917 = vmatpush.msra.mxu3 %v3826_v13 }
 0x8df   :  { %3843 = vmatpush.msra.mxu0 %v3808_v9 }
 0x8e0   :  { %3898 = vmatpush.msrb.mxu2 %v3809_v8  ;;  %3918 = vmatpush.msra.mxu3 %v3825_v16  ;;  %v3989_v16 = vld [vmem:[%s11025_s22 + $0xf8] sm:$0xff] }
 0x8e1   :  { %3844 = vmatpush.msra.mxu0 %v3807_v10 }
 0x8e2   :  { %3899 = vmatpush.msrb.mxu2 %v3808_v9 }
 0x8e3   :  { %3845 = vmatpush.msra.mxu0 %v3806_v14 }
 0x8e4   :  { %3900 = vmatpush.msrb.mxu2 %v3807_v10 }
 0x8e6   :  { %3901 = vmatpush.msrb.mxu2 %v3806_v14  ;;  %v3988_v14 = vld [vmem:[%s11025_s22 + $0xf0] sm:$0xff] }
 0x91e   :  { %v3265_v15 = vpop.f32.mrf.mxu0  ;;  %v3278_v20 = vpop.f32.mrf.mxu1 }
 0x91f   :  { %v3279_v23 = vadd.f32 %v3278_v20, %v3265_v15  ;;  %v3805_v15 = vld [vmem:[%s11024_s21 + $0x18] sm:$0xff]  ;;  %v3824_v20 = vld [vmem:[%s11024_s21 + $0xb0] sm:$0xff] }
 0x920   :  { %3846 = vmatpush.msra.mxu0 %v3805_v15  ;;  %3863 = vmatpush.msra.mxu1 %v3824_v20 }
 0x921   :  { %3902 = vmatpush.msrb.mxu2 %v3805_v15  ;;  %3919 = vmatpush.msra.mxu3 %v3824_v20  ;;  %v3986_v15 = vld [vmem:[%s11025_s22 + $0xe0] sm:$0xff]  ;;  %v3987_v20 = vld [vmem:[%s11025_s22 + $0xe8] sm:$0xff] }
 0x922   :  { %v3239_v27 = vpop.f32.mrf.mxu2  ;;  %v3252_v5 = vpop.f32.mrf.mxu3  ;;  %3847 = vmatpush.msra.mxu0 %v3804_v21  ;;  %3864 = vmatpush.msra.mxu1 %v3823_v22 }
 0x923   :  { %v3253_v32 = vadd.f32 %v3252_v5, %v3239_v27  ;;  %3903 = vmatpush.msrb.mxu2 %v3804_v21  ;;  %3920 = vmatpush.msra.mxu3 %v3823_v22  ;;  %v3819_v27 = vld [vmem:[%s11024_s21 + $0x88] sm:$0xff]  ;;  %v3818_v5 = vld [vmem:[%s11024_s21 + $0x80] sm:$0xff]  ;;  %v7524_v21 = vmov 8.0   ;;  %v3984_v22 = vld [vmem:[%s11025_s22 + $0xd0] sm:$0xff] }
 0x924   :  { %3865 = vmatpush.msra.mxu1 %v3822_v17  ;;  %7492 = vrcp.f32 %v7524_v21 }
 0x925   :  { %3921 = vmatpush.msra.mxu3 %v3822_v17  ;;  %v3982_v17 = vld [vmem:[%s11025_s22 + $0xc0] sm:$0xff] }
 0x926   :  { %v3267_v36 = vpop.f32.mrf.mxu0  ;;  %v3280_v38 = vpop.f32.mrf.mxu1  ;;  %3866 = vmatpush.msra.mxu1 %v3821_v26 }
 0x927   :  { %3922 = vmatpush.msra.mxu3 %v3821_v26  ;;  %v3777_v38 = vperm.slane %v3774_v28, 1  ;;  %v3980_v26 = vld [vmem:[%s11025_s22 + $0xb0] sm:$0xff] }
 0x928   :  { %3867 = vmatpush.msra.mxu1 %v3820_v24 }
 0x929   :  { %3923 = vmatpush.msra.mxu3 %v3820_v24  ;;  %v3981_v24 = vld [vmem:[%s11025_s22 + $0xb8] sm:$0xff] }
 0x92a   :  { %v3241_v39 = vpop.f32.mrf.mxu2  ;;  %v3254_v41 = vpop.f32.mrf.mxu3  ;;  %3868 = vmatpush.msra.mxu1 %v3819_v27 }
 0x92b   :  { %3924 = vmatpush.msra.mxu3 %v3819_v27  ;;  %v10302_v27 = vpop.eup %7492 }
 0x92c   :  { %3869 = vmatpush.msra.mxu1 %v3818_v5  ;;  %vm3935_vm14 = vweird.f32 %v10302_v27 }
 0x92d   :  { %3925 = vmatpush.msra.mxu3 %v3818_v5  ;;  %v3978_v5 = vld [vmem:[%s11025_s22 + $0xa0] sm:$0xff] }
 0x92e   :  { %v3477_v47 = vpop.f32.mrf.mxu0  ;;  %v3490_v48 = vpop.f32.mrf.mxu1 }
 0x92f   :  { %v3478_v33 = vadd.f32 %v3477_v47, %v3279_v23  ;;  %v3803_v23 = vld [vmem:[%s11024_s21 + $0x8] sm:$0xff] }
 0x930   :  { %3848 = vmatpush.msra.mxu0 %v3803_v23  ;;  %3904 = vmatpush.msrb.mxu2 %v3803_v23  ;;  %v3985_v23 = vld [vmem:[%s11025_s22 + $0xd8] sm:$0xff] }
 0x931   :  { %v10168_v46 = vadd.f32 %v3490_v48, %v3478_v33 }
 0x932   :  { %v3451_v57 = vpop.f32.mrf.mxu2  ;;  %v3464_v19 = vpop.f32.mrf.mxu3  ;;  %3849 = vmatpush.msra.mxu0 %v3802_v25  ;;  %3905 = vmatpush.msrb.mxu2 %v3802_v25  ;;  %v3983_v25 = vld [vmem:[%s11025_s22 + $0xc8] sm:$0xff] }
 0x933   :  { %v3452_v35 = vadd.f32 %v3451_v57, %v3253_v32  ;;  %v3776_v32 = vperm.slane %v3774_v28, 0  ;;  %v3979_v28 = vld [vmem:[%s11025_s22 + $0xa8] sm:$0xff] }
 0x935   :  { %v10170_v50 = vadd.f32 %v3464_v19, %v3452_v35 }
 0x936   :  { %v3479_v53 = vpop.f32.mrf.mxu0  ;;  %v3492_v54 = vpop.f32.mrf.mxu1 }
 0x93a   :  { %v3453_v56 = vpop.f32.mrf.mxu2  ;;  %v3466_v58 = vpop.f32.mrf.mxu3 }
 0x942   :  { %v3508_v59 = vpop.f32.mrf.mxu2  ;;  %v3521_v60 = vpop.f32.mrf.mxu3 }
 0x943   :  { %v3525_v61 = vpack.c.bf16 %v3508_v59, %v3508_v59  ;;  %v3526_v62 = vpack.c.bf16 %v3521_v60, %v3521_v60 }
 0x945   :  { %3728 = vmatmul.bf16.vlgmr.msrb.gmra.mxu0 %v3525_v61  ;;  %3741 = vmatmul.bf16.vlgmr.msrb.gmra.mxu1 %v3526_v62 }
 0x946   :  { %3754 = vmatmul.bf16.vlgmr.msra.gmra.mxu2 %v3525_v61  ;;  %3767 = vmatmul.bf16.vlgmr.msrb.gmra.mxu3 %v3526_v62 }
 0x947   :  { %3990 = vmatpush.msrb.mxu0 %v3988_v14  ;;  %4010 = vmatpush.msrb.mxu1 %v3989_v16 }
 0x948   :  { %4030 = vmatpush.msra.mxu2 %v3988_v14  ;;  %4050 = vmatpush.msrb.mxu3 %v3989_v16 }
 0x949   :  { %3991 = vmatpush.msrb.mxu0 %v3986_v15  ;;  %4011 = vmatpush.msrb.mxu1 %v3987_v20 }
 0x94a   :  { %v3510_v51 = vpop.f32.mrf.mxu2  ;;  %v3523_v52 = vpop.f32.mrf.mxu3  ;;  %4031 = vmatpush.msra.mxu2 %v3986_v15  ;;  %4051 = vmatpush.msrb.mxu3 %v3987_v20 }
 0x94b   :  { %3992 = vmatpush.msrb.mxu0 %v3984_v22  ;;  %4012 = vmatpush.msrb.mxu1 %v3985_v23 }
 0x94c   :  { %4032 = vmatpush.msra.mxu2 %v3984_v22  ;;  %4052 = vmatpush.msrb.mxu3 %v3985_v23 }
 0x94d   :  { %3993 = vmatpush.msrb.mxu0 %v3982_v17  ;;  %4013 = vmatpush.msrb.mxu1 %v3983_v25 }
 0x94e   :  { %4033 = vmatpush.msra.mxu2 %v3982_v17  ;;  %4053 = vmatpush.msrb.mxu3 %v3983_v25 }
 0x94f   :  { %3994 = vmatpush.msrb.mxu0 %v3980_v26  ;;  %4014 = vmatpush.msrb.mxu1 %v3981_v24 }
 0x950   :  { %4034 = vmatpush.msra.mxu2 %v3980_v26  ;;  %4054 = vmatpush.msrb.mxu3 %v3981_v24 }
 0x951   :  { %3995 = vmatpush.msrb.mxu0 %v3978_v5  ;;  %4015 = vmatpush.msrb.mxu1 %v3979_v28 }
 0x952   :  { %4035 = vmatpush.msra.mxu2 %v3978_v5  ;;  %4055 = vmatpush.msrb.mxu3 %v3979_v28 }
 0x9c2   :  { %v3729_v55 = vpop.f32.mrf.mxu0  ;;  %v3742_v29 = vpop.f32.mrf.mxu1 }
 0x9c3   :  { %v3743_v30 = vadd.f32 %v3742_v29, %v3729_v55  ;;  %v3931_v55 = vmul.f32 8.0, %v10302_v27  ;;  %v3976_v29 = vld [vmem:[%s11025_s22 + $0x90] sm:$0xff] }
 0x9c4   :  { %3996 = vmatpush.msrb.mxu0 %v3976_v29  ;;  %4036 = vmatpush.msra.mxu2 %v3976_v29  ;;  %v7453_v29 = vld [vmem:[%s11029_s26 + $0x22c] sm:$0xf] }
 0x9c5   :  { %v3772_v11 = vadd.f32 %v3743_v30, %v10170_v50  ;;  %v3977_v30 = vld [vmem:[%s11025_s22 + $0x98] sm:$0xff] }
 0x9c6   :  { %4016 = vmatpush.msrb.mxu1 %v3977_v30  ;;  %4056 = vmatpush.msrb.mxu3 %v3977_v30 }
 0x9c7   :  { %v3780_v37 = vadd.f32 %v3776_v32, %v3772_v11  ;;  %v3974_v32 = vld [vmem:[%s11025_s22 + $0x80] sm:$0xff]  ;;  %v3975_v11 = vld [vmem:[%s11025_s22 + $0x88] sm:$0xff] }
 0x9c8   :  { %3997 = vmatpush.msrb.mxu0 %v3974_v32  ;;  %4017 = vmatpush.msrb.mxu1 %v3975_v11 }
 0x9c9   :  { %vm3782_vm12 = vcmp.ge.f32.partialorder %v3780_v37, 0.0  ;;  %v3784_v18 = vmul.f32 0.2, %v3780_v37  ;;  %v3755_v34 = vpop.f32.mrf.mxu2  ;;  %v3768_v31 = vpop.f32.mrf.mxu3  ;;  %4037 = vmatpush.msra.mxu2 %v3974_v32  ;;  %4057 = vmatpush.msrb.mxu3 %v3975_v11  ;;  %v6849_v32 = vld [vmem:[%s11029_s26 + $0x2e8] sm:$0xf] }
 0x9ca   :  { %v3769_v36 = vadd.f32 %v3768_v31, %v3755_v34  ;;  %v3731_v39 = vpop.f32.mrf.mxu0  ;;  %v3744_v41 = vpop.f32.mrf.mxu1  ;;  %v3973_v34 = vld [vmem:[%s11025_s22 + $0x78] sm:$0xff]  ;;  %v3970_v31 = vld [vmem:[%s11025_s22 + $0x60] sm:$0xff]  ;;  %v7478_v11 = vld [vmem:[%s11029_s26 + $0x2f0] sm:$0xf0] }
 0x9cb   :  { %v10257_v42 = vsel %vm3782_vm12, %v3780_v37, %v3784_v18  ;;  %v3932_v37 = vsub.f32 1.0, %v3931_v55  ;;  %v3972_v18 = vld [vmem:[%s11025_s22 + $0x70] sm:$0xff]  ;;  %4018 = vmatpush.msrb.mxu1 %v3973_v34  ;;  %4058 = vmatpush.msrb.mxu3 %v3973_v34  ;;  %v3969_v41 = vld [vmem:[%s11025_s22 + $0x58] sm:$0xff] }
 0x9cc   :  { %v3788_v45 = vsel %vm2937_vm0, %v10257_v42, 0.0  ;;  %v3874_v3 = vmul.f32 %v10257_v42, %v10257_v42  ;;  %v3773_v12 = vadd.f32 %v3769_v36, %v10168_v46  ;;  %3998 = vmatpush.msrb.mxu0 %v3972_v18  ;;  %v3971_v36 = vld [vmem:[%s11025_s22 + $0x68] sm:$0xff]  ;;  %4038 = vmatpush.msra.mxu2 %v3972_v18  ;;  %v3968_v39 = vld [vmem:[%s11025_s22 + $0x50] sm:$0xff] }
 0x9cd   :  { %v3789_v47 = vrot.slane %v3788_v45, 4  ;;  %4019 = vmatpush.msrb.mxu1 %v3971_v36  ;;  %4059 = vmatpush.msrb.mxu3 %v3971_v36  ;;  %v7454_v55 = vld [vmem:[%s11029_s26 + $0x230] sm:$0xf0]  ;;  %v6741_v36 = vld [vmem:[%s11029_s26 + $0x210] sm:$0xf] }
 0x9ce   :  { %v3876_v48 = vsel %vm2937_vm0, %v3874_v3, 0.0  ;;  %v3781_v40 = vadd.f32 %v3777_v38, %v3773_v12  ;;  %3999 = vmatpush.msrb.mxu0 %v3970_v31  ;;  %v3933_v38 = vmul.f32 %v10302_v27, %v3932_v37  ;;  %4039 = vmatpush.msra.mxu2 %v3970_v31  ;;  %v3967_v3 = vld [vmem:[%s11025_s22 + $0x48] sm:$0xff]  ;;  %v6851_v31 = vld [vmem:[%s11029_s26 + $0x2f4] sm:$0xf0] }
 0x9cf   :  { %v3790_v33 = vadd.f32 %v3789_v47, %v3788_v45  ;;  %v3877_v57 = vrot.slane %v3876_v48, 4  ;;  %4020 = vmatpush.msrb.mxu1 %v3969_v41  ;;  %v3966_v45 = vld [vmem:[%s11025_s22 + $0x40] sm:$0xff]  ;;  %4060 = vmatpush.msrb.mxu3 %v3969_v41  ;;  %v7477_v37 = vld [vmem:[%s11029_s26 + $0x2ec] sm:$0xf] }
 0x9d0   :  { %vm3783_vm13 = vcmp.ge.f32.partialorder %v3781_v40, 0.0  ;;  %v3785_v19 = vmul.f32 0.2, %v3781_v40  ;;  %4000 = vmatpush.msrb.mxu0 %v3968_v39  ;;  %4040 = vmatpush.msra.mxu2 %v3968_v39  ;;  %v3934_v47 = vadd.f32 %v10302_v27, %v3933_v38  ;;  %v7451_v38 = vld [vmem:[%s11029_s26 + $0x218] sm:$0xf0] }
 0x9d1   :  { %v3791_v35 = vrot.slane %v3790_v33, 2  ;;  %v3878_v50 = vadd.f32 %v3877_v57, %v3876_v48  ;;  %v3757_v53 = vpop.f32.mrf.mxu2  ;;  %v3770_v54 = vpop.f32.mrf.mxu3  ;;  %4021 = vmatpush.msrb.mxu1 %v3967_v3  ;;  %v3964_v48 = vld [vmem:[%s11025_s22 + $0x30] sm:$0xff]  ;;  %4061 = vmatpush.msrb.mxu3 %v3967_v3  ;;  %v3962_v57 = vld [vmem:[%s11025_s22 + $0x20] sm:$0xff] }
 0x9d2   :  { %v10265_v56 = vsel %vm3783_vm13, %v3781_v40, %v3785_v19  ;;  %4001 = vmatpush.msrb.mxu0 %v3966_v45  ;;  %v3965_v40 = vld [vmem:[%s11025_s22 + $0x38] sm:$0xff]  ;;  %4041 = vmatpush.msra.mxu2 %v3966_v45  ;;  %v3963_v19 = vld [vmem:[%s11025_s22 + $0x28] sm:$0xff]  ;;  %v3936_v54 = vsel %vm3935_vm14, %v10302_v27, %v3934_v47  ;;  %v7450_v45 = vld [vmem:[%s11029_s26 + $0x214] sm:$0xf] }
 0x9d3   :  { %v3795_v58 = vsel %vm2937_vm0, %v10265_v56, 0.0  ;;  %v3875_v46 = vmul.f32 %v10265_v56, %v10265_v56  ;;  %v3792_v59 = vadd.f32 %v3791_v35, %v3790_v33  ;;  %v3879_v60 = vrot.slane %v3878_v50, 2  ;;  %4022 = vmatpush.msrb.mxu1 %v3965_v40  ;;  %v3960_v35 = vld [vmem:[%s11025_s22 + $0x10] sm:$0xff]  ;;  %4062 = vmatpush.msrb.mxu3 %v3965_v40  ;;  %v3961_v53 = vld [vmem:[%s11025_s22 + $0x18] sm:$0xff]  ;;  %v6753_v27 = vld [vmem:[%s11029_s26 + $0x228] sm:$0xf] }
 0x9d4   :  { %v3796_v61 = vrot.slane %v3795_v58, 4  ;;  %4002 = vmatpush.msrb.mxu0 %v3964_v48  ;;  %4042 = vmatpush.msra.mxu2 %v3964_v48  ;;  %v6754_v18 = vor.u32 %v7454_v55, %v6753_v27  ;;  %v6743_v3 = vld [vmem:[%s11029_s26 + $0x21c] sm:$0xf0]  ;;  %v6850_v48 = vor.u32 %v7478_v11, %v6849_v32  ;;  %v6854_v40 = vor.u32 %v7477_v37, %v6851_v31  ;;  %v7465_v27 = vld [vmem:[%s11029_s26 + $0x28c] sm:$0xf] }
 0x9d5   :  { %v3883_v62 = vsel %vm2937_vm0, %v3875_v46, 0.0  ;;  %v3793_v51 = vrot.slane %v3792_v59, 1  ;;  %v3880_v52 = vadd.f32 %v3879_v60, %v3878_v50  ;;  %4023 = vmatpush.msrb.mxu1 %v3963_v19  ;;  %v3959_v46 = vld [vmem:[%s11025_s22 + $0x8] sm:$0xff]  ;;  %4063 = vmatpush.msrb.mxu3 %v3963_v19  ;;  %v6600_v47 = vld [vmem:[%s11028_s25 + $0x1] sm:$0x1]  ;;  %v6742_v19 = vor.u32 %v7451_v38, %v6741_v36 }
 0x9d6   :  { %v3797_v43 = vadd.f32 %v3796_v61, %v3795_v58  ;;  %v3884_v63 = vrot.slane %v3883_v62, 4  ;;  %4003 = vmatpush.msrb.mxu0 %v3962_v57  ;;  %v3958_v58 = vld [vmem:[%s11025_s22] sm:$0xff]  ;;  %4043 = vmatpush.msra.mxu2 %v3962_v57  ;;  %v7475_v57 = vld [vmem:[%s11029_s26 + $0x2d8] sm:$0xf0]  ;;  %v6789_v32 = vld [vmem:[%s11029_s26 + $0x270] sm:$0xf] }
 0x9d7   :  { %v3794_v0 = vadd.f32 %v3793_v51, %v3792_v59  ;;  %v3881_v1 = vrot.slane %v3880_v52, 1  ;;  %4024 = vmatpush.msrb.mxu1 %v3961_v53  ;;  %4064 = vmatpush.msrb.mxu3 %v3961_v53  ;;  %v6839_v53 = vld [vmem:[%s11029_s26 + $0x2dc] sm:$0xf0]  ;;  %v7439_v55 = vld [vmem:[%s11029_s26 + $0x1b8] sm:$0xf0] }
 0x9d8   :  { %v3798_v2 = vrot.slane %v3797_v43, 2  ;;  %v3885_v4 = vadd.f32 %v3884_v63, %v3883_v62  ;;  %4004 = vmatpush.msrb.mxu0 %v3960_v35  ;;  %4044 = vmatpush.msra.mxu2 %v3960_v35  ;;  %v6746_v35 = vor.u32 %v7450_v45, %v6743_v3  ;;  %v7463_v11 = vld [vmem:[%s11029_s26 + $0x278] sm:$0xf0]  ;;  %v6791_v31 = vld [vmem:[%s11029_s26 + $0x27c] sm:$0xf0] }
 0x9d9   :  { %3850 = vmatmul.f32.vlgmr.msra.gmra.mxu0 %v3794_v0  ;;  %v3882_v6 = vadd.f32 %v3881_v1, %v3880_v52  ;;  %4025 = vmatpush.msrb.mxu1 %v3959_v46  ;;  %v6681_v36 = vld [vmem:[%s11029_s26 + $0x198] sm:$0xf]  ;;  %v7436_v38 = vld [vmem:[%s11029_s26 + $0x1a0] sm:$0xf0]  ;;  %v6790_v45 = vor.u32 %v7463_v11, %v6789_v32 }
 0x9da   :  { %v3799_v7 = vadd.f32 %v3798_v2, %v3797_v43  ;;  %v3886_v8 = vrot.slane %v3885_v4, 2  ;;  %4005 = vmatpush.msrb.mxu0 %v3958_v58  ;;  %4045 = vmatpush.msra.mxu2 %v3958_v58  ;;  %v7448_v58 = vld [vmem:[%s11029_s26 + $0x200] sm:$0xf0]  ;;  %v7017_v32 = vld [vmem:[%s11029_s26 + $0x138] sm:$0xf] }
 0x9db   :  { %3906 = vmatmul.f32.vlgmr.msrb.gmra.mxu2 %v3882_v6  ;;  %4065 = vmatpush.msrb.mxu3 %v3959_v46  ;;  %v7447_v46 = vld [vmem:[%s11029_s26 + $0x1fc] sm:$0xf]  ;;  %v7424_v11 = vld [vmem:[%s11029_s26 + $0x140] sm:$0xf0] }
 0x9dc   :  { %v3800_v44 = vrot.slane %v3799_v7, 1  ;;  %v3887_v9 = vadd.f32 %v3886_v8, %v3885_v4 }
 0x9de   :  { %v3801_v49 = vadd.f32 %v3800_v44, %v3799_v7  ;;  %v3888_v10 = vrot.slane %v3887_v9, 1  ;;  %v3942_v44 = vld [vmem:[%s11026_s23] sm:$0x1] }
 0x9e0   :  { %3870 = vmatmul.f32.vlgmr.msra.gmra.mxu1 %v3801_v49  ;;  %v3889_v13 = vadd.f32 %v3888_v10, %v3887_v9  ;;  %v3955_v10 = vld [vmem:[%s11027_s24] sm:$0x1]  ;;  %s4981_s24 = sshll.u32 %s11031_s28, 4  ;;  %s4982_s24 = int_to_ptr.hbm [resolvable:$true] %s4981_s24 }
 0x9e2   :  { %3926 = vmatmul.f32.vlgmr.msra.gmra.mxu3 %v3889_v13 }
 0xa56   :  { %v3851_v33 = vpop.f32.mrf.mxu0 }
 0xa5d   :  { %v3871_v12 = vpop.f32.mrf.mxu1 }
 0xa5e   :  { %v3872_v50 = vadd.f32 %v3871_v12, %v3851_v33  ;;  %v3907_v60 = vpop.f32.mrf.mxu2  ;;  %v4080_v12 = vld [vmem:[%s11028_s25] sm:$0x1]  ;;  %v6837_v33 = vld [vmem:[%s11029_s26 + $0x2d0] sm:$0xf] }
 0xa60   :  { %v3937_v59 = vmul.f32 %v3936_v54, %v3872_v50  ;;  %v7474_v50 = vld [vmem:[%s11029_s26 + $0x2d4] sm:$0xf] }
 0xa62   :  { %v3939_v51 = vmul.f32 %v3937_v59, %v3937_v59 }
 0xa65   :  { %v3927_v61 = vpop.f32.mrf.mxu3 }
 0xa66   :  { %v3928_v62 = vadd.f32 %v3927_v61, %v3907_v60  ;;  %v6838_v60 = vor.u32 %v7475_v57, %v6837_v33  ;;  %v6842_v61 = vor.u32 %v7474_v50, %v6839_v53  ;;  %v6779_v57 = vld [vmem:[%s11029_s26 + $0x264] sm:$0xf0]  ;;  %v7432_v50 = vld [vmem:[%s11029_s26 + $0x184] sm:$0xf]  ;;  %v6671_v53 = vld [vmem:[%s11029_s26 + $0x18c] sm:$0xf0] }
 0xa68   :  { %v3938_v52 = vmul.f32 %v3936_v54, %v3928_v62  ;;  %v6729_v54 = vld [vmem:[%s11029_s26 + $0x1f8] sm:$0xf] }
 0xa69   :  { %v6825_v62 = vld [vmem:[%s11029_s26 + $0x2b8] sm:$0xf] }
 0xa6a   :  { %v3940_v43 = vsub.f32 %v3938_v52, %v3939_v51  ;;  %v7472_v51 = vld [vmem:[%s11029_s26 + $0x2c0] sm:$0xf0]  ;;  %v6730_v52 = vor.u32 %v7448_v58, %v6729_v54  ;;  %v6761_v54 = vld [vmem:[%s11029_s26 + $0x230] sm:$0xf]  ;;  %v7455_v58 = vld [vmem:[%s11029_s26 + $0x238] sm:$0xf0] }
 0xa6c   :  { %v3941_v63 = vmax.f32 %v3940_v43, 0.0 }
 0xa6e   :  { %v3943_v0 = vadd.f32 0.8, %v3941_v63  ;;  %v7471_v63 = vld [vmem:[%s11029_s26 + $0x2bc] sm:$0xf] }
 0xa70   :  { %7494 = vrsqrt.f32 %v3943_v0  ;;  %vm3950_vm1 = vweird.f32 %v3943_v0 }
 0xa76   :  { %v7495_v1 = vpop.eup %7494 }
 0xa77   :  { %v3945_v2 = vmul.f32 %v7495_v1, %v3943_v0  ;;  %vm3951_vm15 = vweird.f32 %v7495_v1  ;;  %v6827_v0 = vld [vmem:[%s11029_s26 + $0x2c4] sm:$0xf0] }
 0xa78   :  { %vm3952_vm2 = vmor %vm3950_vm1, %vm3951_vm15 }
 0xa79   :  { %v3946_v4 = vmul.f32 %v7495_v1, %v3945_v2  ;;  %v7445_v2 = vld [vmem:[%s11029_s26 + $0x1e8] sm:$0xf0] }
 0xa7b   :  { %v3947_v6 = vmul.f32 0.5, %v3946_v4  ;;  %v7444_v4 = vld [vmem:[%s11029_s26 + $0x1e4] sm:$0xf] }
 0xa7d   :  { %v3948_v7 = vsub.f32 1.5, %v3947_v6  ;;  %v6719_v6 = vld [vmem:[%s11029_s26 + $0x1ec] sm:$0xf0] }
 0xa7f   :  { %v3949_v8 = vmul.f32 %v7495_v1, %v3948_v7  ;;  %v6826_v7 = vor.u32 %v7472_v51, %v6825_v62  ;;  %v6765_v62 = vld [vmem:[%s11029_s26 + $0x240] sm:$0xf]  ;;  %v7457_v51 = vld [vmem:[%s11029_s26 + $0x248] sm:$0xf0] }
 0xa81   :  { %v3953_v9 = vsel %vm3952_vm2, %v7495_v1, %v3949_v8  ;;  %v6717_v1 = vld [vmem:[%s11029_s26 + $0x1e0] sm:$0xf]  ;;  %v6830_v8 = vor.u32 %v7471_v63, %v6827_v0  ;;  %v6674_v63 = vor.u32 %v7432_v50, %v6671_v53  ;;  %v6767_v0 = vld [vmem:[%s11029_s26 + $0x24c] sm:$0xf0]  ;;  %v7467_v53 = vld [vmem:[%s11029_s26 + $0x298] sm:$0xf0] }
 0xa82   :  { %v3954_v49 = vmul.f32 %v3953_v9, %v3942_v44  ;;  %v6813_v44 = vld [vmem:[%s11029_s26 + $0x2a0] sm:$0xf]  ;;  %v7469_v9 = vld [vmem:[%s11029_s26 + $0x2a8] sm:$0xf0]  ;;  %v6809_v50 = vld [vmem:[%s11029_s26 + $0x290] sm:$0xf] }
 0xa84   :  { %4006 = vmatmul.f32.vlgmr.msrb.gmra.mxu0 %v3954_v49  ;;  %4026 = vmatmul.f32.vlgmr.msrb.gmra.mxu1 %v3954_v49  ;;  %v3956_v13 = vmul.f32 %v3954_v49, %v3937_v59  ;;  %v6731_v59 = vld [vmem:[%s11029_s26 + $0x204] sm:$0xf0]  ;;  %v6718_v49 = vor.u32 %v7445_v2, %v6717_v1  ;;  %v6857_v1 = vld [vmem:[%s11029_s26 + $0x2f0] sm:$0xf]  ;;  %v7479_v2 = vld [vmem:[%s11029_s26 + $0x2f8] sm:$0xf0] }
 0xa85   :  { %v6734_v43 = vor.u32 %v7447_v46, %v6731_v59  ;;  %v6945_v46 = vld [vmem:[%s11029_s26 + $0xa8] sm:$0xf]  ;;  %v7406_v59 = vld [vmem:[%s11029_s26 + $0xb0] sm:$0xf0] }
 0xa86   :  { %v3957_v14 = vsub.f32 %v3955_v10, %v3956_v13  ;;  %v6722_v10 = vor.u32 %v7444_v4, %v6719_v6  ;;  %v7468_v13 = vld [vmem:[%s11029_s26 + $0x2a4] sm:$0xf]  ;;  %v6762_v4 = vor.u32 %v7455_v58, %v6761_v54  ;;  %v6946_v6 = vor.u32 %v7406_v59, %v6945_v46  ;;  %v6993_v46 = vld [vmem:[%s11029_s26 + $0x108] sm:$0xf]  ;;  %v7418_v59 = vld [vmem:[%s11029_s26 + $0x110] sm:$0xf0] }
 0xa88   :  { %4046 = vmatmul.f32.vlgmr.msra.gmra.mxu2 %v3957_v14  ;;  %4066 = vmatmul.f32.vlgmr.msrb.gmra.mxu3 %v3957_v14  ;;  %v6815_v14 = vld [vmem:[%s11029_s26 + $0x2ac] sm:$0xf0] }
 0xb01   :  { %v4007_v16 = vpop.f32.mrf.mxu0  ;;  %v4027_v15 = vpop.f32.mrf.mxu1 }
 0xb02   :  { %v4070_v20 = vperm.slane %v4007_v16, 0  ;;  %v4071_v21 = vperm.slane %v4027_v15, 0  ;;  %v6705_v16 = vld [vmem:[%s11029_s26 + $0x1c8] sm:$0xf]  ;;  %v7442_v15 = vld [vmem:[%s11029_s26 + $0x1d0] sm:$0xf0] }
 0xb04   :  { %v4072_v17 = vmul.f32 %v4070_v20, %v10257_v42  ;;  %v4073_v25 = vmul.f32 %v4071_v21, %v10265_v56  ;;  %v6755_v42 = vld [vmem:[%s11029_s26 + $0x234] sm:$0xf0]  ;;  %v7441_v20 = vld [vmem:[%s11029_s26 + $0x1cc] sm:$0xf] }
 0xb05   :  { %v6758_v34 = vor.u32 %v7453_v29, %v6755_v42  ;;  %v6707_v21 = vld [vmem:[%s11029_s26 + $0x1d4] sm:$0xf0]  ;;  %v7438_v29 = vld [vmem:[%s11029_s26 + $0x1b4] sm:$0xf]  ;;  %v6695_v42 = vld [vmem:[%s11029_s26 + $0x1bc] sm:$0xf0] }
 0xb0b   :  { %v4047_v22 = vpop.f32.mrf.mxu2  ;;  %v4067_v23 = vpop.f32.mrf.mxu3 }
 0xb0c   :  { %v4074_v26 = vperm.slane %v4047_v22, 0  ;;  %v4075_v24 = vperm.slane %v4067_v23, 0  ;;  %v6814_v22 = vor.u32 %v7469_v9, %v6813_v44  ;;  %v6818_v23 = vor.u32 %v7468_v13, %v6815_v14  ;;  %v6749_v44 = vld [vmem:[%s11029_s26 + $0x218] sm:$0xf]  ;;  %v7452_v9 = vld [vmem:[%s11029_s26 + $0x220] sm:$0xf0] }
 0xb0d   :  { %v6766_v13 = vor.u32 %v7457_v51, %v6765_v62  ;;  %v6885_v62 = vld [vmem:[%s11029_s26 + $0x30] sm:$0xf]  ;;  %v7391_v51 = vld [vmem:[%s11029_s26 + $0x38] sm:$0xf0] }
 0xb0e   :  { %v4076_v5 = vadd.f32 %v4074_v26, %v4072_v17  ;;  %v4077_v28 = vadd.f32 %v4075_v24, %v4073_v25  ;;  %v6801_v17 = vld [vmem:[%s11029_s26 + $0x288] sm:$0xf]  ;;  %v7466_v25 = vld [vmem:[%s11029_s26 + $0x290] sm:$0xf0]  ;;  %v6706_v26 = vor.u32 %v7442_v15, %v6705_v16  ;;  %v6710_v24 = vor.u32 %v7441_v20, %v6707_v21  ;;  %v6845_v20 = vld [vmem:[%s11029_s26 + $0x2d8] sm:$0xf] }
 0xb0f   :  { %v6858_v16 = vor.u32 %v7479_v2, %v6857_v1  ;;  %v7476_v21 = vld [vmem:[%s11029_s26 + $0x2e0] sm:$0xf0]  ;;  %v6886_v2 = vor.u32 %v7391_v51, %v6885_v62 }
 0xb10   :  { %v4078_v56 = vpack.c.bf16 %v4076_v5, %v4076_v5  ;;  %v4079_v30 = vpack.c.bf16 %v4077_v28, %v4077_v28  ;;  %v6803_v5 = vld [vmem:[%s11029_s26 + $0x294] sm:$0xf0]  ;;  %v6693_v28 = vld [vmem:[%s11029_s26 + $0x1b0] sm:$0xf] }
 0xb11   :  { %v6694_v37 = vor.u32 %v7439_v55, %v6693_v28  ;;  %v6846_v28 = vor.u32 %v7476_v21, %v6845_v20  ;;  %v6969_v20 = vld [vmem:[%s11029_s26 + $0xd8] sm:$0xf] }
 0xb12   :  { %v4087_v39 = vsel %vm4085_vm3, %v4078_v56, 0  ;;  %v4090_v41 = vsel %vm4085_vm3, %v4079_v30, 0  ;;  %v6802_v56 = vor.u32 %v7466_v25, %v6801_v17  ;;  %v6806_v30 = vor.u32 %v7465_v27, %v6803_v5  ;;  %v7029_v17 = vld [vmem:[%s11029_s26 + $0x150] sm:$0xf]  ;;  %v7427_v25 = vld [vmem:[%s11029_s26 + $0x158] sm:$0xf0] }
 0xb13   :  { %4099 = vmatpush.bf16.msra.mxu0 %v4087_v39  ;;  %4112 = vmatpush.bf16.msra.mxu1 %v4090_v41  ;;  %v6921_v27 = vld [vmem:[%s11029_s26 + $0x78] sm:$0xf]  ;;  %v7400_v5 = vld [vmem:[%s11029_s26 + $0x80] sm:$0xf0]  ;;  %v7030_v55 = vor.u32 %v7427_v25, %v7029_v17  ;;  %v6677_v17 = vld [vmem:[%s11029_s26 + $0x188] sm:$0xf] }
 0xb14   :  { %4196 = vmatpush.bf16.msrb.mxu2 %v4087_v39  ;;  %4209 = vmatpush.bf16.msra.mxu3 %v4090_v41  ;;  %v7435_v39 = vld [vmem:[%s11029_s26 + $0x19c] sm:$0xf]  ;;  %v6683_v41 = vld [vmem:[%s11029_s26 + $0x1a4] sm:$0xf0]  ;;  %v7434_v25 = vld [vmem:[%s11029_s26 + $0x190] sm:$0xf0] }
 0xb15   :  { %v6686_v33 = vor.u32 %v7435_v39, %v6683_v41  ;;  %v6821_v39 = vld [vmem:[%s11029_s26 + $0x2a8] sm:$0xf]  ;;  %v7470_v41 = vld [vmem:[%s11029_s26 + $0x2b0] sm:$0xf0] }
 0xb16   :  { %6598 = vmatmul.msk.bf16.vlgmr.msra.gmra.mxu0 %vm4081_vm4, %v4080_v12  ;;  %6599 = vmatmul.msk.bf16.vlgmr.msra.gmra.mxu1 %vm4081_vm4, %v4080_v12  ;;  %v6777_v12 = vld [vmem:[%s11029_s26 + $0x258] sm:$0xf] }
 0xb17   :  { %4538 = vmatpush.bf16.msrb.mxu0 %v6754_v18  ;;  %6601 = vmatmul.msk.bf16.vlgmr.msrb.gmra.mxu2 %vm4081_vm4, %v6600_v47  ;;  %v6698_v18 = vor.u32 %v7438_v29, %v6695_v42  ;;  %v6833_v29 = vld [vmem:[%s11029_s26 + $0x2c0] sm:$0xf]  ;;  %v7473_v42 = vld [vmem:[%s11029_s26 + $0x2c8] sm:$0xf0] }
 0xb18   :  { %4564 = vmatpush.bf16.msra.mxu2 %v6758_v34  ;;  %6602 = vmatmul.msk.bf16.vlgmr.msra.gmra.mxu3 %vm4081_vm4, %v6600_v47  ;;  %v7462_v34 = vld [vmem:[%s11029_s26 + $0x274] sm:$0xf]  ;;  %v7460_v47 = vld [vmem:[%s11029_s26 + $0x260] sm:$0xf0] }
 0xb19   :  { %4551 = vmatpush.bf16.msrb.mxu1 %v6850_v48  ;;  %4577 = vmatpush.bf16.msrb.mxu3 %v6854_v40  ;;  %v6794_v3 = vor.u32 %v7462_v34, %v6791_v31  ;;  %v7459_v48 = vld [vmem:[%s11029_s26 + $0x25c] sm:$0xf]  ;;  %v6682_v40 = vor.u32 %v7436_v38, %v6681_v36  ;;  %v6909_v34 = vld [vmem:[%s11029_s26 + $0x60] sm:$0xf]  ;;  %v7397_v31 = vld [vmem:[%s11029_s26 + $0x68] sm:$0xf0]  ;;  %v6834_v36 = vor.u32 %v7473_v42, %v6833_v29 }
 0xb1a   :  { %v7018_v38 = vor.u32 %v7424_v11, %v7017_v32  ;;  %v6957_v29 = vld [vmem:[%s11029_s26 + $0xc0] sm:$0xf]  ;;  %v7409_v42 = vld [vmem:[%s11029_s26 + $0xc8] sm:$0xf0] }
 0xb1b   :  { %4539 = vmatpush.bf16.msrb.mxu0 %v6742_v19  ;;  %v6669_v19 = vld [vmem:[%s11029_s26 + $0x180] sm:$0xf] }
 0xb1c   :  { %4565 = vmatpush.bf16.msra.mxu2 %v6746_v35  ;;  %v7433_v35 = vld [vmem:[%s11029_s26 + $0x188] sm:$0xf0] }
 0xb1d   :  { %4552 = vmatpush.bf16.msrb.mxu1 %v6838_v60  ;;  %4578 = vmatpush.bf16.msrb.mxu3 %v6842_v61  ;;  %v6778_v60 = vor.u32 %v7460_v47, %v6777_v12  ;;  %v6782_v61 = vor.u32 %v7459_v48, %v6779_v57  ;;  %v7005_v12 = vld [vmem:[%s11029_s26 + $0x120] sm:$0xf]  ;;  %v7421_v47 = vld [vmem:[%s11029_s26 + $0x128] sm:$0xf0]  ;;  %v6713_v48 = vld [vmem:[%s11029_s26 + $0x1d0] sm:$0xf] }
 0xb1e   :  { %v7394_v57 = vld [vmem:[%s11029_s26 + $0x50] sm:$0xf0] }
 0xb1f   :  { %4540 = vmatpush.bf16.msrb.mxu0 %v6730_v52  ;;  %v7456_v52 = vld [vmem:[%s11029_s26 + $0x244] sm:$0xf] }
 0xb20   :  { %4566 = vmatpush.bf16.msra.mxu2 %v6734_v43  ;;  %v6670_v43 = vor.u32 %v7433_v35, %v6669_v19  ;;  %v6770_v14 = vor.u32 %v7456_v52, %v6767_v0  ;;  %v6822_v19 = vor.u32 %v7470_v41, %v6821_v39  ;;  %v7006_v35 = vor.u32 %v7421_v47, %v7005_v12  ;;  %v7464_v0 = vld [vmem:[%s11029_s26 + $0x280] sm:$0xf0]  ;;  %v7049_v39 = vld [vmem:[%s11029_s26 + $0x170] sm:$0xf]  ;;  %v7431_v41 = vld [vmem:[%s11029_s26 + $0x178] sm:$0xf0] }
 0xb21   :  { %4553 = vmatpush.bf16.msrb.mxu1 %v6826_v7  ;;  %4579 = vmatpush.bf16.msrb.mxu3 %v6830_v8  ;;  %v7041_v7 = vld [vmem:[%s11029_s26 + $0x168] sm:$0xf]  ;;  %v7430_v8 = vld [vmem:[%s11029_s26 + $0x170] sm:$0xf0]  ;;  %v6810_v52 = vor.u32 %v7467_v53, %v6809_v50 }
 0xb22   :  { %v7042_v15 = vor.u32 %v7430_v8, %v7041_v7  ;;  %v6689_v7 = vld [vmem:[%s11029_s26 + $0x1a0] sm:$0xf]  ;;  %v7437_v8 = vld [vmem:[%s11029_s26 + $0x1a8] sm:$0xf0] }
 0xb23   :  { %4541 = vmatpush.bf16.msrb.mxu0 %v6718_v49  ;;  %v6933_v49 = vld [vmem:[%s11029_s26 + $0x90] sm:$0xf] }
 0xb24   :  { %4567 = vmatpush.bf16.msra.mxu2 %v6722_v10  ;;  %v7403_v10 = vld [vmem:[%s11029_s26 + $0x98] sm:$0xf0] }
 0xb25   :  { %4554 = vmatpush.bf16.msrb.mxu1 %v6814_v22  ;;  %4580 = vmatpush.bf16.msrb.mxu3 %v6818_v23  ;;  %v6750_v22 = vor.u32 %v7452_v9, %v6749_v44  ;;  %v6934_v23 = vor.u32 %v7403_v10, %v6933_v49  ;;  %v6873_v44 = vld [vmem:[%s11029_s26 + $0x18] sm:$0xf]  ;;  %v7388_v9 = vld [vmem:[%s11029_s26 + $0x20] sm:$0xf0] }
 0xb27   :  { %4542 = vmatpush.bf16.msrb.mxu0 %v6706_v26  ;;  %v6737_v26 = vld [vmem:[%s11029_s26 + $0x200] sm:$0xf] }
 0xb28   :  { %4568 = vmatpush.bf16.msra.mxu2 %v6710_v24  ;;  %v7449_v24 = vld [vmem:[%s11029_s26 + $0x208] sm:$0xf0] }
 0xb29   :  { %4555 = vmatpush.bf16.msrb.mxu1 %v6802_v56  ;;  %4581 = vmatpush.bf16.msrb.mxu3 %v6806_v30  ;;  %v6738_v56 = vor.u32 %v7449_v24, %v6737_v26  ;;  %v6922_v30 = vor.u32 %v7400_v5, %v6921_v27  ;;  %v6861_v26 = vld [vmem:[%s11029_s26] sm:$0xf]  ;;  %v6678_v24 = vor.u32 %v7434_v25, %v6677_v17  ;;  %v7385_v27 = vld [vmem:[%s11029_s26 + $0x8] sm:$0xf0]  ;;  %v7013_v17 = vld [vmem:[%s11029_s26 + $0x128] sm:$0xf] }
 0xb2a   :  { %v6862_v5 = vor.u32 %v7385_v27, %v6861_v26  ;;  %v7422_v25 = vld [vmem:[%s11029_s26 + $0x130] sm:$0xf0]  ;;  %v7393_v27 = vld [vmem:[%s11029_s26 + $0x4c] sm:$0xf] }
 0xb2b   :  { %4543 = vmatpush.bf16.msrb.mxu0 %v6694_v37  ;;  %v6725_v37 = vld [vmem:[%s11029_s26 + $0x1e8] sm:$0xf] }
 0xb2c   :  { %4569 = vmatpush.bf16.msra.mxu2 %v6698_v18  ;;  %v7446_v18 = vld [vmem:[%s11029_s26 + $0x1f0] sm:$0xf0] }
 0xb2d   :  { %4556 = vmatpush.bf16.msrb.mxu1 %v6790_v45  ;;  %4582 = vmatpush.bf16.msrb.mxu3 %v6794_v3  ;;  %v6726_v45 = vor.u32 %v7446_v18, %v6725_v37  ;;  %v6910_v3 = vor.u32 %v7397_v31, %v6909_v34  ;;  %v7405_v37 = vld [vmem:[%s11029_s26 + $0xac] sm:$0xf]  ;;  %v6947_v18 = vld [vmem:[%s11029_s26 + $0xb4] sm:$0xf0]  ;;  %v6953_v34 = vld [vmem:[%s11029_s26 + $0xb0] sm:$0xf] }
 0xb2e   :  { %v7407_v31 = vld [vmem:[%s11029_s26 + $0xb8] sm:$0xf0]  ;;  %v6950_v12 = vor.u32 %v7405_v37, %v6947_v18  ;;  %v6995_v37 = vld [vmem:[%s11029_s26 + $0x114] sm:$0xf0]  ;;  %v7001_v18 = vld [vmem:[%s11029_s26 + $0x110] sm:$0xf] }
 0xb2f   :  { %4544 = vmatpush.bf16.msrb.mxu0 %v6682_v40  ;;  %v7443_v40 = vld [vmem:[%s11029_s26 + $0x1d8] sm:$0xf0]  ;;  %v6954_v47 = vor.u32 %v7407_v31, %v6953_v34 }
 0xb30   :  { %4570 = vmatpush.bf16.msra.mxu2 %v6686_v33  ;;  %v6897_v33 = vld [vmem:[%s11029_s26 + $0x48] sm:$0xf]  ;;  %v6714_v54 = vor.u32 %v7443_v40, %v6713_v48  ;;  %v7402_v48 = vld [vmem:[%s11029_s26 + $0x94] sm:$0xf]  ;;  %v7419_v34 = vld [vmem:[%s11029_s26 + $0x118] sm:$0xf0] }
 0xb31   :  { %4557 = vmatpush.bf16.msrb.mxu1 %v6778_v60  ;;  %4583 = vmatpush.bf16.msrb.mxu3 %v6782_v61  ;;  %v6898_v58 = vor.u32 %v7394_v57, %v6897_v33  ;;  %v6701_v60 = vld [vmem:[%s11029_s26 + $0x1b8] sm:$0xf]  ;;  %v7440_v61 = vld [vmem:[%s11029_s26 + $0x1c0] sm:$0xf0]  ;;  %v6935_v57 = vld [vmem:[%s11029_s26 + $0x9c] sm:$0xf0] }
 0xb32   :  { %v6702_v1 = vor.u32 %v7440_v61, %v6701_v60  ;;  %v7037_v60 = vld [vmem:[%s11029_s26 + $0x158] sm:$0xf]  ;;  %v7428_v61 = vld [vmem:[%s11029_s26 + $0x160] sm:$0xf0]  ;;  %v6938_v62 = vor.u32 %v7402_v48, %v6935_v57 }
 0xb33   :  { %4545 = vmatpush.bf16.msrb.mxu0 %v6670_v43  ;;  %v6994_v43 = vor.u32 %v7418_v59, %v6993_v46  ;;  %v7426_v46 = vld [vmem:[%s11029_s26 + $0x154] sm:$0xf]  ;;  %v7031_v59 = vld [vmem:[%s11029_s26 + $0x15c] sm:$0xf0]  ;;  %v6989_v48 = vld [vmem:[%s11029_s26 + $0xf8] sm:$0xf] }
 0xb34   :  { %4571 = vmatpush.bf16.msra.mxu2 %v6674_v63  ;;  %v6797_v63 = vld [vmem:[%s11029_s26 + $0x278] sm:$0xf]  ;;  %v7416_v57 = vld [vmem:[%s11029_s26 + $0x100] sm:$0xf0] }
 0xb35   :  { %4558 = vmatpush.bf16.msrb.mxu1 %v6766_v13  ;;  %4584 = vmatpush.bf16.msrb.mxu3 %v6770_v14  ;;  %v6798_v49 = vor.u32 %v7464_v0, %v6797_v63  ;;  %v6690_v13 = vor.u32 %v7437_v8, %v6689_v7  ;;  %v6874_v14 = vor.u32 %v7388_v9, %v6873_v44  ;;  %v6929_v63 = vld [vmem:[%s11029_s26 + $0x80] sm:$0xf]  ;;  %v7401_v0 = vld [vmem:[%s11029_s26 + $0x88] sm:$0xf0] }
 0xb36   :  { %v7025_v7 = vld [vmem:[%s11029_s26 + $0x140] sm:$0xf]  ;;  %v7425_v8 = vld [vmem:[%s11029_s26 + $0x148] sm:$0xf0]  ;;  %v6930_v9 = vor.u32 %v7401_v0, %v6929_v63  ;;  %v6869_v63 = vld [vmem:[%s11029_s26 + $0x8] sm:$0xf] }
 0xb37   :  { %4590 = vmatpush.bf16.msra.mxu0 %v6762_v4  ;;  %v6981_v4 = vld [vmem:[%s11029_s26 + $0xf0] sm:$0xf]  ;;  %v7386_v0 = vld [vmem:[%s11029_s26 + $0x10] sm:$0xf0] }
 0xb38   :  { %4872 = vmatpush.bf16.msrb.mxu2 %v6946_v6  ;;  %v7415_v6 = vld [vmem:[%s11029_s26 + $0xf8] sm:$0xf0] }
 0xb39   :  { %4603 = vmatpush.bf16.msra.mxu1 %v6858_v16  ;;  %4885 = vmatpush.bf16.msra.mxu3 %v7042_v15  ;;  %v6982_v10 = vor.u32 %v7415_v6, %v6981_v4  ;;  %v6785_v16 = vld [vmem:[%s11029_s26 + $0x260] sm:$0xf]  ;;  %v7461_v15 = vld [vmem:[%s11029_s26 + $0x268] sm:$0xf0]  ;;  %v7423_v4 = vld [vmem:[%s11029_s26 + $0x13c] sm:$0xf] }
 0xb3a   :  { %v6786_v21 = vor.u32 %v7461_v15, %v6785_v16  ;;  %v7019_v6 = vld [vmem:[%s11029_s26 + $0x144] sm:$0xf0]  ;;  %v7398_v15 = vld [vmem:[%s11029_s26 + $0x70] sm:$0xf0] }
 0xb3b   :  { %4591 = vmatpush.bf16.msra.mxu0 %v6750_v22  ;;  %v7412_v22 = vld [vmem:[%s11029_s26 + $0xe0] sm:$0xf0]  ;;  %v6917_v16 = vld [vmem:[%s11029_s26 + $0x68] sm:$0xf] }
 0xb3c   :  { %4873 = vmatpush.bf16.msrb.mxu2 %v6934_v23  ;;  %v6970_v23 = vor.u32 %v7412_v22, %v6969_v20  ;;  %v7022_v20 = vor.u32 %v7423_v4, %v7019_v6  ;;  %v7420_v22 = vld [vmem:[%s11029_s26 + $0x124] sm:$0xf]  ;;  %v6959_v6 = vld [vmem:[%s11029_s26 + $0xcc] sm:$0xf0] }
 0xb3d   :  { %4604 = vmatpush.bf16.msra.mxu1 %v6846_v28  ;;  %4886 = vmatpush.bf16.msra.mxu3 %v7030_v55  ;;  %v6773_v28 = vld [vmem:[%s11029_s26 + $0x248] sm:$0xf]  ;;  %v7458_v55 = vld [vmem:[%s11029_s26 + $0x250] sm:$0xf0]  ;;  %v7408_v4 = vld [vmem:[%s11029_s26 + $0xc4] sm:$0xf] }
 0xb3f   :  { %4592 = vmatpush.bf16.msra.mxu0 %v6738_v56  ;;  %v6774_v56 = vor.u32 %v7458_v55, %v6773_v28  ;;  %v6905_v28 = vld [vmem:[%s11029_s26 + $0x50] sm:$0xf]  ;;  %v7395_v55 = vld [vmem:[%s11029_s26 + $0x58] sm:$0xf0] }
 0xb40   :  { %4874 = vmatpush.bf16.msrb.mxu2 %v6922_v30  ;;  %v6958_v30 = vor.u32 %v7409_v42, %v6957_v29  ;;  %v7014_v42 = vor.u32 %v7422_v25, %v7013_v17 }
 0xb41   :  { %4605 = vmatpush.bf16.msra.mxu1 %v6834_v36  ;;  %4887 = vmatpush.bf16.msra.mxu3 %v7018_v38  ;;  %v7429_v36 = vld [vmem:[%s11029_s26 + $0x16c] sm:$0xf]  ;;  %v7043_v38 = vld [vmem:[%s11029_s26 + $0x174] sm:$0xf0] }
 0xb43   :  { %4593 = vmatpush.bf16.msra.mxu0 %v6726_v45 }
 0xb44   :  { %4875 = vmatpush.bf16.msrb.mxu2 %v6910_v3 }
 0xb45   :  { %4606 = vmatpush.bf16.msra.mxu1 %v6822_v19  ;;  %4888 = vmatpush.bf16.msra.mxu3 %v7006_v35  ;;  %v6941_v19 = vld [vmem:[%s11029_s26 + $0x98] sm:$0xf]  ;;  %v7404_v35 = vld [vmem:[%s11029_s26 + $0xa0] sm:$0xf0] }
 0xb46   :  { %v6942_v51 = vor.u32 %v7404_v35, %v6941_v19 }
 0xb47   :  { %4594 = vmatpush.bf16.msra.mxu0 %v6714_v54  ;;  %v7046_v54 = vor.u32 %v7429_v36, %v7043_v38  ;;  %v6906_v36 = vor.u32 %v7395_v55, %v6905_v28 }
 0xb48   :  { %4876 = vmatpush.bf16.msrb.mxu2 %v6898_v58  ;;  %v7050_v58 = vor.u32 %v7431_v41, %v7049_v39  ;;  %v6887_v39 = vld [vmem:[%s11029_s26 + $0x3c] sm:$0xf0]  ;;  %v6893_v41 = vld [vmem:[%s11029_s26 + $0x38] sm:$0xf] }
 0xb49   :  { %4607 = vmatpush.bf16.msra.mxu1 %v6810_v52  ;;  %4889 = vmatpush.bf16.msra.mxu3 %v6994_v43  ;;  %v7399_v52 = vld [vmem:[%s11029_s26 + $0x7c] sm:$0xf]  ;;  %v6923_v43 = vld [vmem:[%s11029_s26 + $0x84] sm:$0xf0] }
 0xb4a   :  { %v6926_v44 = vor.u32 %v7399_v52, %v6923_v43  ;;  %v7384_v52 = vld [vmem:[%s11029_s26 + $0x4] sm:$0xf]  ;;  %v6863_v43 = vld [vmem:[%s11029_s26 + $0xc] sm:$0xf0] }
 0xb4b   :  { %4595 = vmatpush.bf16.msra.mxu0 %v6702_v1  ;;  %v7034_v1 = vor.u32 %v7426_v46, %v7031_v59  ;;  %v6990_v46 = vor.u32 %v7416_v57, %v6989_v48  ;;  %v6971_v59 = vld [vmem:[%s11029_s26 + $0xe4] sm:$0xf0] }
 0xb4c   :  { %4877 = vmatpush.bf16.msrb.mxu2 %v6886_v2  ;;  %v7038_v2 = vor.u32 %v7428_v61, %v7037_v60  ;;  %v6977_v60 = vld [vmem:[%s11029_s26 + $0xe0] sm:$0xf]  ;;  %v7413_v61 = vld [vmem:[%s11029_s26 + $0xe8] sm:$0xf0] }
 0xb4d   :  { %4608 = vmatpush.bf16.msra.mxu1 %v6798_v49  ;;  %4890 = vmatpush.bf16.msra.mxu3 %v6982_v10  ;;  %v7396_v49 = vld [vmem:[%s11029_s26 + $0x64] sm:$0xf] }
 0xb4f   :  { %4596 = vmatpush.bf16.msra.mxu0 %v6690_v13 }
 0xb50   :  { %4878 = vmatpush.bf16.msrb.mxu2 %v6874_v14  ;;  %v6911_v14 = vld [vmem:[%s11029_s26 + $0x6c] sm:$0xf0] }
 0xb51   :  { %4609 = vmatpush.bf16.msra.mxu1 %v6786_v21  ;;  %4891 = vmatpush.bf16.msra.mxu3 %v6970_v23  ;;  %v7026_v21 = vor.u32 %v7425_v8, %v7025_v7  ;;  %v7007_v23 = vld [vmem:[%s11029_s26 + $0x12c] sm:$0xf0]  ;;  %v6914_v26 = vor.u32 %v7396_v49, %v6911_v14  ;;  %v6965_v7 = vld [vmem:[%s11029_s26 + $0xc8] sm:$0xf]  ;;  %v7410_v8 = vld [vmem:[%s11029_s26 + $0xd0] sm:$0xf0]  ;;  %v6962_v49 = vor.u32 %v7408_v4, %v6959_v6 }
 0xb52   :  { %v7010_v29 = vor.u32 %v7420_v22, %v7007_v23 }
 0xb53   :  { %4597 = vmatpush.bf16.msra.mxu0 %v6678_v24  ;;  %v6918_v24 = vor.u32 %v7398_v15, %v6917_v16 }
 0xb54   :  { %4879 = vmatpush.bf16.msrb.mxu2 %v6862_v5  ;;  %v6899_v5 = vld [vmem:[%s11029_s26 + $0x54] sm:$0xf0] }
 0xb55   :  { %4610 = vmatpush.bf16.msra.mxu1 %v6774_v56  ;;  %4892 = vmatpush.bf16.msra.mxu3 %v6958_v30  ;;  %v7417_v56 = vld [vmem:[%s11029_s26 + $0x10c] sm:$0xf]  ;;  %v6902_v31 = vor.u32 %v7393_v27, %v6899_v5 }
 0xb93   :  { %v10779_v32 = vpop.f32.mrf.mxu0  ;;  %v10781_v11 = vpop.f32.mrf.mxu1 }
 0xb94   :  { %v10904_v30 = vpack.c.bf16 %v10779_v32, %v10779_v32  ;;  %v7390_v32 = vld [vmem:[%s11029_s26 + $0x34] sm:$0xf]  ;;  %v4119_v38 = vpack.c.bf16 %v10781_v11, %v10781_v11 }
 0xb95   :  { %v7414_v11 = vld [vmem:[%s11029_s26 + $0xf4] sm:$0xf]  ;;  %v6890_v19 = vor.u32 %v7390_v32, %v6887_v39 }
 0xb9a   :  { %v4198_v45 = vpop.f32.mrf.mxu2 }
 0xb9b   :  { %v4211_v3 = vpop.f32.mrf.mxu3  ;;  %v10810_v40 = vpack.c.bf16 %v4198_v45, %v4198_v45  ;;  %v4103_v50 = vpop.f32.mrf.mxu0  ;;  %v7392_v45 = vld [vmem:[%s11029_s26 + $0x40] sm:$0xf0] }
 0xb9c   :  { %v10812_v33 = vpack.c.bf16 %v4211_v3, %v4211_v3  ;;  %v4116_v53 = vpop.f32.mrf.mxu1  ;;  %v6998_v3 = vor.u32 %v7417_v56, %v6995_v37  ;;  %v6894_v35 = vor.u32 %v7392_v45, %v6893_v41  ;;  %v6875_v50 = vld [vmem:[%s11029_s26 + $0x24] sm:$0xf0]  ;;  %v4950_v56 = vld [vmem:[%s11030_s27] sm:$0x7]  ;;  %s7525_s27 = smov [#allocation2]  }
 0xb9d   :  { %4546 = vmatmul.bf16.vlgmr.msrb.gmra.mxu0 %v10810_v40  ;;  %4572 = vmatmul.bf16.vlgmr.msra.gmra.mxu2 %v10810_v40  ;;  %v6881_v53 = vld [vmem:[%s11029_s26 + $0x20] sm:$0xf]  ;;  %v4954_v45 = vperm.slane %v4950_v56, 2  ;;  %s4979_s1 = sshll.u32 %s7525_s27, 4  ;;  %s4980_s1 = int_to_ptr.vmem [resolvable:$true] %s4979_s1 }
 0xb9e   :  { %4898 = vmatpush.bf16.msrb.mxu0 %v6950_v12  ;;  %4924 = vmatpush.bf16.msra.mxu2 %v6954_v47  ;;  %v7002_v12 = vor.u32 %v7419_v34, %v7001_v18  ;;  %v6983_v47 = vld [vmem:[%s11029_s26 + $0xfc] sm:$0xf0]  ;;  %v4953_v34 = vperm.slane %v4950_v56, 1 }
 0xb9f   :  { %4559 = vmatmul.bf16.vlgmr.msrb.gmra.mxu1 %v10812_v33  ;;  %4585 = vmatmul.bf16.vlgmr.msrb.gmra.mxu3 %v10812_v33 }
 0xba0   :  { %4911 = vmatpush.bf16.msrb.mxu1 %v7046_v54  ;;  %4937 = vmatpush.bf16.msrb.mxu3 %v7050_v58  ;;  %v7389_v54 = vld [vmem:[%s11029_s26 + $0x28] sm:$0xf0]  ;;  %v6986_v58 = vor.u32 %v7414_v11, %v6983_v47 }
 0xba2   :  { %4899 = vmatpush.bf16.msrb.mxu0 %v6938_v62  ;;  %4925 = vmatpush.bf16.msra.mxu2 %v6942_v51  ;;  %v4200_v10 = vpop.f32.mrf.mxu2  ;;  %v6882_v51 = vor.u32 %v7389_v54, %v6881_v53 }
 0xba3   :  { %v4213_v13 = vpop.f32.mrf.mxu3  ;;  %v6966_v10 = vor.u32 %v7410_v8, %v6965_v7 }
 0xba4   :  { %4912 = vmatpush.bf16.msrb.mxu1 %v7034_v1  ;;  %4938 = vmatpush.bf16.msrb.mxu3 %v7038_v2  ;;  %v6978_v2 = vor.u32 %v7413_v61, %v6977_v60 }
 0xba6   :  { %4900 = vmatpush.bf16.msrb.mxu0 %v6926_v44  ;;  %4926 = vmatpush.bf16.msra.mxu2 %v6930_v9  ;;  %v6866_v44 = vor.u32 %v7384_v52, %v6863_v43  ;;  %v6870_v9 = vor.u32 %v7386_v0, %v6869_v63 }
 0xba8   :  { %4913 = vmatpush.bf16.msrb.mxu1 %v7022_v20  ;;  %4939 = vmatpush.bf16.msrb.mxu3 %v7026_v21 }
 0xbaa   :  { %4901 = vmatpush.bf16.msrb.mxu0 %v6914_v26  ;;  %4927 = vmatpush.bf16.msra.mxu2 %v6918_v24 }
 0xbac   :  { %4914 = vmatpush.bf16.msrb.mxu1 %v7010_v29  ;;  %4940 = vmatpush.bf16.msrb.mxu3 %v7014_v42 }
 0xbad   :  { %4598 = vmatmul.bf16.vlgmr.msra.gmra.mxu0 %v10810_v40  ;;  %4880 = vmatmul.bf16.vlgmr.msrb.gmra.mxu2 %v10904_v30  ;;  %v7387_v40 = vld [vmem:[%s11029_s26 + $0x1c] sm:$0xf] }
 0xbae   :  { %4902 = vmatpush.bf16.msrb.mxu0 %v6902_v31  ;;  %4928 = vmatpush.bf16.msra.mxu2 %v6906_v36  ;;  %v6878_v62 = vor.u32 %v7387_v40, %v6875_v50 }
 0xbaf   :  { %4611 = vmatmul.bf16.vlgmr.msra.gmra.mxu1 %v10812_v33  ;;  %4893 = vmatmul.bf16.vlgmr.msra.gmra.mxu3 %v4119_v38  ;;  %v7411_v33 = vld [vmem:[%s11029_s26 + $0xdc] sm:$0xf] }
 0xbb0   :  { %4915 = vmatpush.bf16.msrb.mxu1 %v6998_v3  ;;  %4941 = vmatpush.bf16.msrb.mxu3 %v7002_v12  ;;  %v6974_v1 = vor.u32 %v7411_v33, %v6971_v59  ;;  %v4952_v12 = vperm.slane %v4950_v56, 0 }
 0xbb2   :  { %4903 = vmatpush.bf16.msrb.mxu0 %v6890_v19  ;;  %4929 = vmatpush.bf16.msra.mxu2 %v6894_v35 }
 0xbb4   :  { %4916 = vmatpush.bf16.msrb.mxu1 %v6986_v58  ;;  %4942 = vmatpush.bf16.msrb.mxu3 %v6990_v46 }
 0xbb6   :  { %4904 = vmatpush.bf16.msrb.mxu0 %v6878_v62  ;;  %4930 = vmatpush.bf16.msra.mxu2 %v6882_v51 }
 0xbb8   :  { %4917 = vmatpush.bf16.msrb.mxu1 %v6974_v1  ;;  %4943 = vmatpush.bf16.msrb.mxu3 %v6978_v2 }
 0xbba   :  { %4905 = vmatpush.bf16.msrb.mxu0 %v6866_v44  ;;  %4931 = vmatpush.bf16.msra.mxu2 %v6870_v9 }
 0xbbc   :  { %4918 = vmatpush.bf16.msrb.mxu1 %v6962_v49  ;;  %4944 = vmatpush.bf16.msrb.mxu3 %v6966_v10 }
 0xbbd   :  { %4906 = vmatmul.bf16.vlgmr.msrb.gmra.mxu0 %v10904_v30  ;;  %4932 = vmatmul.bf16.vlgmr.msra.gmra.mxu2 %v10904_v30 }
 0xbbf   :  { %4919 = vmatmul.bf16.vlgmr.msrb.gmra.mxu1 %v4119_v38  ;;  %4945 = vmatmul.bf16.vlgmr.msrb.gmra.mxu3 %v4119_v38 }
 0xc1a   :  { %v4547_v13 = vpop.f32.mrf.mxu0 }
 0xc1c   :  { %v4560_v14 = vpop.f32.mrf.mxu1 }
 0xc1d   :  { %v4561_v37 = vadd.f32 %v4560_v14, %v4547_v13 }
 0xc20   :  { %v4573_v16 = vpop.f32.mrf.mxu2 }
 0xc22   :  { %v4549_v15 = vpop.f32.mrf.mxu0  ;;  %v4586_v20 = vpop.f32.mrf.mxu3 }
 0xc23   :  { %v4587_v55 = vadd.f32 %v4586_v20, %v4573_v16 }
 0xc24   :  { %v4562_v21 = vpop.f32.mrf.mxu1 }
 0xc28   :  { %v4575_v22 = vpop.f32.mrf.mxu2 }
 0xc2a   :  { %v4588_v23 = vpop.f32.mrf.mxu3  ;;  %v4599_v17 = vpop.f32.mrf.mxu0 }
 0xc2c   :  { %v4612_v25 = vpop.f32.mrf.mxu1 }
 0xc2d   :  { %v4613_v32 = vadd.f32 %v4612_v25, %v4599_v17 }
 0xc30   :  { %v4881_v26 = vpop.f32.mrf.mxu2 }
 0xc31   :  { %v4882_v36 = vadd.f32 %v4881_v26, %v4561_v37 }
 0xc32   :  { %v4601_v24 = vpop.f32.mrf.mxu0  ;;  %v4894_v27 = vpop.f32.mrf.mxu3 }
 0xc33   :  { %v4895_v3 = vadd.f32 %v4894_v27, %v4882_v36 }
 0xc34   :  { %v4614_v5 = vpop.f32.mrf.mxu1 }
 0xc35   :  { %v4958_v40 = vadd.f32 %v4952_v12, %v4895_v3 }
 0xc38   :  { %v4883_v28 = vpop.f32.mrf.mxu2 }
 0xc3a   :  { %v4896_v29 = vpop.f32.mrf.mxu3  ;;  %v4907_v42 = vpop.f32.mrf.mxu0 }
 0xc3b   :  { %v4908_v30 = vadd.f32 %v4907_v42, %v4587_v55 }
 0xc3c   :  { %v4920_v18 = vpop.f32.mrf.mxu1 }
 0xc3d   :  { %v4921_v31 = vadd.f32 %v4920_v18, %v4908_v30 }
 0xc3f   :  { %v4959_v38 = vadd.f32 %v4953_v34, %v4921_v31 }
 0xc40   :  { %v4933_v39 = vpop.f32.mrf.mxu2 }
 0xc41   :  { %v4934_v41 = vadd.f32 %v4933_v39, %v4613_v32  ;;  %v4964_v57 = vrot.slane %v4959_v38, 6 }
 0xc42   :  { %v4946_v11 = vpop.f32.mrf.mxu3  ;;  %v4909_v47 = vpop.f32.mrf.mxu0 }
 0xc43   :  { %v4947_v48 = vadd.f32 %v4946_v11, %v4934_v41  ;;  %v4966_v54 = vsel %vm4085_vm3, %v4958_v40, %v4964_v57 }
 0xc44   :  { %v4922_v19 = vpop.f32.mrf.mxu1 }
 0xc45   :  { %v4960_v35 = vadd.f32 %v4954_v45, %v4947_v48 }
 0xc47   :  { %v4965_v50 = vrot.slane %v4960_v35, 4 }
 0xc48   :  { %v4935_v53 = vpop.f32.mrf.mxu2 }
 0xc49   :  { %v4967_v58 = vsel %vm2937_vm0, %v4966_v54, %v4965_v50 }
 0xc4a   :  { %v4948_v46 = vpop.f32.mrf.mxu3  ;;  %4973 = vst.msk [vmem:[#allocation2] sm:$0x3f] %vm4972_vm8, %v4967_v58 }
 0xc4b   :  { %4984 = dma.vmem_to_hbm [thread:$0]  %s4980_s1, 96, %s4982_s24, [#allocation3]  }
 0xc4c   :  { %7520 = dma.done.wait [#allocation3], 96  }
 0xc4d   :  { %7521 = vsyncadd [#allocation3], 4294967200 }
 0xc4e   :  { %4989 = vsyncpa [#allocation3], 1 }

</bundles_post_ra>
